<compile_context>
chip_gen: v6e
topology: v6e:2x2x1
jax: 0.10.0
libtpu: 0.0.40
codegen_flags: <defaults>
</compile_context>

<pallas_src>
import jax
import jax.numpy as jnp
import numpy as np
from jax.experimental import pallas as pl
from jax.experimental.pallas import tpu as pltpu

# ---- module hyper-parameters (small, consistent with ResidualCouplingLayer) ----
INPUT_CHANNELS = 16          # -> half_channels = 8
INTERNAL_CHANNELS = 16       # WN hidden size
SPEAKER_CHANNELS = 16        # speaker_encoding_channels
KERNEL_SIZE = 5
DILATION_RATE = 1
NUM_WN_BLOCK = 4             # WN layers
HALF = INPUT_CHANNELS // 2

BATCH = 2
SEQ = 32


def make_kernel(reverse: bool, batch: int, seq: int):
    H, G = INTERNAL_CHANNELS, SPEAKER_CHANNELS
    K, DR, NL = KERNEL_SIZE, DILATION_RATE, NUM_WN_BLOCK
    T = seq
    BT = batch * seq
    C2 = 2 * H

    def kernel(xin_ref, wpp_ref, wcg_ref, wl_ref, bias_ref, out_ref):
        xin = xin_ref[...]                          # (BT, 2*HALF + G)
        x0 = xin[:, :HALF]                          # (BT, HALF)
        x1 = xin[:, HALF:2 * HALF]                  # (BT, HALF)
        spk = xin[:, 2 * HALF:]                     # (BT, G)

        bias = bias_ref[...]                        # (2*NL + 2, 2H)
        bpre = bias[0:1, :H]                        # (1, H)
        bpost = bias[2 * NL + 1:2 * NL + 2, :HALF]  # (1, HALF)

        wpre = wpp_ref[:HALF, :]                    # (HALF, H)
        wpost = wpp_ref[HALF:HALF + H, :HALF]       # (H, HALF)

        # pre: 1x1 conv over the flattened batch*time rows
        h = jnp.dot(x0, wpre, preferred_element_type=jnp.float32) + bpre

        # all speaker-conditioning 1x1 convs (every layer, both gates) in one
        # lane-dense matmul: (BT, G) @ (G, NL*2H = 128)
        g_all = jnp.dot(spk, wcg_ref[...], preferred_element_type=jnp.float32)

        # time index within each sample (batch is folded into rows); used to
        # zero conv taps that would leak across a sample boundary
        t_idx = jax.lax.broadcasted_iota(jnp.int32, (BT, 1), 0) % T

        # static shift offsets & per-shift validity masks (hoisted out of loop)
        shift_set = set()
        for i in range(NL):
            d = DR ** i
            for k in range(K):
                shift_set.add((k - (K - 1) // 2) * d)
        masks = {s: jnp.logical_and(t_idx + s >= 0, t_idx + s < T)
                 for s in shift_set if s != 0}

        out = jnp.zeros((BT, H), jnp.float32)
        for i in range(NL):
            d = DR ** i
            wl_i = wl_ref[i]                        # (K*H + H, 2H)
            w_gate = wl_i[:K * H, :]                # (K*H, 2H)
            w_rs = wl_i[K * H:, :]                  # (H, 2H)

            # (BT, K*H) tap matrix: time-shifted copies of h, kept in vregs
            taps = []
            for k in range(K):
                s = (k - (K - 1) // 2) * d
                if s == 0:
                    taps.append(h)
                else:
                    rolled = pltpu.roll(h, shift=(-s) % BT, axis=0)
                    taps.append(jnp.where(masks[s], rolled, 0.0))
            lhs = jnp.concatenate(taps, axis=-1)    # (BT, K*H)

            # fused dilated conv (all taps, tanh+sigmoid branches) in one dot
            z = jnp.dot(lhs, w_gate, preferred_element_type=jnp.float32)
            z = z + bias[1 + i:2 + i, :]            # conv + cond biases (pre-folded)
            z = z + g_all[:, i * C2:(i + 1) * C2]   # speaker conditioning
            acts = jnp.tanh(z[:, :H]) * jax.nn.sigmoid(z[:, H:])

            # fused res/skip 1x1 conv
            rs = jnp.dot(acts, w_rs, preferred_element_type=jnp.float32)
            rs = rs + bias[1 + NL + i:2 + NL + i, :]
            if i < NL - 1:
                h = h + rs[:, :H]
            out = out + rs[:, H:]

        # post: 1x1 conv, then coupling update
        post = jnp.dot(out, wpost, preferred_element_type=jnp.float32) + bpost
        x1n = x1 - post if reverse else x1 + post

        # packed output: [x0 | x1_new | wn_out]
        out_ref[...] = jnp.concatenate([x0, x1n, out], axis=-1)

    return kernel


def pack_params(params):
    """Fuse/pack the 16 logical parameter arrays into 4 slabs."""
    H, G = INTERNAL_CHANNELS, SPEAKER_CHANNELS
    K, NL = KERNEL_SIZE, NUM_WN_BLOCK
    C2 = 2 * H

    # pre / post 1x1 conv weights in one slab (post padded to H lanes)
    wpp = jnp.concatenate([
        params["wpre"],                                         # (HALF, H)
        jnp.pad(params["wpost"], ((0, 0), (0, H - HALF))),      # (H, H)
    ], axis=0)                                                  # (HALF+H, H)

    # per-layer slab: [stacked conv taps (tanh|sigmoid) ; res|skip 1x1]
    w_gate = jnp.concatenate([params["win_t"], params["win_s"]], axis=-1)  # (NL,K,H,2H)
    w_gate = w_gate.reshape(NL, K * H, C2)
    w_rs = jnp.concatenate([params["wres"], params["wskip"]], axis=-1)     # (NL,H,2H)
    wl = jnp.concatenate([w_gate, w_rs], axis=1)                           # (NL,K*H+H,2H)

    # speaker-conditioning convs for all layers & gates: (G, NL*2H) = (16, 128)
    wcg = jnp.concatenate([params["wcg_t"], params["wcg_s"]], axis=-1)     # (NL,G,2H)
    wcg = jnp.transpose(wcg, (1, 0, 2)).reshape(G, NL * C2)

    # biases: cond-conv biases folded into the gate biases
    def row(v):
        v = v.reshape(1, -1)
        return jnp.pad(v, ((0, 0), (0, C2 - v.shape[1])))

    b_gate = jnp.concatenate([params["bin_t"] + params["bcg_t"],
                              params["bin_s"] + params["bcg_s"]],
                             axis=-1).reshape(NL, C2)
    b_rs = jnp.concatenate([params["bres"], params["bskip"]],
                           axis=-1).reshape(NL, C2)
    bias = jnp.concatenate(
        [row(params["bpre"]), b_gate, b_rs, row(params["bpost"])], axis=0)  # (2NL+2, 2H)

    return wpp, wcg, wl, bias


def residual_coupling_layer(x, speaker, params, reverse=False):
    """x: (B, C, T), speaker: (B, G, T)  (PyTorch NCT layout).

    Returns (x_out (B, C, T), wn_out (B, T, hidden))."""
    B, C, T = x.shape
    assert C == INPUT_CHANNELS
    H, G = INTERNAL_CHANNELS, SPEAKER_CHANNELS
    BT = B * T

    # fold batch into rows; pack x0|x1|speaker into one lane-concatenated input
    xt = jnp.transpose(x, (0, 2, 1)).astype(jnp.float32).reshape(BT, C)
    st = jnp.transpose(speaker, (0, 2, 1)).astype(jnp.float32).reshape(BT, G)
    xin = jnp.concatenate([xt, st], axis=-1)            # (BT, C + G)

    wpp, wcg, wl, bias = pack_params(params)

    def full_spec(shape):
        nd = len(shape)
        return pl.BlockSpec(shape, lambda: (0,) * nd)

    operands = (xin, wpp, wcg, wl, bias)
    out = pl.pallas_call(
        make_kernel(reverse, B, T),
        out_shape=jax.ShapeDtypeStruct((BT, C + H), jnp.float32),
        in_specs=[full_spec(a.shape) for a in operands],
        out_specs=full_spec((BT, C + H)),
    )(*operands)

    x_out = jnp.transpose(out[:, :C].reshape(B, T, C), (0, 2, 1))   # (B, C, T)
    wn_out = out[:, C:].reshape(B, T, H)
    return x_out, wn_out


def reference_forward(x, speaker, params, reverse=False):
    """Pure-JAX reference of the same math (for verification)."""
    H = INTERNAL_CHANNELS
    K, DR, NL = KERNEL_SIZE, DILATION_RATE, NUM_WN_BLOCK
    B, C, T = x.shape
    xt = jnp.transpose(x, (0, 2, 1)).astype(jnp.float32)
    st = jnp.transpose(speaker, (0, 2, 1)).astype(jnp.float32)
    x0, x1 = xt[..., :HALF], xt[..., HALF:]

    h = x0 @ params["wpre"] + params["bpre"]
    out = jnp.zeros_like(h)
    for i in range(NL):
        d = DR ** i
        p = (K * d - d) // 2
        hp = jnp.pad(h, ((0, 0), (p, p), (0, 0)))
        xa = jnp.broadcast_to(params["bin_t"][i], (B, T, H)).astype(jnp.float32)
        xb = jnp.broadcast_to(params["bin_s"][i], (B, T, H)).astype(jnp.float32)
        for k in range(K):
            sl = hp[:, k * d:k * d + T, :]
            xa = xa + sl @ params["win_t"][i, k]
            xb = xb + sl @ params["win_s"][i, k]
        ga = st @ params["wcg_t"][i] + params["bcg_t"][i]
        gb = st @ params["wcg_s"][i] + params["bcg_s"][i]
        acts = jnp.tanh(xa + ga) * jax.nn.sigmoid(xb + gb)
        skip = acts @ params["wskip"][i] + params["bskip"][i]
        if i < NL - 1:
            h = h + (acts @ params["wres"][i] + params["bres"][i])
        out = out + skip

    post = out @ params["wpost"] + params["bpost"]
    x1n = x1 - post if reverse else x1 + post
    xo = jnp.concatenate([x0, x1n], axis=-1)
    return jnp.transpose(xo, (0, 2, 1)), out


def init_params(key):
    H, G, K, NL = INTERNAL_CHANNELS, SPEAKER_CHANNELS, KERNEL_SIZE, NUM_WN_BLOCK
    # NOTE: the PyTorch module zero-initializes post.weight / post.bias; the
    # forward math is identical for any value, so they are randomized here so
    # the post conv and the reverse branch are actually exercised by the test.
    shapes = {
        "wpre": (HALF, H), "bpre": (1, H),
        "wcg_t": (NL, G, H), "wcg_s": (NL, G, H),
        "bcg_t": (NL, 1, H), "bcg_s": (NL, 1, H),
        "win_t": (NL, K, H, H), "win_s": (NL, K, H, H),
        "bin_t": (NL, 1, H), "bin_s": (NL, 1, H),
        "wres": (NL, H, H), "wskip": (NL, H, H),
        "bres": (NL, 1, H), "bskip": (NL, 1, H),
        "wpost": (H, HALF), "bpost": (1, HALF),
    }
    params = {}
    keys = jax.random.split(key, len(shapes))
    for k_, (name, shp) in zip(keys, shapes.items()):
        scale = 0.1 if name.startswith("w") else 0.01
        params[name] = (scale * jax.random.normal(k_, shp)).astype(jnp.float32)
    return params


if __name__ == "__main__":
    key = jax.random.PRNGKey(0)
    kx, ks, kp = jax.random.split(key, 3)
    x = jax.random.normal(kx, (BATCH, INPUT_CHANNELS, SEQ), jnp.float32)
    speaker = jax.random.normal(ks, (BATCH, SPEAKER_CHANNELS, SEQ), jnp.float32)
    params = init_params(kp)

    for reverse in (False, True):
        y, wn_out = residual_coupling_layer(x, speaker, params, reverse=reverse)
        y = jax.block_until_ready(y)
        wn_out = jax.block_until_ready(wn_out)

        y_ref, wn_ref = reference_forward(x, speaker, params, reverse=reverse)
        np.testing.assert_allclose(np.asarray(y), np.asarray(y_ref),
                                   rtol=1e-4, atol=1e-4)
        np.testing.assert_allclose(np.asarray(wn_out), np.asarray(wn_ref),
                                   rtol=1e-4, atol=1e-4)

    print("KERNEL_OK")
</pallas_src>

<mosaic_0001>
module attributes {stable_mosaic.version = 11 : i64} {
  func.func @kernel(%arg0: memref<64x32xf32, #tpu.memory_space<vmem>>, %arg1: memref<24x16xf32, #tpu.memory_space<vmem>>, %arg2: memref<16x128xf32, #tpu.memory_space<vmem>>, %arg3: memref<4x96x32xf32, #tpu.memory_space<vmem>>, %arg4: memref<10x32xf32, #tpu.memory_space<vmem>>, %arg5: memref<64x32xf32, #tpu.memory_space<vmem>>) attributes {dimension_semantics = [], scalar_prefetch = 0 : i64, scratch_operands = 0 : i64, tpu.core_type = #tpu.core_type<tc>} {
    %c0 = arith.constant 0 : index
    %c0_0 = arith.constant 0 : index
    %0 = vector.load %arg0[%c0, %c0_0] : memref<64x32xf32, #tpu.memory_space<vmem>>, vector<64x32xf32>
    %1 = vector.extract_strided_slice %0 {offsets = [0, 0], sizes = [64, 8], strides = [1, 1]} : vector<64x32xf32> to vector<64x8xf32>
    %2 = vector.extract_strided_slice %0 {offsets = [0, 8], sizes = [64, 8], strides = [1, 1]} : vector<64x32xf32> to vector<64x8xf32>
    %3 = vector.extract_strided_slice %0 {offsets = [0, 16], sizes = [64, 16], strides = [1, 1]} : vector<64x32xf32> to vector<64x16xf32>
    %c0_1 = arith.constant 0 : index
    %c0_2 = arith.constant 0 : index
    %4 = vector.load %arg4[%c0_1, %c0_2] : memref<10x32xf32, #tpu.memory_space<vmem>>, vector<10x32xf32>
    %5 = vector.extract_strided_slice %4 {offsets = [0, 0], sizes = [1, 16], strides = [1, 1]} : vector<10x32xf32> to vector<1x16xf32>
    %6 = vector.extract_strided_slice %4 {offsets = [9, 0], sizes = [1, 8], strides = [1, 1]} : vector<10x32xf32> to vector<1x8xf32>
    %c0_3 = arith.constant 0 : index
    %c0_4 = arith.constant 0 : index
    %7 = vector.load %arg1[%c0_3, %c0_4] : memref<24x16xf32, #tpu.memory_space<vmem>>, vector<8x16xf32>
    %c8 = arith.constant 8 : index
    %c0_5 = arith.constant 0 : index
    %8 = vector.load %arg1[%c8, %c0_5] : memref<24x16xf32, #tpu.memory_space<vmem>>, vector<16x8xf32>
    %cst = arith.constant dense<0.000000e+00> : vector<64x16xf32>
    %9 = tpu.matmul %1, %7, %cst {dimension_numbers = #tpu.dot_dimension_numbers<[1], [0], [0], [1], [0, 0, 1, 1], [], []>} : vector<64x8xf32>, vector<8x16xf32>, vector<64x16xf32> -> vector<64x16xf32>
    %10 = vector.broadcast %5 : vector<1x16xf32> to vector<64x16xf32>
    %11 = arith.addf %9, %10 : vector<64x16xf32>
    %c0_6 = arith.constant 0 : index
    %c0_7 = arith.constant 0 : index
    %12 = vector.load %arg2[%c0_6, %c0_7] : memref<16x128xf32, #tpu.memory_space<vmem>>, vector<16x128xf32>
    %cst_8 = arith.constant dense<0.000000e+00> : vector<64x128xf32>
    %13 = tpu.matmul %3, %12, %cst_8 {dimension_numbers = #tpu.dot_dimension_numbers<[1], [0], [0], [1], [0, 0, 1, 1], [], []>} : vector<64x16xf32>, vector<16x128xf32>, vector<64x128xf32> -> vector<64x128xf32>
    %14 = tpu.iota {dimensions = array<i32: 0>} : vector<64x1xi32>
    %c32_i32 = arith.constant 32 : i32
    %c0_i32 = arith.constant 0 : i32
    %15 = arith.cmpi eq, %c32_i32, %c0_i32 : i32
    %c1_i32 = arith.constant 1 : i32
    %16 = arith.select %15, %c1_i32, %c32_i32 : i32
    %17 = vector.broadcast %16 : i32 to vector<64x1xi32>
    %18 = arith.remsi %14, %17 : vector<64x1xi32>
    %c0_i32_9 = arith.constant 0 : i32
    %19 = vector.broadcast %c0_i32_9 : i32 to vector<64x1xi32>
    %20 = arith.cmpi ne, %18, %19 : vector<64x1xi32>
    %c0_i32_10 = arith.constant 0 : i32
    %21 = vector.broadcast %c0_i32_10 : i32 to vector<64x1xi32>
    %22 = arith.cmpi slt, %18, %21 : vector<64x1xi32>
    %c0_i32_11 = arith.constant 0 : i32
    %23 = arith.cmpi slt, %16, %c0_i32_11 : i32
    %24 = vector.broadcast %23 : i1 to vector<64x1xi1>
    %25 = vector.broadcast %24 : vector<64x1xi1> to vector<64x1xi1>
    %26 = arith.xori %22, %25 : vector<64x1xi1>
    %27 = arith.andi %26, %20 : vector<64x1xi1>
    %28 = vector.broadcast %16 : i32 to vector<64x1xi32>
    %29 = arith.addi %18, %28 : vector<64x1xi32>
    %30 = arith.select %27, %29, %18 : vector<64x1xi1>, vector<64x1xi32>
    %c1_i32_12 = arith.constant 1 : i32
    %31 = vector.broadcast %c1_i32_12 : i32 to vector<64x1xi32>
    %32 = arith.addi %30, %31 : vector<64x1xi32>
    %c0_i32_13 = arith.constant 0 : i32
    %33 = vector.broadcast %c0_i32_13 : i32 to vector<64x1xi32>
    %34 = arith.cmpi sge, %32, %33 : vector<64x1xi32>
    %c1_i32_14 = arith.constant 1 : i32
    %35 = vector.broadcast %c1_i32_14 : i32 to vector<64x1xi32>
    %36 = arith.addi %30, %35 : vector<64x1xi32>
    %c32_i32_15 = arith.constant 32 : i32
    %37 = vector.broadcast %c32_i32_15 : i32 to vector<64x1xi32>
    %38 = arith.cmpi slt, %36, %37 : vector<64x1xi32>
    %39 = arith.andi %34, %38 : vector<64x1xi1>
    %c2_i32 = arith.constant 2 : i32
    %40 = vector.broadcast %c2_i32 : i32 to vector<64x1xi32>
    %41 = arith.addi %30, %40 : vector<64x1xi32>
    %c0_i32_16 = arith.constant 0 : i32
    %42 = vector.broadcast %c0_i32_16 : i32 to vector<64x1xi32>
    %43 = arith.cmpi sge, %41, %42 : vector<64x1xi32>
    %c2_i32_17 = arith.constant 2 : i32
    %44 = vector.broadcast %c2_i32_17 : i32 to vector<64x1xi32>
    %45 = arith.addi %30, %44 : vector<64x1xi32>
    %c32_i32_18 = arith.constant 32 : i32
    %46 = vector.broadcast %c32_i32_18 : i32 to vector<64x1xi32>
    %47 = arith.cmpi slt, %45, %46 : vector<64x1xi32>
    %48 = arith.andi %43, %47 : vector<64x1xi1>
    %c-1_i32 = arith.constant -1 : i32
    %49 = vector.broadcast %c-1_i32 : i32 to vector<64x1xi32>
    %50 = arith.addi %30, %49 : vector<64x1xi32>
    %c0_i32_19 = arith.constant 0 : i32
    %51 = vector.broadcast %c0_i32_19 : i32 to vector<64x1xi32>
    %52 = arith.cmpi sge, %50, %51 : vector<64x1xi32>
    %c-1_i32_20 = arith.constant -1 : i32
    %53 = vector.broadcast %c-1_i32_20 : i32 to vector<64x1xi32>
    %54 = arith.addi %30, %53 : vector<64x1xi32>
    %c32_i32_21 = arith.constant 32 : i32
    %55 = vector.broadcast %c32_i32_21 : i32 to vector<64x1xi32>
    %56 = arith.cmpi slt, %54, %55 : vector<64x1xi32>
    %57 = arith.andi %52, %56 : vector<64x1xi1>
    %c-2_i32 = arith.constant -2 : i32
    %58 = vector.broadcast %c-2_i32 : i32 to vector<64x1xi32>
    %59 = arith.addi %30, %58 : vector<64x1xi32>
    %c0_i32_22 = arith.constant 0 : i32
    %60 = vector.broadcast %c0_i32_22 : i32 to vector<64x1xi32>
    %61 = arith.cmpi sge, %59, %60 : vector<64x1xi32>
    %c-2_i32_23 = arith.constant -2 : i32
    %62 = vector.broadcast %c-2_i32_23 : i32 to vector<64x1xi32>
    %63 = arith.addi %30, %62 : vector<64x1xi32>
    %c32_i32_24 = arith.constant 32 : i32
    %64 = vector.broadcast %c32_i32_24 : i32 to vector<64x1xi32>
    %65 = arith.cmpi slt, %63, %64 : vector<64x1xi32>
    %66 = arith.andi %61, %65 : vector<64x1xi1>
    %cst_25 = arith.constant 0.000000e+00 : f32
    %67 = vector.broadcast %cst_25 : f32 to vector<64x16xf32>
    %c0_26 = arith.constant 0 : index
    %c0_27 = arith.constant 0 : index
    %c0_28 = arith.constant 0 : index
    %68 = vector.load %arg3[%c0_26, %c0_27, %c0_28] : memref<4x96x32xf32, #tpu.memory_space<vmem>>, vector<1x96x32xf32>
    %69 = vector.shape_cast %68 : vector<1x96x32xf32> to vector<96x32xf32>
    %70 = vector.extract_strided_slice %69 {offsets = [0, 0], sizes = [80, 32], strides = [1, 1]} : vector<96x32xf32> to vector<80x32xf32>
    %71 = vector.extract_strided_slice %69 {offsets = [80, 0], sizes = [16, 32], strides = [1, 1]} : vector<96x32xf32> to vector<16x32xf32>
    %c2_i32_29 = arith.constant 2 : i32
    %72 = tpu.dynamic_rotate %11 by %c2_i32_29 dim 0 : vector<64x16xf32>, i32 -> vector<64x16xf32>
    %cst_30 = arith.constant 0.000000e+00 : f32
    %73 = vector.shape_cast %66 : vector<64x1xi1> to vector<64x1xi1>
    %74 = vector.broadcast %73 : vector<64x1xi1> to vector<64x16xi1>
    %75 = vector.broadcast %cst_30 : f32 to vector<64x16xf32>
    %76 = arith.select %74, %72, %75 : vector<64x16xi1>, vector<64x16xf32>
    %c1_i32_31 = arith.constant 1 : i32
    %77 = tpu.dynamic_rotate %11 by %c1_i32_31 dim 0 : vector<64x16xf32>, i32 -> vector<64x16xf32>
    %cst_32 = arith.constant 0.000000e+00 : f32
    %78 = vector.shape_cast %57 : vector<64x1xi1> to vector<64x1xi1>
    %79 = vector.broadcast %78 : vector<64x1xi1> to vector<64x16xi1>
    %80 = vector.broadcast %cst_32 : f32 to vector<64x16xf32>
    %81 = arith.select %79, %77, %80 : vector<64x16xi1>, vector<64x16xf32>
    %c63_i32 = arith.constant 63 : i32
    %82 = tpu.dynamic_rotate %11 by %c63_i32 dim 0 : vector<64x16xf32>, i32 -> vector<64x16xf32>
    %cst_33 = arith.constant 0.000000e+00 : f32
    %83 = vector.shape_cast %39 : vector<64x1xi1> to vector<64x1xi1>
    %84 = vector.broadcast %83 : vector<64x1xi1> to vector<64x16xi1>
    %85 = vector.broadcast %cst_33 : f32 to vector<64x16xf32>
    %86 = arith.select %84, %82, %85 : vector<64x16xi1>, vector<64x16xf32>
    %c62_i32 = arith.constant 62 : i32
    %87 = tpu.dynamic_rotate %11 by %c62_i32 dim 0 : vector<64x16xf32>, i32 -> vector<64x16xf32>
    %cst_34 = arith.constant 0.000000e+00 : f32
    %88 = vector.shape_cast %48 : vector<64x1xi1> to vector<64x1xi1>
    %89 = vector.broadcast %88 : vector<64x1xi1> to vector<64x16xi1>
    %90 = vector.broadcast %cst_34 : f32 to vector<64x16xf32>
    %91 = arith.select %89, %87, %90 : vector<64x16xi1>, vector<64x16xf32>
    %92 = tpu.concatenate %76, %81, %11, %86, %91 in 1 : vector<64x16xf32>, vector<64x16xf32>, vector<64x16xf32>, vector<64x16xf32>, vector<64x16xf32> -> vector<64x80xf32>
    %cst_35 = arith.constant dense<0.000000e+00> : vector<64x32xf32>
    %93 = tpu.matmul %92, %70, %cst_35 {dimension_numbers = #tpu.dot_dimension_numbers<[1], [0], [0], [1], [0, 0, 1, 1], [], []>} : vector<64x80xf32>, vector<80x32xf32>, vector<64x32xf32> -> vector<64x32xf32>
    %94 = vector.extract_strided_slice %4 {offsets = [1, 0], sizes = [1, 32], strides = [1, 1]} : vector<10x32xf32> to vector<1x32xf32>
    %95 = vector.broadcast %94 : vector<1x32xf32> to vector<64x32xf32>
    %96 = arith.addf %93, %95 : vector<64x32xf32>
    %97 = vector.extract_strided_slice %13 {offsets = [0, 0], sizes = [64, 32], strides = [1, 1]} : vector<64x128xf32> to vector<64x32xf32>
    %98 = arith.addf %96, %97 : vector<64x32xf32>
    %99 = vector.extract_strided_slice %98 {offsets = [0, 0], sizes = [64, 16], strides = [1, 1]} : vector<64x32xf32> to vector<64x16xf32>
    %100 = math.tanh %99 : vector<64x16xf32>
    %101 = vector.extract_strided_slice %98 {offsets = [0, 16], sizes = [64, 16], strides = [1, 1]} : vector<64x32xf32> to vector<64x16xf32>
    %102 = arith.negf %101 : vector<64x16xf32>
    %103 = math.exp %102 : vector<64x16xf32>
    %cst_36 = arith.constant 1.000000e+00 : f32
    %104 = vector.broadcast %cst_36 : f32 to vector<64x16xf32>
    %105 = arith.addf %104, %103 : vector<64x16xf32>
    %106 = arith.divf %104, %105 : vector<64x16xf32>
    %107 = arith.mulf %100, %106 : vector<64x16xf32>
    %cst_37 = arith.constant dense<0.000000e+00> : vector<64x32xf32>
    %108 = tpu.matmul %107, %71, %cst_37 {dimension_numbers = #tpu.dot_dimension_numbers<[1], [0], [0], [1], [0, 0, 1, 1], [], []>} : vector<64x16xf32>, vector<16x32xf32>, vector<64x32xf32> -> vector<64x32xf32>
    %109 = vector.extract_strided_slice %4 {offsets = [5, 0], sizes = [1, 32], strides = [1, 1]} : vector<10x32xf32> to vector<1x32xf32>
    %110 = vector.broadcast %109 : vector<1x32xf32> to vector<64x32xf32>
    %111 = arith.addf %108, %110 : vector<64x32xf32>
    %112 = vector.extract_strided_slice %111 {offsets = [0, 0], sizes = [64, 16], strides = [1, 1]} : vector<64x32xf32> to vector<64x16xf32>
    %113 = arith.addf %11, %112 : vector<64x16xf32>
    %114 = vector.extract_strided_slice %111 {offsets = [0, 16], sizes = [64, 16], strides = [1, 1]} : vector<64x32xf32> to vector<64x16xf32>
    %115 = arith.addf %67, %114 : vector<64x16xf32>
    %c1 = arith.constant 1 : index
    %c0_38 = arith.constant 0 : index
    %c0_39 = arith.constant 0 : index
    %116 = vector.load %arg3[%c1, %c0_38, %c0_39] : memref<4x96x32xf32, #tpu.memory_space<vmem>>, vector<1x96x32xf32>
    %117 = vector.shape_cast %116 : vector<1x96x32xf32> to vector<96x32xf32>
    %118 = vector.extract_strided_slice %117 {offsets = [0, 0], sizes = [80, 32], strides = [1, 1]} : vector<96x32xf32> to vector<80x32xf32>
    %119 = vector.extract_strided_slice %117 {offsets = [80, 0], sizes = [16, 32], strides = [1, 1]} : vector<96x32xf32> to vector<16x32xf32>
    %c2_i32_40 = arith.constant 2 : i32
    %120 = tpu.dynamic_rotate %113 by %c2_i32_40 dim 0 : vector<64x16xf32>, i32 -> vector<64x16xf32>
    %cst_41 = arith.constant 0.000000e+00 : f32
    %121 = vector.shape_cast %66 : vector<64x1xi1> to vector<64x1xi1>
    %122 = vector.broadcast %121 : vector<64x1xi1> to vector<64x16xi1>
    %123 = vector.broadcast %cst_41 : f32 to vector<64x16xf32>
    %124 = arith.select %122, %120, %123 : vector<64x16xi1>, vector<64x16xf32>
    %c1_i32_42 = arith.constant 1 : i32
    %125 = tpu.dynamic_rotate %113 by %c1_i32_42 dim 0 : vector<64x16xf32>, i32 -> vector<64x16xf32>
    %cst_43 = arith.constant 0.000000e+00 : f32
    %126 = vector.shape_cast %57 : vector<64x1xi1> to vector<64x1xi1>
    %127 = vector.broadcast %126 : vector<64x1xi1> to vector<64x16xi1>
    %128 = vector.broadcast %cst_43 : f32 to vector<64x16xf32>
    %129 = arith.select %127, %125, %128 : vector<64x16xi1>, vector<64x16xf32>
    %c63_i32_44 = arith.constant 63 : i32
    %130 = tpu.dynamic_rotate %113 by %c63_i32_44 dim 0 : vector<64x16xf32>, i32 -> vector<64x16xf32>
    %cst_45 = arith.constant 0.000000e+00 : f32
    %131 = vector.shape_cast %39 : vector<64x1xi1> to vector<64x1xi1>
    %132 = vector.broadcast %131 : vector<64x1xi1> to vector<64x16xi1>
    %133 = vector.broadcast %cst_45 : f32 to vector<64x16xf32>
    %134 = arith.select %132, %130, %133 : vector<64x16xi1>, vector<64x16xf32>
    %c62_i32_46 = arith.constant 62 : i32
    %135 = tpu.dynamic_rotate %113 by %c62_i32_46 dim 0 : vector<64x16xf32>, i32 -> vector<64x16xf32>
    %cst_47 = arith.constant 0.000000e+00 : f32
    %136 = vector.shape_cast %48 : vector<64x1xi1> to vector<64x1xi1>
    %137 = vector.broadcast %136 : vector<64x1xi1> to vector<64x16xi1>
    %138 = vector.broadcast %cst_47 : f32 to vector<64x16xf32>
    %139 = arith.select %137, %135, %138 : vector<64x16xi1>, vector<64x16xf32>
    %140 = tpu.concatenate %124, %129, %113, %134, %139 in 1 : vector<64x16xf32>, vector<64x16xf32>, vector<64x16xf32>, vector<64x16xf32>, vector<64x16xf32> -> vector<64x80xf32>
    %cst_48 = arith.constant dense<0.000000e+00> : vector<64x32xf32>
    %141 = tpu.matmul %140, %118, %cst_48 {dimension_numbers = #tpu.dot_dimension_numbers<[1], [0], [0], [1], [0, 0, 1, 1], [], []>} : vector<64x80xf32>, vector<80x32xf32>, vector<64x32xf32> -> vector<64x32xf32>
    %142 = vector.extract_strided_slice %4 {offsets = [2, 0], sizes = [1, 32], strides = [1, 1]} : vector<10x32xf32> to vector<1x32xf32>
    %143 = vector.broadcast %142 : vector<1x32xf32> to vector<64x32xf32>
    %144 = arith.addf %141, %143 : vector<64x32xf32>
    %145 = vector.extract_strided_slice %13 {offsets = [0, 32], sizes = [64, 32], strides = [1, 1]} : vector<64x128xf32> to vector<64x32xf32>
    %146 = arith.addf %144, %145 : vector<64x32xf32>
    %147 = vector.extract_strided_slice %146 {offsets = [0, 0], sizes = [64, 16], strides = [1, 1]} : vector<64x32xf32> to vector<64x16xf32>
    %148 = math.tanh %147 : vector<64x16xf32>
    %149 = vector.extract_strided_slice %146 {offsets = [0, 16], sizes = [64, 16], strides = [1, 1]} : vector<64x32xf32> to vector<64x16xf32>
    %150 = arith.negf %149 : vector<64x16xf32>
    %151 = math.exp %150 : vector<64x16xf32>
    %cst_49 = arith.constant 1.000000e+00 : f32
    %152 = vector.broadcast %cst_49 : f32 to vector<64x16xf32>
    %153 = arith.addf %152, %151 : vector<64x16xf32>
    %154 = arith.divf %152, %153 : vector<64x16xf32>
    %155 = arith.mulf %148, %154 : vector<64x16xf32>
    %cst_50 = arith.constant dense<0.000000e+00> : vector<64x32xf32>
    %156 = tpu.matmul %155, %119, %cst_50 {dimension_numbers = #tpu.dot_dimension_numbers<[1], [0], [0], [1], [0, 0, 1, 1], [], []>} : vector<64x16xf32>, vector<16x32xf32>, vector<64x32xf32> -> vector<64x32xf32>
    %157 = vector.extract_strided_slice %4 {offsets = [6, 0], sizes = [1, 32], strides = [1, 1]} : vector<10x32xf32> to vector<1x32xf32>
    %158 = vector.broadcast %157 : vector<1x32xf32> to vector<64x32xf32>
    %159 = arith.addf %156, %158 : vector<64x32xf32>
    %160 = vector.extract_strided_slice %159 {offsets = [0, 0], sizes = [64, 16], strides = [1, 1]} : vector<64x32xf32> to vector<64x16xf32>
    %161 = arith.addf %113, %160 : vector<64x16xf32>
    %162 = vector.extract_strided_slice %159 {offsets = [0, 16], sizes = [64, 16], strides = [1, 1]} : vector<64x32xf32> to vector<64x16xf32>
    %163 = arith.addf %115, %162 : vector<64x16xf32>
    %c2 = arith.constant 2 : index
    %c0_51 = arith.constant 0 : index
    %c0_52 = arith.constant 0 : index
    %164 = vector.load %arg3[%c2, %c0_51, %c0_52] : memref<4x96x32xf32, #tpu.memory_space<vmem>>, vector<1x96x32xf32>
    %165 = vector.shape_cast %164 : vector<1x96x32xf32> to vector<96x32xf32>
    %166 = vector.extract_strided_slice %165 {offsets = [0, 0], sizes = [80, 32], strides = [1, 1]} : vector<96x32xf32> to vector<80x32xf32>
    %167 = vector.extract_strided_slice %165 {offsets = [80, 0], sizes = [16, 32], strides = [1, 1]} : vector<96x32xf32> to vector<16x32xf32>
    %c2_i32_53 = arith.constant 2 : i32
    %168 = tpu.dynamic_rotate %161 by %c2_i32_53 dim 0 : vector<64x16xf32>, i32 -> vector<64x16xf32>
    %cst_54 = arith.constant 0.000000e+00 : f32
    %169 = vector.shape_cast %66 : vector<64x1xi1> to vector<64x1xi1>
    %170 = vector.broadcast %169 : vector<64x1xi1> to vector<64x16xi1>
    %171 = vector.broadcast %cst_54 : f32 to vector<64x16xf32>
    %172 = arith.select %170, %168, %171 : vector<64x16xi1>, vector<64x16xf32>
    %c1_i32_55 = arith.constant 1 : i32
    %173 = tpu.dynamic_rotate %161 by %c1_i32_55 dim 0 : vector<64x16xf32>, i32 -> vector<64x16xf32>
    %cst_56 = arith.constant 0.000000e+00 : f32
    %174 = vector.shape_cast %57 : vector<64x1xi1> to vector<64x1xi1>
    %175 = vector.broadcast %174 : vector<64x1xi1> to vector<64x16xi1>
    %176 = vector.broadcast %cst_56 : f32 to vector<64x16xf32>
    %177 = arith.select %175, %173, %176 : vector<64x16xi1>, vector<64x16xf32>
    %c63_i32_57 = arith.constant 63 : i32
    %178 = tpu.dynamic_rotate %161 by %c63_i32_57 dim 0 : vector<64x16xf32>, i32 -> vector<64x16xf32>
    %cst_58 = arith.constant 0.000000e+00 : f32
    %179 = vector.shape_cast %39 : vector<64x1xi1> to vector<64x1xi1>
    %180 = vector.broadcast %179 : vector<64x1xi1> to vector<64x16xi1>
    %181 = vector.broadcast %cst_58 : f32 to vector<64x16xf32>
    %182 = arith.select %180, %178, %181 : vector<64x16xi1>, vector<64x16xf32>
    %c62_i32_59 = arith.constant 62 : i32
    %183 = tpu.dynamic_rotate %161 by %c62_i32_59 dim 0 : vector<64x16xf32>, i32 -> vector<64x16xf32>
    %cst_60 = arith.constant 0.000000e+00 : f32
    %184 = vector.shape_cast %48 : vector<64x1xi1> to vector<64x1xi1>
    %185 = vector.broadcast %184 : vector<64x1xi1> to vector<64x16xi1>
    %186 = vector.broadcast %cst_60 : f32 to vector<64x16xf32>
    %187 = arith.select %185, %183, %186 : vector<64x16xi1>, vector<64x16xf32>
    %188 = tpu.concatenate %172, %177, %161, %182, %187 in 1 : vector<64x16xf32>, vector<64x16xf32>, vector<64x16xf32>, vector<64x16xf32>, vector<64x16xf32> -> vector<64x80xf32>
    %cst_61 = arith.constant dense<0.000000e+00> : vector<64x32xf32>
    %189 = tpu.matmul %188, %166, %cst_61 {dimension_numbers = #tpu.dot_dimension_numbers<[1], [0], [0], [1], [0, 0, 1, 1], [], []>} : vector<64x80xf32>, vector<80x32xf32>, vector<64x32xf32> -> vector<64x32xf32>
    %190 = vector.extract_strided_slice %4 {offsets = [3, 0], sizes = [1, 32], strides = [1, 1]} : vector<10x32xf32> to vector<1x32xf32>
    %191 = vector.broadcast %190 : vector<1x32xf32> to vector<64x32xf32>
    %192 = arith.addf %189, %191 : vector<64x32xf32>
    %193 = vector.extract_strided_slice %13 {offsets = [0, 64], sizes = [64, 32], strides = [1, 1]} : vector<64x128xf32> to vector<64x32xf32>
    %194 = arith.addf %192, %193 : vector<64x32xf32>
    %195 = vector.extract_strided_slice %194 {offsets = [0, 0], sizes = [64, 16], strides = [1, 1]} : vector<64x32xf32> to vector<64x16xf32>
    %196 = math.tanh %195 : vector<64x16xf32>
    %197 = vector.extract_strided_slice %194 {offsets = [0, 16], sizes = [64, 16], strides = [1, 1]} : vector<64x32xf32> to vector<64x16xf32>
    %198 = arith.negf %197 : vector<64x16xf32>
    %199 = math.exp %198 : vector<64x16xf32>
    %cst_62 = arith.constant 1.000000e+00 : f32
    %200 = vector.broadcast %cst_62 : f32 to vector<64x16xf32>
    %201 = arith.addf %200, %199 : vector<64x16xf32>
    %202 = arith.divf %200, %201 : vector<64x16xf32>
    %203 = arith.mulf %196, %202 : vector<64x16xf32>
    %cst_63 = arith.constant dense<0.000000e+00> : vector<64x32xf32>
    %204 = tpu.matmul %203, %167, %cst_63 {dimension_numbers = #tpu.dot_dimension_numbers<[1], [0], [0], [1], [0, 0, 1, 1], [], []>} : vector<64x16xf32>, vector<16x32xf32>, vector<64x32xf32> -> vector<64x32xf32>
    %205 = vector.extract_strided_slice %4 {offsets = [7, 0], sizes = [1, 32], strides = [1, 1]} : vector<10x32xf32> to vector<1x32xf32>
    %206 = vector.broadcast %205 : vector<1x32xf32> to vector<64x32xf32>
    %207 = arith.addf %204, %206 : vector<64x32xf32>
    %208 = vector.extract_strided_slice %207 {offsets = [0, 0], sizes = [64, 16], strides = [1, 1]} : vector<64x32xf32> to vector<64x16xf32>
    %209 = arith.addf %161, %208 : vector<64x16xf32>
    %210 = vector.extract_strided_slice %207 {offsets = [0, 16], sizes = [64, 16], strides = [1, 1]} : vector<64x32xf32> to vector<64x16xf32>
    %211 = arith.addf %163, %210 : vector<64x16xf32>
    %c3 = arith.constant 3 : index
    %c0_64 = arith.constant 0 : index
    %c0_65 = arith.constant 0 : index
    %212 = vector.load %arg3[%c3, %c0_64, %c0_65] : memref<4x96x32xf32, #tpu.memory_space<vmem>>, vector<1x96x32xf32>
    %213 = vector.shape_cast %212 : vector<1x96x32xf32> to vector<96x32xf32>
    %214 = vector.extract_strided_slice %213 {offsets = [0, 0], sizes = [80, 32], strides = [1, 1]} : vector<96x32xf32> to vector<80x32xf32>
    %215 = vector.extract_strided_slice %213 {offsets = [80, 0], sizes = [16, 32], strides = [1, 1]} : vector<96x32xf32> to vector<16x32xf32>
    %c2_i32_66 = arith.constant 2 : i32
    %216 = tpu.dynamic_rotate %209 by %c2_i32_66 dim 0 : vector<64x16xf32>, i32 -> vector<64x16xf32>
    %cst_67 = arith.constant 0.000000e+00 : f32
    %217 = vector.shape_cast %66 : vector<64x1xi1> to vector<64x1xi1>
    %218 = vector.broadcast %217 : vector<64x1xi1> to vector<64x16xi1>
    %219 = vector.broadcast %cst_67 : f32 to vector<64x16xf32>
    %220 = arith.select %218, %216, %219 : vector<64x16xi1>, vector<64x16xf32>
    %c1_i32_68 = arith.constant 1 : i32
    %221 = tpu.dynamic_rotate %209 by %c1_i32_68 dim 0 : vector<64x16xf32>, i32 -> vector<64x16xf32>
    %cst_69 = arith.constant 0.000000e+00 : f32
    %222 = vector.shape_cast %57 : vector<64x1xi1> to vector<64x1xi1>
    %223 = vector.broadcast %222 : vector<64x1xi1> to vector<64x16xi1>
    %224 = vector.broadcast %cst_69 : f32 to vector<64x16xf32>
    %225 = arith.select %223, %221, %224 : vector<64x16xi1>, vector<64x16xf32>
    %c63_i32_70 = arith.constant 63 : i32
    %226 = tpu.dynamic_rotate %209 by %c63_i32_70 dim 0 : vector<64x16xf32>, i32 -> vector<64x16xf32>
    %cst_71 = arith.constant 0.000000e+00 : f32
    %227 = vector.shape_cast %39 : vector<64x1xi1> to vector<64x1xi1>
    %228 = vector.broadcast %227 : vector<64x1xi1> to vector<64x16xi1>
    %229 = vector.broadcast %cst_71 : f32 to vector<64x16xf32>
    %230 = arith.select %228, %226, %229 : vector<64x16xi1>, vector<64x16xf32>
    %c62_i32_72 = arith.constant 62 : i32
    %231 = tpu.dynamic_rotate %209 by %c62_i32_72 dim 0 : vector<64x16xf32>, i32 -> vector<64x16xf32>
    %cst_73 = arith.constant 0.000000e+00 : f32
    %232 = vector.shape_cast %48 : vector<64x1xi1> to vector<64x1xi1>
    %233 = vector.broadcast %232 : vector<64x1xi1> to vector<64x16xi1>
    %234 = vector.broadcast %cst_73 : f32 to vector<64x16xf32>
    %235 = arith.select %233, %231, %234 : vector<64x16xi1>, vector<64x16xf32>
    %236 = tpu.concatenate %220, %225, %209, %230, %235 in 1 : vector<64x16xf32>, vector<64x16xf32>, vector<64x16xf32>, vector<64x16xf32>, vector<64x16xf32> -> vector<64x80xf32>
    %cst_74 = arith.constant dense<0.000000e+00> : vector<64x32xf32>
    %237 = tpu.matmul %236, %214, %cst_74 {dimension_numbers = #tpu.dot_dimension_numbers<[1], [0], [0], [1], [0, 0, 1, 1], [], []>} : vector<64x80xf32>, vector<80x32xf32>, vector<64x32xf32> -> vector<64x32xf32>
    %238 = vector.extract_strided_slice %4 {offsets = [4, 0], sizes = [1, 32], strides = [1, 1]} : vector<10x32xf32> to vector<1x32xf32>
    %239 = vector.broadcast %238 : vector<1x32xf32> to vector<64x32xf32>
    %240 = arith.addf %237, %239 : vector<64x32xf32>
    %241 = vector.extract_strided_slice %13 {offsets = [0, 96], sizes = [64, 32], strides = [1, 1]} : vector<64x128xf32> to vector<64x32xf32>
    %242 = arith.addf %240, %241 : vector<64x32xf32>
    %243 = vector.extract_strided_slice %242 {offsets = [0, 0], sizes = [64, 16], strides = [1, 1]} : vector<64x32xf32> to vector<64x16xf32>
    %244 = math.tanh %243 : vector<64x16xf32>
    %245 = vector.extract_strided_slice %242 {offsets = [0, 16], sizes = [64, 16], strides = [1, 1]} : vector<64x32xf32> to vector<64x16xf32>
    %246 = arith.negf %245 : vector<64x16xf32>
    %247 = math.exp %246 : vector<64x16xf32>
    %cst_75 = arith.constant 1.000000e+00 : f32
    %248 = vector.broadcast %cst_75 : f32 to vector<64x16xf32>
    %249 = arith.addf %248, %247 : vector<64x16xf32>
    %250 = arith.divf %248, %249 : vector<64x16xf32>
    %251 = arith.mulf %244, %250 : vector<64x16xf32>
    %cst_76 = arith.constant dense<0.000000e+00> : vector<64x32xf32>
    %252 = tpu.matmul %251, %215, %cst_76 {dimension_numbers = #tpu.dot_dimension_numbers<[1], [0], [0], [1], [0, 0, 1, 1], [], []>} : vector<64x16xf32>, vector<16x32xf32>, vector<64x32xf32> -> vector<64x32xf32>
    %253 = vector.extract_strided_slice %4 {offsets = [8, 0], sizes = [1, 32], strides = [1, 1]} : vector<10x32xf32> to vector<1x32xf32>
    %254 = vector.broadcast %253 : vector<1x32xf32> to vector<64x32xf32>
    %255 = arith.addf %252, %254 : vector<64x32xf32>
    %256 = vector.extract_strided_slice %255 {offsets = [0, 16], sizes = [64, 16], strides = [1, 1]} : vector<64x32xf32> to vector<64x16xf32>
    %257 = arith.addf %211, %256 : vector<64x16xf32>
    %cst_77 = arith.constant dense<0.000000e+00> : vector<64x8xf32>
    %258 = tpu.matmul %257, %8, %cst_77 {dimension_numbers = #tpu.dot_dimension_numbers<[1], [0], [0], [1], [0, 0, 1, 1], [], []>} : vector<64x16xf32>, vector<16x8xf32>, vector<64x8xf32> -> vector<64x8xf32>
    %259 = vector.broadcast %6 : vector<1x8xf32> to vector<64x8xf32>
    %260 = arith.addf %258, %259 : vector<64x8xf32>
    %261 = arith.addf %2, %260 : vector<64x8xf32>
    %262 = tpu.concatenate %1, %261, %257 in 1 : vector<64x8xf32>, vector<64x8xf32>, vector<64x16xf32> -> vector<64x32xf32>
    %c0_78 = arith.constant 0 : index
    %c0_79 = arith.constant 0 : index
    %263 = vector.load %arg5[%c0_78, %c0_79] : memref<64x32xf32, #tpu.memory_space<vmem>>, vector<64x32xf32>
    tpu.vector_store %arg5[%c0_78, %c0_79], %262 {strides = array<i32>} : memref<64x32xf32, #tpu.memory_space<vmem>>, vector<64x32xf32>,
    return
  }
}

</mosaic_0001>

<bundles_post_ra>
// kernel: tpu_custom_call.1
= control target key start
LH: loop header
LB: loop body
LE: loop exit
PB: predicated region body
PF: predicated region fallthrough
CT: control target
= control target key end

     0   :  { %vm6042_vm0 = vcmask 64512   ;;  %s4284_s26 = smov 112   ;;  %vm185_vm1 = vcmask 130048   ;;  %v33_v19 = vlaneseq  ;;  %s4285_s17 = smov 32   ;;  %vm852_vm14 = vcmask 261120   ;;  %s6036_s1 = inlined_call_operand.vmem [shape: f32[24,16], index: 1, kind: input, shape index: {}]   ;;  %s6037_s0 = inlined_call_operand.vmem [shape: f32[64,32], index: 0, kind: input, shape index: {}]   ;;  %s6038_s2 = inlined_call_operand.vmem [shape: f32[16,128], index: 2, kind: input, shape index: {}]   ;;  %s6039_s4 = inlined_call_operand.vmem [shape: f32[10,32], index: 4, kind: input, shape index: {}]   ;;  %s6040_s3 = inlined_call_operand.vmem [shape: f32[4,96,32], index: 3, kind: input, shape index: {}]   ;;  %s6041_s5 = inlined_call_operand.vmem [shape: f32[64,32], index: 5, kind: output, shape index: {}]  }
   0x1   :  { %v30_v0 = vld [vmem:[%s6036_s1] sm:$0xff]  ;;  %v21_v2 = vld [vmem:[%s6037_s0 + $0x8] sm:$0xff]  ;;  %v22_v3 = vld [vmem:[%s6037_s0 + $0x10] sm:$0xff]  ;;  %s4286_s18 = smov 48   ;;  %s4287_s19 = smov 16   ;;  %vm861_vm15 = vcmask 392192  }
   0x2   :  { %v20_v1 = vld [vmem:[%s6037_s0] sm:$0xff]  ;;  %3817 = vmatprep.subr.mxu0 %v30_v0  ;;  %173 = vrot.lane.b32.xlu1 %v22_v3, %s4284_s26  ;;  %v23_v4 = vld [vmem:[%s6037_s0 + $0x18] sm:$0xff]  ;;  %v25_v6 = vld [vmem:[%s6037_s0 + $0x28] sm:$0xff]  ;;  %v4378_v20 = vshrl.u32 %v33_v19, 7  ;;  %s4288_s20 = smov 64   ;;  %s4289_s23 = smov 96  }
   0x3   :  { %3819 = vmatprep.mubr.msk.f32.mxu0 %vm6042_vm0, %v20_v1  ;;  %3818 = vmatpush3.msra.mxu0 %v30_v0  ;;  %v24_v5 = vld [vmem:[%s6037_s0 + $0x20] sm:$0xff]  ;;  %v26_v7 = vld [vmem:[%s6037_s0 + $0x30] sm:$0xff]  ;;  %v27_v8 = vld [vmem:[%s6037_s0 + $0x38] sm:$0xff] }
   0x4   :  { %169 = vrot.lane.b32.xlu0 %v20_v1, %s4284_s26  ;;  %3820 = vmatmul.mubr.msk.f32.vlgmr.msra.gmra.mxu0 %vm6042_vm0, %v21_v2  ;;  %v168_v11 = vld [vmem:[%s6038_s2 + $0x8] sm:$0xff]  ;;  %v167_v12 = vld [vmem:[%s6038_s2] sm:$0xff]  ;;  %v6046_v21 = vsub.s32 0, %v4378_v20  ;;  %vm642_vm2 = vcmp.lt.s32.totalorder %v4378_v20, 7  ;;  %vm601_vm3 = vcmp.lt.s32.totalorder %v4378_v20, 1  ;;  %vm683_vm4 = vcmp.lt.s32.totalorder %v4378_v20, 6 }
   0x5   :  { %3822 = vmatprep.mubr.msk.f32.mxu0 %vm6042_vm0, %v22_v3  ;;  %3831 = vmatprep.subr.mxu1 %v168_v11  ;;  %v4384_v22 = vld [vmem:[%s6039_s4] sm:$0xff]  ;;  %v549_v47 = vld [vmem:[%s6040_s3 + $0x48] sm:$0xff]  ;;  %v547_v53 = vld [vmem:[%s6040_s3 + $0x38] sm:$0xff]  ;;  %v311_v54 = vadd.s32 24, %v4378_v20  ;;  %v4492_v3 = vadd.s32 32, %v4378_v20  ;;  %vm560_vm11 = vcmp.lt.s32.totalorder %v4378_v20, 2 }
   0x6   :  { %177 = vrot.lane.b32.xlu1 %v24_v5, %s4284_s26  ;;  %3832 = vmatpush3.msra.mxu1 %v168_v11  ;;  %v4389_v23 = vrot.slane %v4384_v22, %v6046_v21  ;;  %v548_v48 = vld [vmem:[%s6040_s3 + $0x40] sm:$0xff]  ;;  %v546_v55 = vld [vmem:[%s6040_s3 + $0x30] sm:$0xff]  ;;  %v545_v61 = vld [vmem:[%s6040_s3 + $0x28] sm:$0xff] }
   0x7   :  { %3833 = vmatprep.subr.mxu1 %v167_v12  ;;  %3847 = vmatprep.subr.mxu0 %v549_v47  ;;  %v341_v63 = vand.u32 31, %v311_v54  ;;  %v544_v0 = vld [vmem:[%s6040_s3 + $0x20] sm:$0xff]  ;;  %v542_v11 = vld [vmem:[%s6040_s3 + $0x10] sm:$0xff] }
   0x8   :  { %171 = vrot.lane.b32.xlu0 %v21_v2, %s4284_s26  ;;  %3823 = vmatmul.mubr.msk.f32.gmra.mxu0 %vm6042_vm0, %v23_v4  ;;  %v540_v19 = vld [vmem:[%s6040_s3] sm:$0xff] }
   0x9   :  { %3825 = vmatprep.mubr.msk.f32.mxu0 %vm6042_vm0, %v24_v5  ;;  %3834 = vmatpush3.msra.mxu1 %v167_v12  ;;  %v543_v5 = vld [vmem:[%s6040_s3 + $0x18] sm:$0xff] }
   0xa   :  { %181 = vrot.lane.b32.xlu1 %v26_v7, %s4284_s26  ;;  %3848 = vmatpush3.msra.mxu0 %v549_v47 }
   0xb   :  { %4055 = vmatprep.subr.mxu1 %v549_v47  ;;  %3849 = vmatprep.subr.mxu0 %v548_v48 }
   0xc   :  { %175 = vrot.lane.b32.xlu0 %v23_v4, %s4284_s26  ;;  %3826 = vmatmul.mubr.msk.f32.gmra.mxu0 %vm6042_vm0, %v25_v6 }
   0xd   :  { %3828 = vmatprep.mubr.msk.f32.mxu0 %vm6042_vm0, %v26_v7  ;;  %3850 = vmatpush3.msra.mxu0 %v548_v48  ;;  %v4501_v7 = vadd.s32 1, %v341_v63 }
   0xe   :  { %3851 = vmatprep.subr.mxu0 %v547_v53 }
   0xf   :  { %3852 = vmatpush3.msra.mxu0 %v547_v53  ;;  %vm431_vm5 = vcmp.lt.s32.totalorder %v4501_v7, 32  ;;  %v3633_v7 = vld [vmem:[%s6040_s3 + $0x128] sm:$0xff] }
  0x10   :  { %179 = vrot.lane.b32.xlu0 %v25_v6, %s4284_s26  ;;  %3829 = vmatmul.mubr.msk.f32.gmra.mxu0 %vm6042_vm0, %v27_v8  ;;  %vm870_vm0 = vcmask 523264  }
  0x11   :  { %3853 = vmatprep.subr.mxu0 %v546_v55 }
  0x12   :  { %3854 = vmatpush3.msra.mxu0 %v546_v55 }
  0x13   :  { %3855 = vmatprep.subr.mxu0 %v545_v61 }
  0x14   :  { %183 = vrot.lane.b32.xlu0 %v27_v8, %s4284_s26  ;;  %3856 = vmatpush3.msra.mxu0 %v545_v61 }
  0x15   :  { %3857 = vmatprep.subr.mxu0 %v544_v0 }
  0x16   :  { %3858 = vmatpush3.msra.mxu0 %v544_v0 }
  0x17   :  { %3859 = vmatprep.subr.mxu0 %v543_v5 }
  0x18   :  { %3860 = vmatpush3.msra.mxu0 %v543_v5 }
  0x19   :  { %3861 = vmatprep.subr.mxu0 %v542_v11 }
  0x1a   :  { %3862 = vmatpush3.msra.mxu0 %v542_v11 }
  0x74   :  { %v174_v10 = vpop.permute.xlu1 %173 }
  0x76   :  { %v170_v9 = vpop.permute.xlu0 %169 }
  0x77   :  { %3835 = vmatprep.mubr.msk.f32.mxu1 %vm185_vm1, %v170_v9 }
  0x78   :  { %v178_v14 = vpop.permute.xlu1 %177 }
  0x7a   :  { %v172_v13 = vpop.permute.xlu0 %171 }
  0x7b   :  { %3836 = vmatmul.mubr.msk.f32.vlgmr.msra.gmra.mxu1 %vm185_vm1, %v172_v13  ;;  %v4515_v13 = vadd.s32 2, %v341_v63 }
  0x7c   :  { %3838 = vmatprep.mubr.msk.f32.mxu1 %vm185_vm1, %v174_v10  ;;  %v182_v17 = vpop.permute.xlu1 %181  ;;  %4065 = vmatpush3.msra.mxu1 %v549_v47  ;;  %v348_v10 = vand.u32 31, %v4492_v3 }
  0x7d   :  { %4056 = vmatprep.subr.mxu1 %v548_v48  ;;  %vm463_vm6 = vcmp.lt.s32.totalorder %v4515_v13, 32 }
  0x7e   :  { %v176_v15 = vpop.permute.xlu0 %175  ;;  %4066 = vmatpush3.msra.mxu1 %v548_v48 }
  0x7f   :  { %3839 = vmatmul.mubr.msk.f32.gmra.mxu1 %vm185_vm1, %v176_v15  ;;  %4057 = vmatprep.subr.mxu1 %v547_v53 }
  0x80   :  { %3841 = vmatprep.mubr.msk.f32.mxu1 %vm185_vm1, %v178_v14  ;;  %4067 = vmatpush3.msra.mxu1 %v547_v53  ;;  %v4518_v14 = vadd.s32 56, %v4378_v20 }
  0x81   :  { %4058 = vmatprep.subr.mxu1 %v546_v55 }
  0x82   :  { %v180_v16 = vpop.permute.xlu0 %179  ;;  %4068 = vmatpush3.msra.mxu1 %v546_v55 }
  0x83   :  { %3842 = vmatmul.mubr.msk.f32.gmra.mxu1 %vm185_vm1, %v180_v16  ;;  %4059 = vmatprep.subr.mxu1 %v545_v61 }
  0x84   :  { %3844 = vmatprep.mubr.msk.f32.mxu1 %vm185_vm1, %v182_v17  ;;  %v320_v17 = vand.u32 31, %v4378_v20  ;;  %4069 = vmatpush3.msra.mxu1 %v545_v61 }
  0x85   :  { %4060 = vmatprep.subr.mxu1 %v544_v0 }
  0x86   :  { %v184_v18 = vpop.permute.xlu0 %183  ;;  %4070 = vmatpush3.msra.mxu1 %v544_v0 }
  0x87   :  { %3845 = vmatmul.mubr.msk.f32.gmra.mxu1 %vm185_vm1, %v184_v18  ;;  %v541_v18 = vld [vmem:[%s6040_s3 + $0x8] sm:$0xff]  ;;  %4061 = vmatprep.subr.mxu1 %v543_v5 }
  0x88   :  { %3863 = vmatprep.subr.mxu0 %v541_v18  ;;  %4071 = vmatpush3.msra.mxu1 %v543_v5 }
  0x89   :  { %3864 = vmatpush3.msra.mxu0 %v541_v18  ;;  %4062 = vmatprep.subr.mxu1 %v542_v11 }
  0x8a   :  { %3865 = vmatprep.subr.mxu0 %v540_v19  ;;  %4072 = vmatpush3.msra.mxu1 %v542_v11 }
  0x8b   :  { %3866 = vmatpush3.msra.mxu0 %v540_v19  ;;  %4063 = vmatprep.subr.mxu1 %v541_v18 }
  0x8c   :  { %4073 = vmatpush3.msra.mxu1 %v541_v18 }
  0x8d   :  { %4064 = vmatprep.subr.mxu1 %v540_v19 }
  0x8e   :  { %4074 = vmatpush3.msra.mxu1 %v540_v19 }
  0xc4   :  { %v3821_v24 = vpop.f32.mrf.mxu0 }
  0xc5   :  { %v4392_v25 = vadd.f32 %v3821_v24, %v4389_v23 }
  0xc6   :  { %v128_v26 = vpop.f32.mrf.mxu0 }
  0xc7   :  { %v4395_v27 = vadd.f32 %v128_v26, %v4389_v23  ;;  %758 = vrot.lane.b32.xlu1 %v4392_v25, %s4285_s17  ;;  %v635_v31 = vrot.slane %v4392_v25, 1  ;;  %v594_v35 = vrot.slane %v4392_v25, 7  ;;  %v676_v40 = vrot.slane %v4392_v25, 2 }
  0xc8   :  { %v3824_v28 = vpop.f32.mrf.mxu0 }
  0xc9   :  { %v4401_v29 = vadd.f32 %v3824_v28, %v4389_v23  ;;  %756 = vrot.lane.b32.xlu0 %v4395_v27, %s4285_s17  ;;  %v634_v30 = vrot.slane %v4395_v27, 1  ;;  %v593_v33 = vrot.slane %v4395_v27, 7  ;;  %v675_v36 = vrot.slane %v4395_v27, 2 }
  0xca   :  { %v138_v32 = vpop.f32.mrf.mxu0  ;;  %v4540_v28 = vadd.s32 4294967295, %v348_v10 }
  0xcb   :  { %762 = vrot.lane.b32.xlu1 %v4401_v29, %s4285_s17  ;;  %v649_v34 = vsel %vm642_vm2, %v634_v30, %v635_v31  ;;  %v4420_v37 = vadd.f32 %v138_v32, %v4389_v23  ;;  %v608_v39 = vsel %vm601_vm3, %v593_v33, %v594_v35  ;;  %v690_v42 = vsel %vm683_vm4, %v675_v36, %v676_v40 }
  0xcc   :  { %v3827_v38 = vpop.f32.mrf.mxu0  ;;  %v637_v52 = vrot.slane %v4401_v29, 1  ;;  %v596_v57 = vrot.slane %v4401_v29, 7  ;;  %v678_v60 = vrot.slane %v4401_v29, 2  ;;  %v369_v32 = vand.u32 31, %v4518_v14 }
  0xcd   :  { %788 = vrot.lane.b32.xlu0 %v649_v34, %s4286_s18  ;;  %v4428_v41 = vadd.f32 %v3827_v38, %v4389_v23  ;;  %v636_v43 = vrot.slane %v4420_v37, 1  ;;  %v595_v44 = vrot.slane %v4420_v37, 7  ;;  %v677_v46 = vrot.slane %v4420_v37, 2 }
  0xce   :  { %v148_v50 = vpop.f32.mrf.mxu0  ;;  %vm488_vm7 = vcmp.ge.s32.totalorder %v4540_v28, 0 }
  0xcf   :  { %726 = vrot.lane.b32.xlu1 %v608_v39, %s4287_s19  ;;  %v648_v45 = vsel %vm642_vm2, %v635_v31, %v636_v43  ;;  %v607_v49 = vsel %vm601_vm3, %v594_v35, %v595_v44  ;;  %v689_v51 = vsel %vm683_vm4, %v676_v40, %v677_v46  ;;  %v647_v56 = vsel %vm642_vm2, %v636_v43, %v637_v52 }
  0xd0   :  { %v3830_v58 = vpop.f32.mrf.mxu0  ;;  %v606_v59 = vsel %vm601_vm3, %v595_v44, %v596_v57  ;;  %v4479_v62 = vadd.f32 %v148_v50, %v4389_v23  ;;  %v688_v1 = vsel %vm683_vm4, %v677_v46, %v678_v60  ;;  %v598_v4 = vrot.slane %v4428_v41, 7 }
  0xd1   :  { %820 = vrot.lane.b32.xlu0 %v690_v42, %s4288_s20  ;;  %v4488_v2 = vadd.f32 %v3830_v58, %v4389_v23  ;;  %v639_v9 = vrot.slane %v4428_v41, 1  ;;  %v680_v26 = vrot.slane %v4428_v41, 2  ;;  %v4551_v35 = vadd.s32 4294967295, %v320_v17 }
  0xd2   :  { %v638_v6 = vrot.slane %v4479_v62, 1  ;;  %v597_v8 = vrot.slane %v4479_v62, 7  ;;  %v679_v16 = vrot.slane %v4479_v62, 2  ;;  %v158_v40 = vpop.f32.mrf.mxu0 }
  0xd3   :  { %766 = vrot.lane.b32.xlu1 %v4428_v41, %s4285_s17  ;;  %6066 = vst [vmem:[#allocation2_spill] sm:$0xff] %v4551_v35  ;;  %v600_v38 = vrot.slane %v4488_v2, 7  ;;  %vm6044_vm8 = vcmp.ge.s32.totalorder %v4551_v35, 0  ;;  %v641_v46 = vrot.slane %v4488_v2, 1  ;;  %v4574_v47 = vadd.f32 %v158_v40, %v4389_v23 }
  0xd4   :  { %v604_v12 = vsel %vm601_vm3, %v597_v8, %v598_v4  ;;  %v646_v15 = vsel %vm642_vm2, %v637_v52, %v638_v6  ;;  %v645_v24 = vsel %vm642_vm2, %v638_v6, %v639_v9  ;;  %v687_v34 = vsel %vm683_vm4, %v678_v60, %v679_v16 }
  0xd5   :  { %760 = vrot.lane.b32.xlu0 %v4420_v37, %s4285_s17  ;;  %v670_v31 = vsel %vm431_vm5, %v646_v15, 0.0  ;;  %v686_v39 = vsel %vm683_vm4, %v679_v16, %v680_v26  ;;  %v605_v42 = vsel %vm601_vm3, %v596_v57, %v597_v8  ;;  %v711_v43 = vsel %vm463_vm6, %v687_v34, 0.0 }
  0xd6   :  { %v609_v44 = vsel %vm601_vm3, %v600_v38, %v593_v33  ;;  %v630_v48 = vsel %vm488_vm7, %v605_v42, 0.0  ;;  %v650_v23 = vsel %vm642_vm2, %v641_v46, %v634_v30  ;;  %v599_v33 = vrot.slane %v4574_v47, 7 }
  0xd7   :  { %790 = vrot.lane.b32.xlu1 %v648_v45, %s4286_s18  ;;  %v4570_v45 = vadd.s32 1, %v369_v32  ;;  %v681_v53 = vrot.slane %v4574_v47, 2  ;;  %v4612_v57 = vadd.s32 2, %v369_v32  ;;  %v556_v32 = vrot.slane %v4479_v62, 6 }
  0xd8   :  { %v603_v30 = vsel %vm601_vm3, %v598_v4, %v599_v33  ;;  %v4637_v34 = vadd.s32 4294967294, %v348_v10  ;;  %v552_v40 = vrot.slane %v4395_v27, 6 }
  0xd9   :  { %728 = vrot.lane.b32.xlu0 %v607_v49, %s4287_s19  ;;  %v626_v49 = vsel %vm6044_vm8, %v609_v44, 0.0  ;;  %vm435_vm9 = vcmp.lt.s32.totalorder %v4570_v45, 32  ;;  %v685_v55 = vsel %vm683_vm4, %v680_v26, %v681_v53  ;;  %6067 = vst [vmem:[#allocation3_spill] sm:$0xff] %v4612_v57  ;;  %vm6043_vm10 = vcmp.lt.s32.totalorder %v4612_v57, 32 }
  0xda   :  { %v674_v50 = vsel %vm435_vm9, %v650_v23, 0.0  ;;  %v553_v44 = vrot.slane %v4392_v25, 6  ;;  %vm520_vm12 = vcmp.ge.s32.totalorder %v4637_v34, 0 }
  0xdb   :  { %822 = vrot.lane.b32.xlu1 %v689_v51, %s4288_s20  ;;  %v640_v51 = vrot.slane %v4574_v47, 1 }
  0xdd   :  { %792 = vrot.lane.b32.xlu0 %v647_v56, %s4286_s18  ;;  %v644_v52 = vsel %vm642_vm2, %v639_v9, %v640_v51  ;;  %v643_v54 = vsel %vm642_vm2, %v640_v51, %v641_v46  ;;  %v682_v56 = vrot.slane %v4488_v2, 2  ;;  %v554_v46 = vrot.slane %v4420_v37, 6 }
  0xdf   :  { %730 = vrot.lane.b32.xlu1 %v606_v59, %s4287_s19  ;;  %v684_v58 = vsel %vm683_vm4, %v681_v53, %v682_v56  ;;  %v602_v59 = vsel %vm601_vm3, %v599_v33, %v600_v38  ;;  %v691_v60 = vsel %vm683_vm4, %v682_v56, %v675_v36  ;;  %v4641_v38 = vadd.s32 4294967294, %v320_v17 }
  0xe0   :  { %v715_v61 = vsel %vm6043_vm10, %v691_v60, 0.0  ;;  %v566_v33 = vsel %vm560_vm11, %v553_v44, %v554_v46  ;;  %vm883_vm10 = vcmask 654336  }
  0xe1   :  { %824 = vrot.lane.b32.xlu0 %v688_v1, %s4288_s20  ;;  %vm516_vm13 = vcmp.ge.s32.totalorder %v4641_v38, 0 }
  0xe3   :  { %770 = vrot.lane.b32.xlu1 %v4488_v2, %s4285_s17 }
  0xe5   :  { %764 = vrot.lane.b32.xlu0 %v4479_v62, %s4285_s17 }
  0xe7   :  { %734 = vrot.lane.b32.xlu1 %v604_v12, %s4287_s19 }
  0xe9   :  { %796 = vrot.lane.b32.xlu0 %v645_v24, %s4286_s18 }
  0xeb   :  { %794 = vrot.lane.b32.xlu1 %v670_v31, %s4286_s18 }
  0xed   :  { %828 = vrot.lane.b32.xlu0 %v686_v39, %s4288_s20  ;;  %v559_v39 = vrot.slane %v4488_v2, 6 }
  0xef   :  { %826 = vrot.lane.b32.xlu1 %v711_v43, %s4288_s20  ;;  %v555_v43 = vrot.slane %v4401_v29, 6  ;;  %v568_v17 = vsel %vm560_vm11, %v559_v39, %v552_v40 }
  0xf1   :  { %732 = vrot.lane.b32.xlu0 %v630_v48, %s4287_s19  ;;  %v564_v10 = vsel %vm560_vm11, %v555_v43, %v556_v32  ;;  %v567_v48 = vsel %vm560_vm11, %v552_v40, %v553_v44  ;;  %v565_v60 = vsel %vm560_vm11, %v554_v46, %v555_v43  ;;  %v558_v43 = vrot.slane %v4574_v47, 6 }
  0xf3   :  { %724 = vrot.lane.b32.xlu1 %v626_v49, %s4287_s19 }
  0xf5   :  { %768 = vrot.lane.b32.xlu0 %v4574_v47, %s4285_s17 }
  0xf7   :  { %802 = vrot.lane.b32.xlu1 %v674_v50, %s4286_s18  ;;  %v589_v50 = vsel %vm520_vm12, %v564_v10, 0.0 }
  0xf9   :  { %736 = vrot.lane.b32.xlu0 %v603_v30, %s4287_s19  ;;  %v585_v30 = vsel %vm516_vm13, %v568_v17, 0.0 }
  0xfb   :  { %798 = vrot.lane.b32.xlu1 %v644_v52, %s4286_s18 }
  0xfd   :  { %800 = vrot.lane.b32.xlu0 %v643_v54, %s4286_s18 }
  0xff   :  { %830 = vrot.lane.b32.xlu1 %v685_v55, %s4288_s20 }
 0x101   :  { %832 = vrot.lane.b32.xlu0 %v684_v58, %s4288_s20 }
 0x103   :  { %738 = vrot.lane.b32.xlu1 %v602_v59, %s4287_s19 }
 0x107   :  { %834 = vrot.lane.b32.xlu1 %v715_v61, %s4288_s20  ;;  %v557_v61 = vrot.slane %v4428_v41, 6 }
 0x109   :  { %v562_v17 = vsel %vm560_vm11, %v557_v61, %v558_v43 }
 0x139   :  { %v759_v63 = vpop.permute.xlu1 %758 }
 0x13b   :  { %v757_v0 = vpop.permute.xlu0 %756 }
 0x13d   :  { %v4628_v1 = vpop.permute.xlu1 %762 }
 0x13f   :  { %v789_v4 = vpop.permute.xlu0 %788 }
 0x141   :  { %v727_v5 = vpop.permute.xlu1 %726 }
 0x142   :  { %v845_v23 = vsel %vm185_vm1, %v567_v48, %v727_v5 }
 0x143   :  { %v821_v6 = vpop.permute.xlu0 %820  ;;  %v854_v55 = vsel %vm852_vm14, %v845_v23, %v759_v63 }
 0x145   :  { %v4630_v8 = vpop.permute.xlu1 %766 }
 0x147   :  { %v761_v9 = vpop.permute.xlu0 %760 }
 0x149   :  { %v791_v11 = vpop.permute.xlu1 %790 }
 0x14a   :  { %v863_v59 = vsel %vm861_vm15, %v854_v55, %v791_v11  ;;  %v4720_v55 = vpop.f32.mrf.mxu1 }
 0x14b   :  { %v729_v12 = vpop.permute.xlu0 %728  ;;  %6068 = vst [vmem:[#allocation4_spill] sm:$0xff] %v4720_v55 }
 0x14c   :  { %v846_v52 = vsel %vm185_vm1, %v566_v33, %v729_v12 }
 0x14d   :  { %v823_v14 = vpop.permute.xlu1 %822  ;;  %v855_v12 = vsel %vm852_vm14, %v846_v52, %v761_v9  ;;  %v563_v9 = vsel %vm560_vm11, %v556_v32, %v557_v61 }
 0x14e   :  { %v872_v10 = vsel %vm870_vm0, %v863_v59, %v823_v14 }
 0x14f   :  { %v793_v15 = vpop.permute.xlu0 %792 }
 0x150   :  { %v864_v11 = vsel %vm861_vm15, %v855_v12, %v793_v15 }
 0x151   :  { %v731_v36 = vpop.permute.xlu1 %730 }
 0x152   :  { %v847_v40 = vsel %vm185_vm1, %v565_v60, %v731_v36 }
 0x153   :  { %v825_v16 = vpop.permute.xlu0 %824  ;;  %v856_v36 = vsel %vm852_vm14, %v847_v40, %v4628_v1 }
 0x154   :  { %v873_v46 = vsel %vm870_vm0, %v864_v11, %v825_v16 }
 0x155   :  { %v4632_v18 = vpop.permute.xlu1 %770 }
 0x157   :  { %v765_v19 = vpop.permute.xlu0 %764 }
 0x159   :  { %v735_v24 = vpop.permute.xlu1 %734 }
 0x15a   :  { %v849_v14 = vsel %vm185_vm1, %v563_v9, %v735_v24 }
 0x15b   :  { %v797_v26 = vpop.permute.xlu0 %796 }
 0x15d   :  { %v795_v31 = vpop.permute.xlu1 %794 }
 0x15e   :  { %v865_v15 = vsel %vm861_vm15, %v856_v36, %v795_v31 }
 0x15f   :  { %v829_v42 = vpop.permute.xlu0 %828 }
 0x161   :  { %v827_v3 = vpop.permute.xlu1 %826 }
 0x162   :  { %v874_v16 = vsel %vm870_vm0, %v865_v15, %v827_v3 }
 0x163   :  { %v733_v49 = vpop.permute.xlu0 %732 }
 0x164   :  { %v848_v53 = vsel %vm185_vm1, %v589_v50, %v733_v49 }
 0x165   :  { %v725_v51 = vpop.permute.xlu1 %724  ;;  %v857_v63 = vsel %vm852_vm14, %v848_v53, %v765_v19 }
 0x166   :  { %v844_v54 = vsel %vm185_vm1, %v585_v30, %v725_v51 }
 0x167   :  { %v853_v56 = vsel %vm852_vm14, %v844_v54, %v757_v0  ;;  %v769_v58 = vpop.permute.xlu0 %768 }
 0x168   :  { %v862_v5 = vsel %vm861_vm15, %v853_v56, %v789_v4  ;;  %v4722_v56 = vpop.f32.mrf.mxu1 }
 0x169   :  { %v803_v44 = vpop.permute.xlu1 %802  ;;  %v871_v0 = vsel %vm870_vm0, %v862_v5, %v821_v6  ;;  %v866_v6 = vsel %vm861_vm15, %v857_v63, %v797_v26  ;;  %v858_v26 = vsel %vm852_vm14, %v849_v14, %v4630_v8  ;;  %v561_v8 = vsel %vm560_vm11, %v558_v43, %v559_v39  ;;  %6069 = vst [vmem:[#allocation5_spill] sm:$0xff] %v4722_v56 }
 0x16a   :  { %3867 = vmatprep.mubr.msk.f32.mxu0 %vm883_vm10, %v871_v0  ;;  %v875_v1 = vsel %vm870_vm0, %v866_v6, %v829_v42  ;;  %v4725_v39 = vpop.f32.mrf.mxu1 }
 0x16b   :  { %v737_v4 = vpop.permute.xlu0 %736  ;;  %3868 = vmatmul.mubr.msk.f32.vlgmr.msra.gmra.mxu0 %vm883_vm10, %v872_v10  ;;  %6070 = vst [vmem:[#allocation6_spill] sm:$0xff] %v4725_v39 }
 0x16c   :  { %3870 = vmatprep.mubr.msk.f32.mxu0 %vm883_vm10, %v873_v46  ;;  %v850_v48 = vsel %vm185_vm1, %v562_v17, %v737_v4 }
 0x16d   :  { %v799_v19 = vpop.permute.xlu1 %798  ;;  %v859_v3 = vsel %vm852_vm14, %v850_v48, %v769_v58  ;;  %v6045_v58 = vsub.s32 1, %v4378_v20 }
 0x16e   :  { %v867_v24 = vsel %vm861_vm15, %v858_v26, %v799_v19 }
 0x16f   :  { %v801_v32 = vpop.permute.xlu0 %800  ;;  %3871 = vmatmul.mubr.msk.f32.gmra.mxu0 %vm883_vm10, %v874_v16  ;;  %v882_v59 = vrot.slane %v4384_v22, %v6045_v58 }
 0x170   :  { %3873 = vmatprep.mubr.msk.f32.mxu0 %vm883_vm10, %v875_v1  ;;  %v868_v23 = vsel %vm861_vm15, %v859_v3, %v801_v32 }
 0x171   :  { %v831_v31 = vpop.permute.xlu1 %830 }
 0x172   :  { %v876_v49 = vsel %vm870_vm0, %v867_v24, %v831_v31 }
 0x173   :  { %v833_v33 = vpop.permute.xlu0 %832  ;;  %3874 = vmatmul.mubr.msk.f32.gmra.mxu0 %vm883_vm10, %v876_v49 }
 0x174   :  { %v877_v50 = vsel %vm870_vm0, %v868_v23, %v833_v33 }
 0x175   :  { %3876 = vmatprep.mubr.msk.f32.mxu1 %vm883_vm10, %v877_v50  ;;  %v739_v42 = vpop.permute.xlu1 %738 }
 0x176   :  { %v851_v51 = vsel %vm185_vm1, %v561_v8, %v739_v42 }
 0x177   :  { %v860_v30 = vsel %vm852_vm14, %v851_v51, %v4632_v18  ;;  %v4730_v18 = vpop.f32.mrf.mxu1 }
 0x178   :  { %v869_v52 = vsel %vm861_vm15, %v860_v30, %v803_v44  ;;  %6071 = vst [vmem:[#allocation7_spill] sm:$0xff] %v4730_v18 }
 0x179   :  { %v835_v53 = vpop.permute.xlu1 %834  ;;  %v4732_v5 = vpop.f32.mrf.mxu1 }
 0x17a   :  { %v878_v54 = vsel %vm870_vm0, %v869_v52, %v835_v53  ;;  %6072 = vst [vmem:[#allocation8_spill] sm:$0xff] %v4732_v5 }
 0x17b   :  { %3877 = vmatmul.mubr.msk.f32.vlgmr.msra.gmra.mxu1 %vm883_vm10, %v878_v54  ;;  %v4741_v43 = vpop.f32.mrf.mxu1 }
 0x17c   :  { %6073 = vst [vmem:[#allocation9_spill] sm:$0xff] %v4741_v43 }
 0x17d   :  { %v4751_v16 = vpop.f32.mrf.mxu1 }
 0x17e   :  { %6074 = vst [vmem:[#allocation10_spill] sm:$0xff] %v4751_v16 }
 0x17f   :  { %v4761_v31 = vpop.f32.mrf.mxu1 }
 0x180   :  { %6075 = vst [vmem:[#allocation11_spill] sm:$0xff] %v4761_v31 }
 0x22b   :  { %v3869_v60 = vpop.f32.mrf.mxu0 }
 0x22c   :  { %v980_v61 = vadd.f32 %v3869_v60, %v882_v59 }
 0x22d   :  { %v974_v12 = vpop.f32.mrf.mxu0 }
 0x22e   :  { %v4735_v40 = vadd.f32 %v4720_v55, %v980_v61  ;;  %v975_v63 = vadd.f32 %v974_v12, %v882_v59  ;;  %v551_v12 = vld [vmem:[%s6040_s3 + $0x58] sm:$0xff] }
 0x22f   :  { %v3872_v44 = vpop.f32.mrf.mxu0  ;;  %3879 = vmatprep.subr.mxu1 %v551_v12 }
 0x230   :  { %v3545_v0 = vmul.f32 -1.442695, %v4735_v40  ;;  %v4739_v10 = vadd.f32 %v975_v63, %v4722_v56  ;;  %v990_v11 = vadd.f32 %v3872_v44, %v882_v59  ;;  %3880 = vmatpush3.msra.mxu1 %v551_v12  ;;  %v550_v44 = vld [vmem:[%s6040_s3 + $0x50] sm:$0xff] }
 0x231   :  { %v984_v46 = vpop.f32.mrf.mxu0  ;;  %3881 = vmatprep.subr.mxu1 %v550_v44 }
 0x232   :  { %4082 = vpow2.f32 %v3545_v0  ;;  %v3544_v4 = vmul.f32 -1.442695, %v4739_v10  ;;  %v4745_v9 = vadd.f32 %v4725_v39, %v990_v11  ;;  %v985_v36 = vadd.f32 %v984_v46, %v882_v59  ;;  %3882 = vmatpush3.msra.mxu1 %v550_v44 }
 0x233   :  { %v3875_v6 = vpop.f32.mrf.mxu0 }
 0x234   :  { %4084 = vpow2.f32 %v3544_v4  ;;  %v3547_v14 = vmul.f32 -1.442695, %v4745_v9  ;;  %v4749_v15 = vadd.f32 %v985_v36, %v4730_v18  ;;  %v1000_v19 = vadd.f32 %v3875_v6, %v882_v59 }
 0x235   :  { %v994_v17 = vpop.f32.mrf.mxu0 }
 0x236   :  { %4086 = vpow2.f32 %v3547_v14  ;;  %v3546_v48 = vmul.f32 -1.442695, %v4749_v15  ;;  %v4755_v32 = vadd.f32 %v4732_v5, %v1000_v19  ;;  %v995_v1 = vadd.f32 %v994_v17, %v882_v59 }
 0x238   :  { %4088 = vpow2.f32 %v3546_v48  ;;  %v3549_v26 = vmul.f32 -1.442695, %v4755_v32  ;;  %v4759_v24 = vadd.f32 %v995_v1, %v4741_v43 }
 0x23a   :  { %4090 = vpow2.f32 %v3549_v26  ;;  %v3548_v3 = vmul.f32 -1.442695, %v4759_v24 }
 0x23b   :  { %v3878_v49 = vpop.f32.mrf.mxu1 }
 0x23c   :  { %4092 = vpow2.f32 %v3548_v3  ;;  %v1010_v23 = vadd.f32 %v3878_v49, %v882_v59 }
 0x23d   :  { %v1004_v33 = vpop.f32.mrf.mxu1 }
 0x23e   :  { %v4765_v50 = vadd.f32 %v4751_v16, %v1010_v23  ;;  %v1005_v8 = vadd.f32 %v1004_v33, %v882_v59 }
 0x23f   :  { %v4083_v42 = vpop.eup %4082 }
 0x240   :  { %v1054_v51 = vadd.f32 1.0, %v4083_v42  ;;  %v3551_v30 = vmul.f32 -1.442695, %v4765_v50  ;;  %v4769_v52 = vadd.f32 %v1005_v8, %v4761_v31 }
 0x241   :  { %v4085_v53 = vpop.eup %4084 }
 0x242   :  { %4094 = vrcp.f32 %v1054_v51  ;;  %v1053_v54 = vadd.f32 1.0, %v4085_v53  ;;  %v3550_v61 = vmul.f32 -1.442695, %v4769_v52 }
 0x243   :  { %v4087_v60 = vpop.eup %4086  ;;  %4096 = vpow2.f32 %v3551_v30 }
 0x244   :  { %4098 = vrcp.f32 %v1053_v54  ;;  %v1056_v59 = vadd.f32 1.0, %v4087_v60 }
 0x245   :  { %v4089_v63 = vpop.eup %4088 }
 0x246   :  { %4100 = vrcp.f32 %v1056_v59  ;;  %v1055_v0 = vadd.f32 1.0, %v4089_v63 }
 0x247   :  { %v4091_v11 = vpop.eup %4090  ;;  %4102 = vpow2.f32 %v3550_v61 }
 0x248   :  { %4104 = vrcp.f32 %v1055_v0  ;;  %v1058_v46 = vadd.f32 1.0, %v4091_v11 }
 0x249   :  { %v4093_v4 = vpop.eup %4092 }
 0x24a   :  { %4106 = vrcp.f32 %v1058_v46  ;;  %v1057_v36 = vadd.f32 1.0, %v4093_v4 }
 0x24c   :  { %4108 = vrcp.f32 %v1057_v36 }
 0x24f   :  { %v4095_v6 = vpop.eup %4094 }
 0x250   :  { %v4097_v14 = vpop.eup %4096  ;;  %1087 = vrot.lane.b32.xlu1 %v4095_v6, %s4284_s26  ;;  %v1119_v6 = vsub.s32 5, %v4378_v20 }
 0x251   :  { %v4099_v19 = vpop.eup %4098  ;;  %v1060_v17 = vadd.f32 1.0, %v4097_v14 }
 0x252   :  { %1085 = vrot.lane.b32.xlu0 %v4099_v19, %s4284_s26  ;;  %v4804_v14 = vrot.slane %v4384_v22, %v1119_v6 }
 0x253   :  { %v4101_v48 = vpop.eup %4100  ;;  %4110 = vrcp.f32 %v1060_v17 }
 0x254   :  { %v4103_v1 = vpop.eup %4102  ;;  %1091 = vrot.lane.b32.xlu1 %v4101_v48, %s4284_s26 }
 0x255   :  { %v4105_v26 = vpop.eup %4104  ;;  %v1059_v3 = vadd.f32 1.0, %v4103_v1 }
 0x256   :  { %1089 = vrot.lane.b32.xlu0 %v4105_v26, %s4284_s26 }
 0x257   :  { %v4107_v49 = vpop.eup %4106  ;;  %4112 = vrcp.f32 %v1059_v3 }
 0x258   :  { %1095 = vrot.lane.b32.xlu1 %v4107_v49, %s4284_s26  ;;  %4114 = vtanh.f32 %v4739_v10 }
 0x259   :  { %v4109_v23 = vpop.eup %4108  ;;  %4116 = vtanh.f32 %v4735_v40 }
 0x25a   :  { %1093 = vrot.lane.b32.xlu0 %v4109_v23, %s4284_s26  ;;  %4118 = vtanh.f32 %v4749_v15 }
 0x25b   :  { %4120 = vtanh.f32 %v4745_v9 }
 0x25c   :  { %4122 = vtanh.f32 %v4759_v24 }
 0x25d   :  { %4124 = vtanh.f32 %v4755_v32 }
 0x25e   :  { %4126 = vtanh.f32 %v4769_v52 }
 0x25f   :  { %4128 = vtanh.f32 %v4765_v50 }
 0x260   :  { %v4111_v33 = vpop.eup %4110 }
 0x261   :  { %1099 = vrot.lane.b32.xlu1 %v4111_v33, %s4284_s26 }
 0x264   :  { %v4113_v8 = vpop.eup %4112 }
 0x265   :  { %1097 = vrot.lane.b32.xlu0 %v4113_v8, %s4284_s26  ;;  %v4115_v51 = vpop.eup %4114 }
 0x266   :  { %v4117_v53 = vpop.eup %4116 }
 0x267   :  { %v4119_v10 = vpop.eup %4118 }
 0x268   :  { %v4121_v40 = vpop.eup %4120 }
 0x269   :  { %v4123_v24 = vpop.eup %4122 }
 0x26a   :  { %v4125_v63 = vpop.eup %4124 }
 0x26b   :  { %v4127_v46 = vpop.eup %4126 }
 0x26c   :  { %v4129_v4 = vpop.eup %4128 }
 0x2c2   :  { %v1088_v42 = vpop.permute.xlu1 %1087 }
 0x2c3   :  { %v1110_v60 = vmul.f32 %v4117_v53, %v1088_v42 }
 0x2c4   :  { %v1086_v30 = vpop.permute.xlu0 %1085 }
 0x2c5   :  { %v1109_v54 = vmul.f32 %v4115_v51, %v1086_v30 }
 0x2c6   :  { %v1092_v61 = vpop.permute.xlu1 %1091 }
 0x2c7   :  { %3883 = vmatprep.mubr.msk.f32.mxu1 %vm185_vm1, %v1109_v54  ;;  %v1112_v9 = vmul.f32 %v4121_v40, %v1092_v61 }
 0x2c8   :  { %v1090_v12 = vpop.permute.xlu0 %1089  ;;  %3884 = vmatmul.mubr.msk.f32.vlgmr.msra.gmra.mxu1 %vm185_vm1, %v1110_v60 }
 0x2c9   :  { %v1111_v15 = vmul.f32 %v4119_v10, %v1090_v12 }
 0x2ca   :  { %v1096_v32 = vpop.permute.xlu1 %1095 }
 0x2cb   :  { %3886 = vmatprep.mubr.msk.f32.mxu1 %vm185_vm1, %v1111_v15  ;;  %v1114_v0 = vmul.f32 %v4125_v63, %v1096_v32 }
 0x2cc   :  { %v1094_v59 = vpop.permute.xlu0 %1093  ;;  %3887 = vmatmul.mubr.msk.f32.gmra.mxu1 %vm185_vm1, %v1112_v9 }
 0x2cd   :  { %v1113_v44 = vmul.f32 %v4123_v24, %v1094_v59  ;;  %v3569_v59 = vld [vmem:[%s6040_s3 + $0xa8] sm:$0xff] }
 0x2ce   :  { %3895 = vmatprep.subr.mxu1 %v3569_v59 }
 0x2cf   :  { %3889 = vmatprep.mubr.msk.f32.mxu1 %vm185_vm1, %v1113_v44  ;;  %3896 = vmatpush3.msra.mxu1 %v3569_v59 }
 0x2d0   :  { %3890 = vmatmul.mubr.msk.f32.gmra.mxu1 %vm185_vm1, %v1114_v0 }
 0x2d3   :  { %v1100_v11 = vpop.permute.xlu1 %1099 }
 0x2d4   :  { %v1116_v50 = vmul.f32 %v4129_v4, %v1100_v11 }
 0x2d7   :  { %v1098_v52 = vpop.permute.xlu0 %1097 }
 0x2d8   :  { %v1115_v36 = vmul.f32 %v4127_v46, %v1098_v52  ;;  %v3568_v46 = vld [vmem:[%s6040_s3 + $0xa0] sm:$0xff]  ;;  %v3567_v52 = vld [vmem:[%s6040_s3 + $0x98] sm:$0xff] }
 0x2d9   :  { %3897 = vmatprep.subr.mxu1 %v3568_v46 }
 0x2da   :  { %3892 = vmatprep.mubr.msk.f32.mxu1 %vm185_vm1, %v1115_v36  ;;  %3898 = vmatpush3.msra.mxu1 %v3568_v46 }
 0x2db   :  { %3893 = vmatmul.mubr.msk.f32.gmra.mxu1 %vm185_vm1, %v1116_v50  ;;  %3899 = vmatprep.subr.mxu1 %v3567_v52 }
 0x2dc   :  { %3900 = vmatpush3.msra.mxu1 %v3567_v52 }
 0x388   :  { %v3885_v19 = vpop.f32.mrf.mxu1 }
 0x389   :  { %v4807_v17 = vadd.f32 %v3885_v19, %v4804_v14 }
 0x38a   :  { %v1211_v48 = vpop.f32.mrf.mxu1 }
 0x38b   :  { %6076 = vst [vmem:[#allocation12_spill] sm:$0xff] %v4807_v17  ;;  %v4811_v1 = vadd.f32 %v4807_v17, %v4392_v25  ;;  %v4814_v26 = vadd.f32 %v1211_v48, %v4804_v14  ;;  %v3566_v48 = vld [vmem:[%s6040_s3 + $0x90] sm:$0xff] }
 0x38c   :  { %v3888_v3 = vpop.f32.mrf.mxu1  ;;  %3901 = vmatprep.subr.mxu1 %v3566_v48 }
 0x38d   :  { %6077 = vst [vmem:[#allocation13_spill] sm:$0xff] %v4814_v26  ;;  %v4818_v49 = vadd.f32 %v4814_v26, %v4395_v27  ;;  %v4821_v22 = vadd.f32 %v3888_v3, %v4804_v14  ;;  %1417 = vrot.lane.b32.xlu1 %v4811_v1, %s4285_s17  ;;  %v1328_v8 = vrot.slane %v4811_v1, 1  ;;  %v1304_v30 = vrot.slane %v4811_v1, 7  ;;  %3902 = vmatpush3.msra.mxu1 %v3566_v48 }
 0x38e   :  { %v1221_v23 = vpop.f32.mrf.mxu1  ;;  %v1352_v10 = vrot.slane %v4811_v1, 2 }
 0x38f   :  { %6078 = vst [vmem:[#allocation14_spill] sm:$0xff] %v4821_v22  ;;  %v4827_v33 = vadd.f32 %v4821_v22, %v4401_v29  ;;  %1415 = vrot.lane.b32.xlu0 %v4818_v49, %s4285_s17  ;;  %v1327_v25 = vrot.slane %v4818_v49, 1  ;;  %v4834_v27 = vadd.f32 %v1221_v23, %v4804_v14  ;;  %v1303_v51 = vrot.slane %v4818_v49, 7 }
 0x390   :  { %v3891_v42 = vpop.f32.mrf.mxu1  ;;  %v1351_v53 = vrot.slane %v4818_v49, 2 }
 0x391   :  { %6079 = vst [vmem:[#allocation15_spill] sm:$0xff] %v4834_v27  ;;  %1421 = vrot.lane.b32.xlu1 %v4827_v33, %s4285_s17  ;;  %v1341_v29 = vsel %vm642_vm2, %v1327_v25, %v1328_v8  ;;  %v4846_v54 = vadd.f32 %v3891_v42, %v4804_v14  ;;  %v4851_v60 = vadd.f32 %v4834_v27, %v4420_v37  ;;  %v1330_v11 = vrot.slane %v4827_v33, 1  ;;  %v3565_v42 = vld [vmem:[%s6040_s3 + $0x88] sm:$0xff] }
 0x392   :  { %v1317_v61 = vsel %vm601_vm3, %v1303_v51, %v1304_v30  ;;  %v1365_v12 = vsel %vm683_vm4, %v1351_v53, %v1352_v10  ;;  %v1231_v15 = vpop.f32.mrf.mxu1  ;;  %v1306_v4 = vrot.slane %v4827_v33, 7  ;;  %v1354_v50 = vrot.slane %v4827_v33, 2  ;;  %3903 = vmatprep.subr.mxu1 %v3565_v42 }
 0x393   :  { %6080 = vst [vmem:[#allocation16_spill] sm:$0xff] %v4846_v54  ;;  %1447 = vrot.lane.b32.xlu0 %v1341_v29, %s4286_s18  ;;  %v4865_v40 = vadd.f32 %v4846_v54, %v4428_v41  ;;  %v1329_v37 = vrot.slane %v4851_v60, 1  ;;  %v1353_v9 = vrot.slane %v4851_v60, 2  ;;  %v4875_v32 = vadd.f32 %v1231_v15, %v4804_v14  ;;  %v3564_v29 = vld [vmem:[%s6040_s3 + $0x80] sm:$0xff]  ;;  %3904 = vmatpush3.msra.mxu1 %v3565_v42 }
 0x394   :  { %v1305_v24 = vrot.slane %v4851_v60, 7  ;;  %3905 = vmatprep.subr.mxu1 %v3564_v29 }
 0x395   :  { %1385 = vrot.lane.b32.xlu1 %v1317_v61, %s4287_s19  ;;  %6081 = vst [vmem:[#allocation17_spill] sm:$0xff] %v4875_v32  ;;  %v1340_v41 = vsel %vm642_vm2, %v1328_v8, %v1329_v37  ;;  %v1364_v63 = vsel %vm683_vm4, %v1352_v10, %v1353_v9  ;;  %v4889_v44 = vadd.f32 %v4875_v32, %v4479_v62  ;;  %v1308_v8 = vrot.slane %v4865_v40, 7 }
 0x396   :  { %v1316_v0 = vsel %vm601_vm3, %v1304_v30, %v1305_v24  ;;  %v1339_v62 = vsel %vm642_vm2, %v1329_v37, %v1330_v11  ;;  %v1315_v36 = vsel %vm601_vm3, %v1305_v24, %v1306_v4  ;;  %v1363_v23 = vsel %vm683_vm4, %v1353_v9, %v1354_v50  ;;  %3906 = vmatpush3.msra.mxu1 %v3564_v29  ;;  %v3562_v37 = vld [vmem:[%s6040_s3 + $0x70] sm:$0xff] }
 0x397   :  { %1479 = vrot.lane.b32.xlu0 %v1365_v12, %s4288_s20  ;;  %v1307_v6 = vrot.slane %v4889_v44, 7  ;;  %v1331_v19 = vrot.slane %v4889_v44, 1  ;;  %v3563_v12 = vld [vmem:[%s6040_s3 + $0x78] sm:$0xff]  ;;  %v1332_v9 = vrot.slane %v4865_v40, 1  ;;  %v1356_v52 = vrot.slane %v4865_v40, 2 }
 0x398   :  { %3907 = vmatprep.subr.mxu1 %v3563_v12 }
 0x399   :  { %1425 = vrot.lane.b32.xlu1 %v4865_v40, %s4285_s17  ;;  %v1313_v30 = vsel %vm601_vm3, %v1307_v6, %v1308_v8  ;;  %v1338_v10 = vsel %vm642_vm2, %v1330_v11, %v1331_v19  ;;  %v1314_v59 = vsel %vm601_vm3, %v1306_v4, %v1307_v6  ;;  %3908 = vmatpush3.msra.mxu1 %v3563_v12 }
 0x39a   :  { %v1346_v15 = vsel %vm431_vm5, %v1338_v10, 0.0  ;;  %3909 = vmatprep.subr.mxu1 %v3562_v37  ;;  %v1323_v46 = vsel %vm488_vm7, %v1314_v59, 0.0 }
 0x39b   :  { %1419 = vrot.lane.b32.xlu0 %v4851_v60, %s4285_s17  ;;  %v3894_v3 = vpop.f32.mrf.mxu1  ;;  %3910 = vmatpush3.msra.mxu1 %v3562_v37 }
 0x39c   :  { %v4927_v61 = vadd.f32 %v3894_v3, %v4804_v14 }
 0x39d   :  { %1449 = vrot.lane.b32.xlu1 %v1340_v41, %s4286_s18  ;;  %v1241_v24 = vpop.f32.mrf.mxu1 }
 0x39e   :  { %6082 = vst [vmem:[#allocation18_spill] sm:$0xff] %v4927_v61  ;;  %v4945_v41 = vadd.f32 %v4927_v61, %v4488_v2  ;;  %v3561_v2 = vld [vmem:[%s6040_s3 + $0x68] sm:$0xff]  ;;  %v4958_v11 = vadd.f32 %v1241_v24, %v4804_v14 }
 0x39f   :  { %1481 = vrot.lane.b32.xlu0 %v1364_v63, %s4288_s20  ;;  %v1337_v63 = vsel %vm642_vm2, %v1331_v19, %v1332_v9  ;;  %3911 = vmatprep.subr.mxu1 %v3561_v2 }
 0x3a0   :  { %6083 = vst [vmem:[#allocation19_spill] sm:$0xff] %v4958_v11  ;;  %v1334_v4 = vrot.slane %v4945_v41, 1  ;;  %3912 = vmatpush3.msra.mxu1 %v3561_v2  ;;  %v1310_v6 = vrot.slane %v4945_v41, 7  ;;  %v4976_v19 = vadd.f32 %v4958_v11, %v4574_v47  ;;  %v1358_v10 = vrot.slane %v4945_v41, 2 }
 0x3a1   :  { %1387 = vrot.lane.b32.xlu1 %v1316_v0, %s4287_s19  ;;  %v1355_v0 = vrot.slane %v4889_v44, 2 }
 0x3a2   :  { %v1342_v48 = vsel %vm642_vm2, %v1334_v4, %v1327_v25  ;;  %v1309_v29 = vrot.slane %v4976_v19, 7 }
 0x3a3   :  { %1451 = vrot.lane.b32.xlu0 %v1339_v62, %s4286_s18  ;;  %v3560_v62 = vld [vmem:[%s6040_s3 + $0x60] sm:$0xff]  ;;  %v1362_v14 = vsel %vm683_vm4, %v1354_v50, %v1355_v0  ;;  %v1318_v50 = vsel %vm601_vm3, %v1310_v6, %v1303_v51  ;;  %v1350_v47 = vsel %vm435_vm9, %v1342_v48, 0.0  ;;  %v1357_v51 = vrot.slane %v4976_v19, 2 }
 0x3a4   :  { %3913 = vmatprep.subr.mxu1 %v3560_v62  ;;  %v1370_v3 = vsel %vm463_vm6, %v1362_v14, 0.0  ;;  %v1319_v25 = vsel %vm6044_vm8, %v1318_v50, 0.0  ;;  %v1311_v37 = vsel %vm601_vm3, %v1309_v29, %v1310_v6  ;;  %vm6084_vm8 = vcmp.lt.s32.totalorder %v4612_v57, 32 }
 0x3a5   :  { %1389 = vrot.lane.b32.xlu1 %v1315_v36, %s4287_s19  ;;  %v1361_v36 = vsel %vm683_vm4, %v1355_v0, %v1356_v52  ;;  %3914 = vmatpush3.msra.mxu1 %v3560_v62  ;;  %v1360_v12 = vsel %vm683_vm4, %v1356_v52, %v1357_v51  ;;  %v1359_v24 = vsel %vm683_vm4, %v1357_v51, %v1358_v10  ;;  %v1279_v51 = vrot.slane %v4818_v49, 6 }
 0x3a7   :  { %1483 = vrot.lane.b32.xlu0 %v1363_v23, %s4288_s20  ;;  %v1333_v23 = vrot.slane %v4976_v19, 1 }
 0x3a9   :  { %1393 = vrot.lane.b32.xlu1 %v1313_v30, %s4287_s19  ;;  %v1336_v42 = vsel %vm642_vm2, %v1332_v9, %v1333_v23  ;;  %v1312_v30 = vsel %vm601_vm3, %v1308_v8, %v1309_v29  ;;  %v1335_v8 = vsel %vm642_vm2, %v1333_v23, %v1334_v4 }
 0x3ab   :  { %1423 = vrot.lane.b32.xlu0 %v4889_v44, %s4285_s17 }
 0x3ad   :  { %1453 = vrot.lane.b32.xlu1 %v1346_v15, %s4286_s18  ;;  %v1366_v15 = vsel %vm683_vm4, %v1358_v10, %v1351_v53  ;;  %v1286_v10 = vrot.slane %v4945_v41, 6 }
 0x3ae   :  { %v1374_v9 = vsel %vm6084_vm8, %v1366_v15, 0.0  ;;  %v1280_v15 = vrot.slane %v4811_v1, 6  ;;  %vm6085_vm8 = vcmp.ge.s32.totalorder %v4551_v35, 0 }
 0x3af   :  { %1455 = vrot.lane.b32.xlu0 %v1337_v63, %s4286_s18  ;;  %v1294_v21 = vsel %vm560_vm11, %v1286_v10, %v1279_v51 }
 0x3b0   :  { %v1295_v26 = vsel %vm516_vm13, %v1294_v21, 0.0 }
 0x3b1   :  { %1391 = vrot.lane.b32.xlu1 %v1323_v46, %s4287_s19 }
 0x3b3   :  { %1487 = vrot.lane.b32.xlu0 %v1361_v36, %s4288_s20 }
 0x3b5   :  { %1429 = vrot.lane.b32.xlu1 %v4945_v41, %s4285_s17 }
 0x3b7   :  { %1485 = vrot.lane.b32.xlu0 %v1370_v3, %s4288_s20 }
 0x3b9   :  { %1461 = vrot.lane.b32.xlu1 %v1350_v47, %s4286_s18 }
 0x3bb   :  { %1383 = vrot.lane.b32.xlu0 %v1319_v25, %s4287_s19 }
 0x3bd   :  { %1457 = vrot.lane.b32.xlu1 %v1336_v42, %s4286_s18 }
 0x3bf   :  { %1427 = vrot.lane.b32.xlu0 %v4976_v19, %s4285_s17 }
 0x3c1   :  { %1395 = vrot.lane.b32.xlu1 %v1312_v30, %s4287_s19  ;;  %v1283_v30 = vrot.slane %v4889_v44, 6 }
 0x3c3   :  { %1489 = vrot.lane.b32.xlu0 %v1360_v12, %s4288_s20  ;;  %v1281_v12 = vrot.slane %v4851_v60, 6 }
 0x3c5   :  { %1397 = vrot.lane.b32.xlu1 %v1311_v37, %s4287_s19  ;;  %v1292_v61 = vsel %vm560_vm11, %v1280_v15, %v1281_v12 }
 0x3c7   :  { %1459 = vrot.lane.b32.xlu0 %v1335_v8, %s4286_s18  ;;  %v1282_v8 = vrot.slane %v4827_v33, 6 }
 0x3c9   :  { %1493 = vrot.lane.b32.xlu1 %v1374_v9, %s4288_s20  ;;  %v1290_v58 = vsel %vm560_vm11, %v1282_v8, %v1283_v30 }
 0x3ca   :  { %v1299_v27 = vsel %vm520_vm12, %v1290_v58, 0.0  ;;  %v1291_v58 = vsel %vm560_vm11, %v1281_v12, %v1282_v8 }
 0x3cb   :  { %1491 = vrot.lane.b32.xlu0 %v1359_v24, %s4288_s20  ;;  %v1293_v24 = vsel %vm560_vm11, %v1279_v51, %v1280_v15 }
 0x3cd   :  { %1678 = vrot.lane.b32.xlu1 %v4720_v55, %s4289_s23 }
 0x3cf   :  { %1676 = vrot.lane.b32.xlu0 %v4722_v56, %s4289_s23 }
 0x3d1   :  { %1682 = vrot.lane.b32.xlu1 %v4725_v39, %s4289_s23 }
 0x3d3   :  { %1680 = vrot.lane.b32.xlu0 %v4730_v18, %s4289_s23 }
 0x3d5   :  { %1686 = vrot.lane.b32.xlu1 %v4732_v5, %s4289_s23 }
 0x3d7   :  { %1684 = vrot.lane.b32.xlu0 %v4741_v43, %s4289_s23 }
 0x3d9   :  { %1690 = vrot.lane.b32.xlu1 %v4751_v16, %s4289_s23 }
 0x3db   :  { %1688 = vrot.lane.b32.xlu0 %v4761_v31, %s4289_s23 }
 0x3ff   :  { %v1418_v53 = vpop.permute.xlu1 %1417 }
 0x401   :  { %v1416_v59 = vpop.permute.xlu0 %1415 }
 0x403   :  { %v1422_v63 = vpop.permute.xlu1 %1421 }
 0x405   :  { %v1448_v0 = vpop.permute.xlu0 %1447 }
 0x407   :  { %v1386_v2 = vpop.permute.xlu1 %1385 }
 0x408   :  { %v1504_v11 = vsel %vm185_vm1, %v1293_v24, %v1386_v2 }
 0x409   :  { %v1480_v46 = vpop.permute.xlu0 %1479  ;;  %v1512_v17 = vsel %vm852_vm14, %v1504_v11, %v1418_v53 }
 0x40b   :  { %v5036_v52 = vpop.permute.xlu1 %1425 }
 0x40d   :  { %v1420_v62 = vpop.permute.xlu0 %1419 }
 0x40f   :  { %v1450_v4 = vpop.permute.xlu1 %1449 }
 0x410   :  { %v1520_v2 = vsel %vm861_vm15, %v1512_v17, %v1450_v4 }
 0x411   :  { %v1482_v36 = vpop.permute.xlu0 %1481 }
 0x413   :  { %v1388_v14 = vpop.permute.xlu1 %1387 }
 0x414   :  { %v1505_v54 = vsel %vm185_vm1, %v1292_v61, %v1388_v14 }
 0x415   :  { %v1452_v6 = vpop.permute.xlu0 %1451  ;;  %v1513_v15 = vsel %vm852_vm14, %v1505_v54, %v1420_v62 }
 0x416   :  { %v1521_v17 = vsel %vm861_vm15, %v1513_v15, %v1452_v6 }
 0x417   :  { %v1390_v48 = vpop.permute.xlu1 %1389 }
 0x418   :  { %v1506_v21 = vsel %vm185_vm1, %v1291_v58, %v1390_v48 }
 0x419   :  { %v1484_v3 = vpop.permute.xlu0 %1483 }
 0x41a   :  { %v1529_v54 = vsel %vm870_vm0, %v1521_v17, %v1484_v3 }
 0x41b   :  { %v1394_v50 = vpop.permute.xlu1 %1393 }
 0x41d   :  { %v1424_v47 = vpop.permute.xlu0 %1423 }
 0x41f   :  { %v1454_v23 = vpop.permute.xlu1 %1453 }
 0x421   :  { %v1456_v25 = vpop.permute.xlu0 %1455 }
 0x423   :  { %v1392_v42 = vpop.permute.xlu1 %1391 }
 0x424   :  { %v1507_v31 = vsel %vm185_vm1, %v1299_v27, %v1392_v42 }
 0x425   :  { %v1488_v29 = vpop.permute.xlu0 %1487  ;;  %v1515_v11 = vsel %vm852_vm14, %v1507_v31, %v1424_v47 }
 0x426   :  { %v1523_v62 = vsel %vm861_vm15, %v1515_v11, %v1456_v25 }
 0x427   :  { %v1430_v37 = vpop.permute.xlu1 %1429  ;;  %v1531_v3 = vsel %vm870_vm0, %v1523_v62, %v1488_v29 }
 0x429   :  { %v1486_v9 = vpop.permute.xlu0 %1485 }
 0x42b   :  { %v1462_v32 = vpop.permute.xlu1 %1461 }
 0x42d   :  { %v1384_v22 = vpop.permute.xlu0 %1383 }
 0x42e   :  { %v1503_v51 = vsel %vm185_vm1, %v1295_v26, %v1384_v22  ;;  %v1528_v26 = vsel %vm870_vm0, %v1520_v2, %v1482_v36  ;;  %v1284_v22 = vrot.slane %v4865_v40, 6 }
 0x42f   :  { %v1511_v24 = vsel %vm852_vm14, %v1503_v51, %v1416_v59  ;;  %v1458_v61 = vpop.permute.xlu1 %1457  ;;  %v1285_v59 = vrot.slane %v4976_v19, 6 }
 0x430   :  { %v1519_v14 = vsel %vm861_vm15, %v1511_v24, %v1448_v0  ;;  %v1289_v31 = vsel %vm560_vm11, %v1283_v30, %v1284_v22 }
 0x431   :  { %v1428_v53 = vpop.permute.xlu0 %1427  ;;  %v1527_v27 = vsel %vm870_vm0, %v1519_v14, %v1480_v46  ;;  %v1514_v46 = vsel %vm852_vm14, %v1506_v21, %v1422_v63  ;;  %v1508_v4 = vsel %vm185_vm1, %v1289_v31, %v1394_v50  ;;  %v1287_v47 = vsel %vm560_vm11, %v1285_v59, %v1286_v10  ;;  %v5117_v14 = vld [vmem:[%s6039_s4] sm:$0xff] }
 0x432   :  { %3915 = vmatprep.mubr.msk.f32.mxu1 %vm883_vm10, %v1527_v27  ;;  %v1522_v36 = vsel %vm861_vm15, %v1514_v46, %v1454_v23  ;;  %v1516_v63 = vsel %vm852_vm14, %v1508_v4, %v5036_v52  ;;  %v1288_v25 = vsel %vm560_vm11, %v1284_v22, %v1285_v59 }
 0x433   :  { %v1396_v0 = vpop.permute.xlu1 %1395  ;;  %3916 = vmatmul.mubr.msk.f32.vlgmr.msra.gmra.mxu1 %vm883_vm10, %v1528_v26  ;;  %v1530_v48 = vsel %vm870_vm0, %v1522_v36, %v1486_v9  ;;  %v1524_v23 = vsel %vm861_vm15, %v1516_v63, %v1458_v61  ;;  %v1537_v61 = vsub.s32 2, %v4378_v20 }
 0x434   :  { %3918 = vmatprep.mubr.msk.f32.mxu1 %vm883_vm10, %v1529_v54  ;;  %v1509_v29 = vsel %vm185_vm1, %v1288_v25, %v1396_v0 }
 0x435   :  { %v1490_v6 = vpop.permute.xlu0 %1489  ;;  %v1517_v52 = vsel %vm852_vm14, %v1509_v29, %v1428_v53  ;;  %v1538_v21 = vrot.slane %v5117_v14, %v1537_v61 }
 0x436   :  { %v1532_v12 = vsel %vm870_vm0, %v1524_v23, %v1490_v6 }
 0x437   :  { %v1398_v42 = vpop.permute.xlu1 %1397  ;;  %3919 = vmatmul.mubr.msk.f32.gmra.mxu1 %vm883_vm10, %v1530_v48 }
 0x438   :  { %v1510_v50 = vsel %vm185_vm1, %v1287_v47, %v1398_v42  ;;  %3921 = vmatprep.mubr.msk.f32.mxu1 %vm883_vm10, %v1531_v3 }
 0x439   :  { %v1518_v30 = vsel %vm852_vm14, %v1510_v50, %v1430_v37  ;;  %v1460_v10 = vpop.permute.xlu0 %1459  ;;  %v3571_v37 = vld [vmem:[%s6040_s3 + $0xb8] sm:$0xff] }
 0x43a   :  { %v1526_v8 = vsel %vm861_vm15, %v1518_v30, %v1462_v32  ;;  %v1525_v51 = vsel %vm861_vm15, %v1517_v52, %v1460_v10  ;;  %v3570_v32 = vld [vmem:[%s6040_s3 + $0xb0] sm:$0xff]  ;;  %3927 = vmatprep.subr.mxu0 %v3571_v37 }
 0x43b   :  { %3922 = vmatmul.mubr.msk.f32.gmra.mxu1 %vm883_vm10, %v1532_v12  ;;  %v1494_v9 = vpop.permute.xlu1 %1493  ;;  %3928 = vmatpush3.msra.mxu0 %v3571_v37 }
 0x43c   :  { %v1534_v24 = vsel %vm870_vm0, %v1526_v8, %v1494_v9  ;;  %3929 = vmatprep.subr.mxu0 %v3570_v32 }
 0x43d   :  { %v1492_v2 = vpop.permute.xlu0 %1491  ;;  %3930 = vmatpush3.msra.mxu0 %v3570_v32 }
 0x43e   :  { %v1533_v15 = vsel %vm870_vm0, %v1525_v51, %v1492_v2 }
 0x43f   :  { %3924 = vmatprep.mubr.msk.f32.mxu1 %vm883_vm10, %v1533_v15  ;;  %v1679_v58 = vpop.permute.xlu1 %1678 }
 0x440   :  { %3925 = vmatmul.mubr.msk.f32.gmra.mxu1 %vm883_vm10, %v1534_v24 }
 0x441   :  { %v1677_v11 = vpop.permute.xlu0 %1676 }
 0x443   :  { %v1683_v17 = vpop.permute.xlu1 %1682 }
 0x445   :  { %v1681_v0 = vpop.permute.xlu0 %1680 }
 0x447   :  { %v1687_v47 = vpop.permute.xlu1 %1686 }
 0x449   :  { %v1685_v23 = vpop.permute.xlu0 %1684 }
 0x44b   :  { %v1691_v51 = vpop.permute.xlu1 %1690 }
 0x44d   :  { %v1689_v32 = vpop.permute.xlu0 %1688 }
 0x4f3   :  { %v3917_v53 = vpop.f32.mrf.mxu1 }
 0x4f4   :  { %v1635_v27 = vadd.f32 %v3917_v53, %v1538_v21 }
 0x4f5   :  { %v1629_v26 = vpop.f32.mrf.mxu1 }
 0x4f6   :  { %v5120_v22 = vadd.f32 %v1679_v58, %v1635_v27  ;;  %v1630_v54 = vadd.f32 %v1629_v26, %v1538_v21 }
 0x4f7   :  { %v3920_v59 = vpop.f32.mrf.mxu1 }
 0x4f8   :  { %v3581_v31 = vmul.f32 -1.442695, %v5120_v22  ;;  %v5123_v46 = vadd.f32 %v1677_v11, %v1630_v54  ;;  %v1645_v62 = vadd.f32 %v3920_v59, %v1538_v21 }
 0x4f9   :  { %v1639_v4 = vpop.f32.mrf.mxu1 }
 0x4fa   :  { %4130 = vpow2.f32 %v3581_v31  ;;  %v3580_v36 = vmul.f32 -1.442695, %v5123_v46  ;;  %v5126_v6 = vadd.f32 %v1683_v17, %v1645_v62  ;;  %v1640_v48 = vadd.f32 %v1639_v4, %v1538_v21 }
 0x4fb   :  { %v3923_v3 = vpop.f32.mrf.mxu1 }
 0x4fc   :  { %4132 = vpow2.f32 %v3580_v36  ;;  %v3583_v42 = vmul.f32 -1.442695, %v5126_v6  ;;  %v5129_v63 = vadd.f32 %v1681_v0, %v1640_v48  ;;  %v1655_v25 = vadd.f32 %v3923_v3, %v1538_v21 }
 0x4fd   :  { %v1649_v50 = vpop.f32.mrf.mxu1 }
 0x4fe   :  { %4134 = vpow2.f32 %v3583_v42  ;;  %v3582_v29 = vmul.f32 -1.442695, %v5129_v63  ;;  %v5132_v30 = vadd.f32 %v1687_v47, %v1655_v25  ;;  %v1650_v10 = vadd.f32 %v1649_v50, %v1538_v21 }
 0x500   :  { %4136 = vpow2.f32 %v3582_v29  ;;  %v3585_v12 = vmul.f32 -1.442695, %v5132_v30  ;;  %v1704_v52 = vadd.f32 %v1685_v23, %v1650_v10  ;;  %v3926_v8 = vpop.f32.mrf.mxu1 }
 0x501   :  { %v1665_v9 = vadd.f32 %v3926_v8, %v1538_v21 }
 0x502   :  { %4138 = vpow2.f32 %v3585_v12  ;;  %v3584_v2 = vmul.f32 -1.442695, %v1704_v52  ;;  %v1659_v15 = vpop.f32.mrf.mxu1 }
 0x503   :  { %v1707_v24 = vadd.f32 %v1691_v51, %v1665_v9  ;;  %v1660_v37 = vadd.f32 %v1659_v15, %v1538_v21 }
 0x504   :  { %4140 = vpow2.f32 %v3584_v2 }
 0x505   :  { %v3587_v61 = vmul.f32 -1.442695, %v1707_v24  ;;  %v1706_v58 = vadd.f32 %v1689_v32, %v1660_v37 }
 0x507   :  { %v4131_v11 = vpop.eup %4130  ;;  %4142 = vpow2.f32 %v3587_v61  ;;  %v3586_v53 = vmul.f32 -1.442695, %v1706_v58 }
 0x508   :  { %v1741_v27 = vadd.f32 1.0, %v4131_v11 }
 0x509   :  { %v4133_v26 = vpop.eup %4132  ;;  %4144 = vpow2.f32 %v3586_v53 }
 0x50a   :  { %4146 = vrcp.f32 %v1741_v27  ;;  %v1740_v17 = vadd.f32 1.0, %v4133_v26 }
 0x50b   :  { %v4135_v54 = vpop.eup %4134 }
 0x50c   :  { %4148 = vrcp.f32 %v1740_v17  ;;  %v1743_v59 = vadd.f32 1.0, %v4135_v54 }
 0x50d   :  { %v4137_v0 = vpop.eup %4136 }
 0x50e   :  { %4150 = vrcp.f32 %v1743_v59  ;;  %v1742_v31 = vadd.f32 1.0, %v4137_v0 }
 0x50f   :  { %v4139_v62 = vpop.eup %4138 }
 0x510   :  { %4152 = vrcp.f32 %v1742_v31  ;;  %v1745_v21 = vadd.f32 1.0, %v4139_v62 }
 0x511   :  { %v4141_v4 = vpop.eup %4140 }
 0x512   :  { %4154 = vrcp.f32 %v1745_v21  ;;  %v1744_v36 = vadd.f32 1.0, %v4141_v4  ;;  %v1806_v21 = vsub.s32 6, %v4378_v20 }
 0x514   :  { %v4143_v48 = vpop.eup %4142  ;;  %4156 = vrcp.f32 %v1744_v36  ;;  %v5158_v4 = vrot.slane %v5117_v14, %v1806_v21  ;;  %v3602_v21 = vld [vmem:[%s6040_s3 + $0xf0] sm:$0xff] }
 0x515   :  { %v1747_v3 = vadd.f32 1.0, %v4143_v48 }
 0x516   :  { %v4145_v47 = vpop.eup %4144 }
 0x517   :  { %v4147_v42 = vpop.eup %4146  ;;  %4158 = vrcp.f32 %v1747_v3  ;;  %v1746_v25 = vadd.f32 1.0, %v4145_v47 }
 0x518   :  { %1774 = vrot.lane.b32.xlu1 %v4147_v42, %s4284_s26 }
 0x519   :  { %v4149_v50 = vpop.eup %4148  ;;  %4160 = vrcp.f32 %v1746_v25 }
 0x51a   :  { %1772 = vrot.lane.b32.xlu0 %v4149_v50, %s4284_s26  ;;  %4162 = vtanh.f32 %v5123_v46 }
 0x51b   :  { %v4151_v23 = vpop.eup %4150  ;;  %4164 = vtanh.f32 %v5120_v22 }
 0x51c   :  { %1778 = vrot.lane.b32.xlu1 %v4151_v23, %s4284_s26  ;;  %4166 = vtanh.f32 %v5129_v63 }
 0x51d   :  { %v4153_v29 = vpop.eup %4152  ;;  %4168 = vtanh.f32 %v5126_v6 }
 0x51e   :  { %1776 = vrot.lane.b32.xlu0 %v4153_v29, %s4284_s26  ;;  %4170 = vtanh.f32 %v1704_v52 }
 0x51f   :  { %v4155_v10 = vpop.eup %4154  ;;  %4172 = vtanh.f32 %v5132_v30 }
 0x520   :  { %1782 = vrot.lane.b32.xlu1 %v4155_v10, %s4284_s26  ;;  %4174 = vtanh.f32 %v1706_v58 }
 0x521   :  { %v4157_v12 = vpop.eup %4156  ;;  %4176 = vtanh.f32 %v1707_v24 }
 0x522   :  { %1780 = vrot.lane.b32.xlu0 %v4157_v12, %s4284_s26 }
 0x524   :  { %v4159_v8 = vpop.eup %4158 }
 0x525   :  { %1786 = vrot.lane.b32.xlu1 %v4159_v8, %s4284_s26 }
 0x526   :  { %v4161_v9 = vpop.eup %4160 }
 0x527   :  { %1784 = vrot.lane.b32.xlu0 %v4161_v9, %s4284_s26  ;;  %v4163_v2 = vpop.eup %4162 }
 0x528   :  { %v4165_v37 = vpop.eup %4164 }
 0x529   :  { %v4167_v46 = vpop.eup %4166 }
 0x52a   :  { %v4169_v63 = vpop.eup %4168 }
 0x52b   :  { %v4171_v30 = vpop.eup %4170 }
 0x52c   :  { %v4173_v24 = vpop.eup %4172 }
 0x52d   :  { %v4175_v54 = vpop.eup %4174 }
 0x52e   :  { %v4177_v0 = vpop.eup %4176 }
 0x58a   :  { %v1775_v51 = vpop.permute.xlu1 %1774 }
 0x58b   :  { %v1797_v61 = vmul.f32 %v4165_v37, %v1775_v51 }
 0x58c   :  { %v1773_v15 = vpop.permute.xlu0 %1772 }
 0x58d   :  { %v1796_v32 = vmul.f32 %v4163_v2, %v1773_v15 }
 0x58e   :  { %v1779_v11 = vpop.permute.xlu1 %1778 }
 0x58f   :  { %3931 = vmatprep.mubr.msk.f32.mxu0 %vm185_vm1, %v1796_v32  ;;  %v1799_v52 = vmul.f32 %v4169_v63, %v1779_v11 }
 0x590   :  { %v1777_v22 = vpop.permute.xlu0 %1776  ;;  %3932 = vmatmul.mubr.msk.f32.vlgmr.msra.gmra.mxu0 %vm185_vm1, %v1797_v61 }
 0x591   :  { %v1798_v6 = vmul.f32 %v4167_v46, %v1777_v22 }
 0x592   :  { %v1783_v53 = vpop.permute.xlu1 %1782 }
 0x593   :  { %3934 = vmatprep.mubr.msk.f32.mxu0 %vm185_vm1, %v1798_v6  ;;  %v1801_v26 = vmul.f32 %v4173_v24, %v1783_v53  ;;  %v3605_v53 = vld [vmem:[%s6040_s3 + $0x108] sm:$0xff] }
 0x594   :  { %v1781_v58 = vpop.permute.xlu0 %1780  ;;  %3935 = vmatmul.mubr.msk.f32.gmra.mxu0 %vm185_vm1, %v1799_v52  ;;  %3943 = vmatprep.subr.mxu0 %v3605_v53 }
 0x595   :  { %v1800_v27 = vmul.f32 %v4171_v30, %v1781_v58  ;;  %3944 = vmatpush3.msra.mxu0 %v3605_v53 }
 0x597   :  { %3937 = vmatprep.mubr.msk.f32.mxu0 %vm185_vm1, %v1800_v27  ;;  %v1787_v17 = vpop.permute.xlu1 %1786 }
 0x598   :  { %3938 = vmatmul.mubr.msk.f32.gmra.mxu0 %vm185_vm1, %v1801_v26  ;;  %v1803_v62 = vmul.f32 %v4177_v0, %v1787_v17  ;;  %v3604_v26 = vld [vmem:[%s6040_s3 + $0x100] sm:$0xff]  ;;  %v3603_v17 = vld [vmem:[%s6040_s3 + $0xf8] sm:$0xff] }
 0x599   :  { %v1785_v59 = vpop.permute.xlu0 %1784  ;;  %3945 = vmatprep.subr.mxu0 %v3604_v26 }
 0x59a   :  { %v1802_v31 = vmul.f32 %v4175_v54, %v1785_v59  ;;  %3946 = vmatpush3.msra.mxu0 %v3604_v26  ;;  %v3596_v26 = vld [vmem:[%s6040_s3 + $0xc0] sm:$0xff] }
 0x59b   :  { %3947 = vmatprep.subr.mxu0 %v3603_v17 }
 0x59c   :  { %3940 = vmatprep.mubr.msk.f32.mxu0 %vm185_vm1, %v1802_v31  ;;  %3948 = vmatpush3.msra.mxu0 %v3603_v17 }
 0x59d   :  { %3941 = vmatmul.mubr.msk.f32.gmra.mxu0 %vm185_vm1, %v1803_v62  ;;  %3949 = vmatprep.subr.mxu0 %v3602_v21 }
 0x59e   :  { %3950 = vmatpush3.msra.mxu0 %v3602_v21 }
 0x650   :  { %v3933_v36 = vpop.f32.mrf.mxu0 }
 0x651   :  { %v5161_v48 = vadd.f32 %v3933_v36, %v5158_v4 }
 0x652   :  { %v1898_v3 = vpop.f32.mrf.mxu0 }
 0x653   :  { %v5165_v47 = vadd.f32 %v5161_v48, %v4811_v1  ;;  %v5168_v42 = vadd.f32 %v1898_v3, %v5158_v4 }
 0x654   :  { %v3936_v25 = vpop.f32.mrf.mxu0 }
 0x655   :  { %v5172_v50 = vadd.f32 %v5168_v42, %v4818_v49  ;;  %v5175_v23 = vadd.f32 %v3936_v25, %v5158_v4  ;;  %2104 = vrot.lane.b32.xlu1 %v5165_v47, %s4285_s17  ;;  %v2015_v12 = vrot.slane %v5165_v47, 1  ;;  %v1991_v51 = vrot.slane %v5165_v47, 7 }
 0x656   :  { %v1908_v29 = vpop.f32.mrf.mxu0  ;;  %v2039_v61 = vrot.slane %v5165_v47, 2 }
 0x657   :  { %v5181_v10 = vadd.f32 %v5175_v23, %v4827_v33  ;;  %2102 = vrot.lane.b32.xlu0 %v5172_v50, %s4285_s17  ;;  %v2014_v1 = vrot.slane %v5172_v50, 1  ;;  %v5188_v49 = vadd.f32 %v1908_v29, %v5158_v4  ;;  %v1990_v9 = vrot.slane %v5172_v50, 7  ;;  %v3601_v29 = vld [vmem:[%s6040_s3 + $0xe8] sm:$0xff] }
 0x658   :  { %v3939_v8 = vpop.f32.mrf.mxu0  ;;  %v2038_v2 = vrot.slane %v5172_v50, 2  ;;  %3951 = vmatprep.subr.mxu0 %v3601_v29 }
 0x659   :  { %2108 = vrot.lane.b32.xlu1 %v5181_v10, %s4285_s17  ;;  %v2028_v33 = vsel %vm642_vm2, %v2014_v1, %v2015_v12  ;;  %v5200_v15 = vadd.f32 %v3939_v8, %v5158_v4  ;;  %v5205_v37 = vadd.f32 %v5188_v49, %v4851_v60  ;;  %v2004_v32 = vsel %vm601_vm3, %v1990_v9, %v1991_v51 }
 0x65a   :  { %v2052_v11 = vsel %vm683_vm4, %v2038_v2, %v2039_v61  ;;  %v1918_v22 = vpop.f32.mrf.mxu0  ;;  %v2017_v27 = vrot.slane %v5181_v10, 1  ;;  %v1993_v54 = vrot.slane %v5181_v10, 7  ;;  %v2041_v0 = vrot.slane %v5181_v10, 2  ;;  %3952 = vmatpush3.msra.mxu0 %v3601_v29 }
 0x65b   :  { %2134 = vrot.lane.b32.xlu0 %v2028_v33, %s4286_s18  ;;  %v5219_v46 = vadd.f32 %v5200_v15, %v4865_v40  ;;  %v2016_v60 = vrot.slane %v5205_v37, 1  ;;  %v2040_v63 = vrot.slane %v5205_v37, 2  ;;  %v5229_v6 = vadd.f32 %v1918_v22, %v5158_v4 }
 0x65c   :  { %v1992_v52 = vrot.slane %v5205_v37, 7 }
 0x65d   :  { %2072 = vrot.lane.b32.xlu1 %v2004_v32, %s4287_s19  ;;  %v2027_v40 = vsel %vm642_vm2, %v2015_v12, %v2016_v60  ;;  %v2051_v30 = vsel %vm683_vm4, %v2039_v61, %v2040_v63  ;;  %v5243_v58 = vadd.f32 %v5229_v6, %v4889_v44  ;;  %v2026_v44 = vsel %vm642_vm2, %v2016_v60, %v2017_v27  ;;  %v3942_v36 = vpop.f32.mrf.mxu0  ;;  %v3600_v12 = vld [vmem:[%s6040_s3 + $0xe0] sm:$0xff]  ;;  %v3599_v32 = vld [vmem:[%s6040_s3 + $0xd8] sm:$0xff]  ;;  %v3598_v61 = vld [vmem:[%s6040_s3 + $0xd0] sm:$0xff] }
 0x65e   :  { %v2003_v24 = vsel %vm601_vm3, %v1991_v51, %v1992_v52  ;;  %v2002_v59 = vsel %vm601_vm3, %v1992_v52, %v1993_v54  ;;  %v2050_v3 = vsel %vm683_vm4, %v2040_v63, %v2041_v0  ;;  %v1995_v25 = vrot.slane %v5219_v46, 7  ;;  %3953 = vmatprep.subr.mxu0 %v3600_v12 }
 0x65f   :  { %2166 = vrot.lane.b32.xlu0 %v2052_v11, %s4288_s20  ;;  %v1994_v31 = vrot.slane %v5243_v58, 7  ;;  %v2018_v62 = vrot.slane %v5243_v58, 1  ;;  %v5281_v33 = vadd.f32 %v3942_v36, %v5158_v4  ;;  %3954 = vmatpush3.msra.mxu0 %v3600_v12  ;;  %v2019_v60 = vrot.slane %v5219_v46, 1  ;;  %v1928_v63 = vpop.f32.mrf.mxu0 }
 0x660   :  { %3955 = vmatprep.subr.mxu0 %v3599_v32  ;;  %v2042_v53 = vrot.slane %v5243_v58, 2 }
 0x661   :  { %2112 = vrot.lane.b32.xlu1 %v5219_v46, %s4285_s17  ;;  %v2000_v8 = vsel %vm601_vm3, %v1994_v31, %v1995_v25  ;;  %v2025_v51 = vsel %vm642_vm2, %v2017_v27, %v2018_v62  ;;  %v5299_v22 = vadd.f32 %v5281_v33, %v4945_v41  ;;  %3956 = vmatpush3.msra.mxu0 %v3599_v32  ;;  %v3597_v41 = vld [vmem:[%s6040_s3 + $0xc8] sm:$0xff]  ;;  %v2043_v27 = vrot.slane %v5219_v46, 2 }
 0x662   :  { %v2033_v11 = vsel %vm431_vm5, %v2025_v51, 0.0  ;;  %v2024_v52 = vsel %vm642_vm2, %v2018_v62, %v2019_v60  ;;  %3957 = vmatprep.subr.mxu0 %v3598_v61 }
 0x663   :  { %2106 = vrot.lane.b32.xlu0 %v5205_v37, %s4285_s17  ;;  %3958 = vmatpush3.msra.mxu0 %v3598_v61  ;;  %v2021_v17 = vrot.slane %v5299_v22, 1  ;;  %v2045_v12 = vrot.slane %v5299_v22, 2 }
 0x664   :  { %3959 = vmatprep.subr.mxu0 %v3597_v41 }
 0x665   :  { %2136 = vrot.lane.b32.xlu1 %v2027_v40, %s4286_s18  ;;  %v2001_v40 = vsel %vm601_vm3, %v1993_v54, %v1994_v31  ;;  %3960 = vmatpush3.msra.mxu0 %v3597_v41  ;;  %v1997_v54 = vrot.slane %v5299_v22, 7  ;;  %v2029_v31 = vsel %vm642_vm2, %v2021_v17, %v2014_v1  ;;  %v2053_v32 = vsel %vm683_vm4, %v2045_v12, %v2038_v2  ;;  %v6087_v2 = vld [vmem:[#allocation11_spill] sm:$0xff] }
 0x666   :  { %3961 = vmatprep.subr.mxu0 %v3596_v26 }
 0x667   :  { %2168 = vrot.lane.b32.xlu0 %v2051_v30, %s4288_s20  ;;  %v5312_v30 = vadd.f32 %v1928_v63, %v5158_v4  ;;  %v2049_v4 = vsel %vm683_vm4, %v2041_v0, %v2042_v53  ;;  %3962 = vmatpush3.msra.mxu0 %v3596_v26  ;;  %v2005_v0 = vsel %vm601_vm3, %v1997_v54, %v1990_v9 }
 0x668   :  { %v2057_v62 = vsel %vm463_vm6, %v2049_v4, 0.0  ;;  %v2006_v1 = vsel %vm6085_vm8, %v2005_v0, 0.0  ;;  %vm6086_vm8 = vcmp.lt.s32.totalorder %v4612_v57, 32 }
 0x669   :  { %2074 = vrot.lane.b32.xlu1 %v2003_v24, %s4287_s19  ;;  %v2010_v24 = vsel %vm488_vm7, %v2001_v40, 0.0  ;;  %v2061_v61 = vsel %vm6086_vm8, %v2053_v32, 0.0  ;;  %v1969_v32 = vrot.slane %v5181_v10, 6 }
 0x66b   :  { %2138 = vrot.lane.b32.xlu0 %v2026_v44, %s4286_s18  ;;  %v2048_v44 = vsel %vm683_vm4, %v2042_v53, %v2043_v27 }
 0x66d   :  { %2076 = vrot.lane.b32.xlu1 %v2002_v59, %s4287_s19  ;;  %v5330_v59 = vadd.f32 %v5312_v30, %v4976_v19  ;;  %v2037_v19 = vsel %vm435_vm9, %v2029_v31, 0.0 }
 0x66f   :  { %2170 = vrot.lane.b32.xlu0 %v2050_v3, %s4288_s20  ;;  %v2020_v21 = vrot.slane %v5330_v59, 1  ;;  %v1996_v3 = vrot.slane %v5330_v59, 7  ;;  %v2044_v9 = vrot.slane %v5330_v59, 2 }
 0x671   :  { %2080 = vrot.lane.b32.xlu1 %v2000_v8, %s4287_s19  ;;  %v2023_v36 = vsel %vm642_vm2, %v2019_v60, %v2020_v21  ;;  %v1999_v29 = vsel %vm601_vm3, %v1995_v25, %v1996_v3  ;;  %v2047_v8 = vsel %vm683_vm4, %v2043_v27, %v2044_v9  ;;  %v1998_v51 = vsel %vm601_vm3, %v1996_v3, %v1997_v54 }
 0x672   :  { %v2022_v25 = vsel %vm642_vm2, %v2020_v21, %v2021_v17  ;;  %v1966_v3 = vrot.slane %v5172_v50, 6 }
 0x673   :  { %2110 = vrot.lane.b32.xlu0 %v5243_v58, %s4285_s17 }
 0x675   :  { %2140 = vrot.lane.b32.xlu1 %v2033_v11, %s4286_s18  ;;  %v2046_v11 = vsel %vm683_vm4, %v2044_v9, %v2045_v12  ;;  %v1970_v9 = vrot.slane %v5243_v58, 6  ;;  %v1968_v12 = vrot.slane %v5205_v37, 6 }
 0x677   :  { %2142 = vrot.lane.b32.xlu0 %v2024_v52, %s4286_s18 }
 0x679   :  { %2078 = vrot.lane.b32.xlu1 %v2010_v24, %s4287_s19 }
 0x67b   :  { %2174 = vrot.lane.b32.xlu0 %v2048_v44, %s4288_s20 }
 0x67d   :  { %2116 = vrot.lane.b32.xlu1 %v5299_v22, %s4285_s17 }
 0x67f   :  { %2172 = vrot.lane.b32.xlu0 %v2057_v62, %s4288_s20 }
 0x681   :  { %2148 = vrot.lane.b32.xlu1 %v2037_v19, %s4286_s18 }
 0x683   :  { %2070 = vrot.lane.b32.xlu0 %v2006_v1, %s4287_s19 }
 0x685   :  { %2144 = vrot.lane.b32.xlu1 %v2023_v36, %s4286_s18 }
 0x687   :  { %2114 = vrot.lane.b32.xlu0 %v5330_v59, %s4285_s17 }
 0x689   :  { %2082 = vrot.lane.b32.xlu1 %v1999_v29, %s4287_s19  ;;  %v1973_v29 = vrot.slane %v5299_v22, 6 }
 0x68b   :  { %2176 = vrot.lane.b32.xlu0 %v2047_v8, %s4288_s20 }
 0x68d   :  { %2084 = vrot.lane.b32.xlu1 %v1998_v51, %s4287_s19  ;;  %v1967_v51 = vrot.slane %v5165_v47, 6 }
 0x68f   :  { %2146 = vrot.lane.b32.xlu0 %v2022_v25, %s4286_s18 }
 0x691   :  { %2180 = vrot.lane.b32.xlu1 %v2061_v61, %s4288_s20  ;;  %v1980_v61 = vsel %vm560_vm11, %v1966_v3, %v1967_v51 }
 0x693   :  { %2178 = vrot.lane.b32.xlu0 %v2046_v11, %s4288_s20  ;;  %v1977_v11 = vsel %vm560_vm11, %v1969_v32, %v1970_v9 }
 0x695   :  { %2357 = vrot.lane.b32.xlu1 %v4720_v55, %s4288_s20 }
 0x697   :  { %2355 = vrot.lane.b32.xlu0 %v4722_v56, %s4288_s20 }
 0x699   :  { %2361 = vrot.lane.b32.xlu1 %v4725_v39, %s4288_s20  ;;  %v1986_v39 = vsel %vm520_vm12, %v1977_v11, 0.0 }
 0x69b   :  { %2359 = vrot.lane.b32.xlu0 %v4730_v18, %s4288_s20 }
 0x69d   :  { %2365 = vrot.lane.b32.xlu1 %v4732_v5, %s4288_s20 }
 0x69f   :  { %2363 = vrot.lane.b32.xlu0 %v4741_v43, %s4288_s20  ;;  %v1979_v43 = vsel %vm560_vm11, %v1967_v51, %v1968_v12 }
 0x6a1   :  { %2369 = vrot.lane.b32.xlu1 %v4751_v16, %s4288_s20 }
 0x6a3   :  { %2367 = vrot.lane.b32.xlu0 %v6087_v2, %s4288_s20  ;;  %v1981_v2 = vsel %vm560_vm11, %v1973_v29, %v1966_v3 }
 0x6a4   :  { %v1982_v55 = vsel %vm516_vm13, %v1981_v2, 0.0 }
 0x6c7   :  { %v2105_v60 = vpop.permute.xlu1 %2104 }
 0x6c9   :  { %v2103_v63 = vpop.permute.xlu0 %2102 }
 0x6cb   :  { %v2109_v40 = vpop.permute.xlu1 %2108 }
 0x6cd   :  { %v2135_v52 = vpop.permute.xlu0 %2134 }
 0x6cf   :  { %v2073_v53 = vpop.permute.xlu1 %2072 }
 0x6d0   :  { %v2191_v16 = vsel %vm185_vm1, %v1980_v61, %v2073_v53 }
 0x6d1   :  { %v2167_v41 = vpop.permute.xlu0 %2166  ;;  %v2199_v57 = vsel %vm852_vm14, %v2191_v16, %v2105_v60 }
 0x6d3   :  { %v5398_v24 = vpop.permute.xlu1 %2112 }
 0x6d5   :  { %v2107_v27 = vpop.permute.xlu0 %2106 }
 0x6d7   :  { %v2137_v26 = vpop.permute.xlu1 %2136 }
 0x6d8   :  { %v2207_v53 = vsel %vm861_vm15, %v2199_v57, %v2137_v26 }
 0x6d9   :  { %v2169_v17 = vpop.permute.xlu0 %2168 }
 0x6db   :  { %v2075_v44 = vpop.permute.xlu1 %2074 }
 0x6dc   :  { %v2192_v18 = vsel %vm185_vm1, %v1979_v43, %v2075_v44  ;;  %v1978_v44 = vsel %vm560_vm11, %v1968_v12, %v1969_v32 }
 0x6dd   :  { %v2139_v4 = vpop.permute.xlu0 %2138  ;;  %v2200_v51 = vsel %vm852_vm14, %v2192_v18, %v2107_v27 }
 0x6de   :  { %v2208_v57 = vsel %vm861_vm15, %v2200_v51, %v2139_v4 }
 0x6df   :  { %v2077_v54 = vpop.permute.xlu1 %2076 }
 0x6e0   :  { %v2193_v2 = vsel %vm185_vm1, %v1978_v44, %v2077_v54 }
 0x6e1   :  { %v2171_v31 = vpop.permute.xlu0 %2170 }
 0x6e2   :  { %v2216_v18 = vsel %vm870_vm0, %v2208_v57, %v2171_v31 }
 0x6e3   :  { %v2081_v62 = vpop.permute.xlu1 %2080 }
 0x6e5   :  { %v2111_v0 = vpop.permute.xlu0 %2110 }
 0x6e7   :  { %v2141_v19 = vpop.permute.xlu1 %2140 }
 0x6e9   :  { %v2143_v21 = vpop.permute.xlu0 %2142 }
 0x6eb   :  { %v2079_v1 = vpop.permute.xlu1 %2078 }
 0x6ec   :  { %v2194_v35 = vsel %vm185_vm1, %v1986_v39, %v2079_v1 }
 0x6ed   :  { %v2175_v36 = vpop.permute.xlu0 %2174  ;;  %v2202_v16 = vsel %vm852_vm14, %v2194_v35, %v2111_v0 }
 0x6ee   :  { %v2210_v27 = vsel %vm861_vm15, %v2202_v16, %v2143_v21 }
 0x6ef   :  { %v2117_v8 = vpop.permute.xlu1 %2116  ;;  %v2218_v31 = vsel %vm870_vm0, %v2210_v27, %v2175_v36 }
 0x6f1   :  { %v2173_v25 = vpop.permute.xlu0 %2172 }
 0x6f3   :  { %v2149_v5 = vpop.permute.xlu1 %2148 }
 0x6f5   :  { %v2071_v56 = vpop.permute.xlu0 %2070 }
 0x6f6   :  { %v2190_v3 = vsel %vm185_vm1, %v1982_v55, %v2071_v56  ;;  %v2215_v55 = vsel %vm870_vm0, %v2207_v53, %v2169_v17  ;;  %v1971_v56 = vrot.slane %v5219_v46, 6 }
 0x6f7   :  { %v2198_v61 = vsel %vm852_vm14, %v2190_v3, %v2103_v63  ;;  %v2145_v43 = vpop.permute.xlu1 %2144  ;;  %v1972_v63 = vrot.slane %v5330_v59, 6 }
 0x6f8   :  { %v2206_v11 = vsel %vm861_vm15, %v2198_v61, %v2135_v52  ;;  %v1976_v35 = vsel %vm560_vm11, %v1970_v9, %v1971_v56 }
 0x6f9   :  { %v2115_v60 = vpop.permute.xlu0 %2114  ;;  %v2214_v39 = vsel %vm870_vm0, %v2206_v11, %v2167_v41  ;;  %v2201_v41 = vsel %vm852_vm14, %v2193_v2, %v2109_v40  ;;  %v2195_v26 = vsel %vm185_vm1, %v1976_v35, %v2081_v62  ;;  %v1974_v0 = vsel %vm560_vm11, %v1972_v63, %v1973_v29 }
 0x6fa   :  { %3963 = vmatprep.mubr.msk.f32.mxu0 %vm883_vm10, %v2214_v39  ;;  %v2209_v17 = vsel %vm861_vm15, %v2201_v41, %v2141_v19  ;;  %v2203_v40 = vsel %vm852_vm14, %v2195_v26, %v5398_v24  ;;  %v1975_v21 = vsel %vm560_vm11, %v1971_v56, %v1972_v63 }
 0x6fb   :  { %v2083_v52 = vpop.permute.xlu1 %2082  ;;  %3964 = vmatmul.mubr.msk.f32.vlgmr.msra.gmra.mxu0 %vm883_vm10, %v2215_v55  ;;  %v2217_v54 = vsel %vm870_vm0, %v2209_v17, %v2173_v25  ;;  %v2211_v19 = vsel %vm861_vm15, %v2203_v40, %v2145_v43  ;;  %v2224_v43 = vsub.s32 3, %v4378_v20 }
 0x6fc   :  { %3966 = vmatprep.mubr.msk.f32.mxu0 %vm883_vm10, %v2216_v18  ;;  %v2196_v36 = vsel %vm185_vm1, %v1975_v21, %v2083_v52 }
 0x6fd   :  { %v2177_v4 = vpop.permute.xlu0 %2176  ;;  %v2204_v24 = vsel %vm852_vm14, %v2196_v36, %v2115_v60  ;;  %v2225_v11 = vrot.slane %v5117_v14, %v2224_v43 }
 0x6fe   :  { %v2219_v12 = vsel %vm870_vm0, %v2211_v19, %v2177_v4 }
 0x6ff   :  { %v2085_v1 = vpop.permute.xlu1 %2084  ;;  %3967 = vmatmul.mubr.msk.f32.gmra.mxu0 %vm883_vm10, %v2217_v54 }
 0x700   :  { %v2197_v62 = vsel %vm185_vm1, %v1974_v0, %v2085_v1  ;;  %3969 = vmatprep.mubr.msk.f32.mxu0 %vm883_vm10, %v2218_v31 }
 0x701   :  { %v2205_v9 = vsel %vm852_vm14, %v2197_v62, %v2117_v8  ;;  %v2147_v29 = vpop.permute.xlu0 %2146  ;;  %v3607_v8 = vld [vmem:[%s6040_s3 + $0x118] sm:$0xff] }
 0x702   :  { %v2213_v32 = vsel %vm861_vm15, %v2205_v9, %v2149_v5  ;;  %v2212_v3 = vsel %vm861_vm15, %v2204_v24, %v2147_v29  ;;  %v3606_v5 = vld [vmem:[%s6040_s3 + $0x110] sm:$0xff]  ;;  %3975 = vmatprep.subr.mxu1 %v3607_v8 }
 0x703   :  { %3970 = vmatmul.mubr.msk.f32.gmra.mxu0 %vm883_vm10, %v2219_v12  ;;  %v2181_v25 = vpop.permute.xlu1 %2180  ;;  %3976 = vmatpush3.msra.mxu1 %v3607_v8 }
 0x704   :  { %v2221_v61 = vsel %vm870_vm0, %v2213_v32, %v2181_v25  ;;  %3977 = vmatprep.subr.mxu1 %v3606_v5 }
 0x705   :  { %v2179_v53 = vpop.permute.xlu0 %2178  ;;  %3978 = vmatpush3.msra.mxu1 %v3606_v5 }
 0x706   :  { %v2220_v51 = vsel %vm870_vm0, %v2212_v3, %v2179_v53 }
 0x707   :  { %3972 = vmatprep.mubr.msk.f32.mxu0 %vm883_vm10, %v2220_v51  ;;  %v2358_v44 = vpop.permute.xlu1 %2357 }
 0x708   :  { %3973 = vmatmul.mubr.msk.f32.gmra.mxu0 %vm883_vm10, %v2221_v61 }
 0x709   :  { %v2356_v2 = vpop.permute.xlu0 %2355 }
 0x70b   :  { %v2362_v55 = vpop.permute.xlu1 %2361 }
 0x70d   :  { %v2360_v63 = vpop.permute.xlu0 %2359 }
 0x70f   :  { %v2366_v31 = vpop.permute.xlu1 %2365 }
 0x711   :  { %v2364_v62 = vpop.permute.xlu0 %2363 }
 0x713   :  { %v2370_v25 = vpop.permute.xlu1 %2369 }
 0x715   :  { %v2368_v8 = vpop.permute.xlu0 %2367 }
 0x7bb   :  { %v3965_v16 = vpop.f32.mrf.mxu0 }
 0x7bc   :  { %v2322_v60 = vadd.f32 %v3965_v16, %v2225_v11 }
 0x7bd   :  { %v2316_v39 = vpop.f32.mrf.mxu0 }
 0x7be   :  { %v5477_v57 = vadd.f32 %v2358_v44, %v2322_v60  ;;  %v2317_v56 = vadd.f32 %v2316_v39, %v2225_v11 }
 0x7bf   :  { %v3968_v18 = vpop.f32.mrf.mxu0 }
 0x7c0   :  { %v3617_v52 = vmul.f32 -1.442695, %v5477_v57  ;;  %v5480_v35 = vadd.f32 %v2356_v2, %v2317_v56  ;;  %v2332_v41 = vadd.f32 %v3968_v18, %v2225_v11 }
 0x7c1   :  { %v2326_v27 = vpop.f32.mrf.mxu0 }
 0x7c2   :  { %4178 = vpow2.f32 %v3617_v52  ;;  %v3616_v26 = vmul.f32 -1.442695, %v5480_v35  ;;  %v5483_v17 = vadd.f32 %v2362_v55, %v2332_v41  ;;  %v2327_v4 = vadd.f32 %v2326_v27, %v2225_v11 }
 0x7c3   :  { %v3971_v54 = vpop.f32.mrf.mxu0 }
 0x7c4   :  { %4180 = vpow2.f32 %v3616_v26  ;;  %v3619_v0 = vmul.f32 -1.442695, %v5483_v17  ;;  %v5486_v1 = vadd.f32 %v2360_v63, %v2327_v4  ;;  %v2342_v40 = vadd.f32 %v3971_v54, %v2225_v11 }
 0x7c5   :  { %v2336_v21 = vpop.f32.mrf.mxu0 }
 0x7c6   :  { %4182 = vpow2.f32 %v3619_v0  ;;  %v3618_v19 = vmul.f32 -1.442695, %v5486_v1  ;;  %v5489_v36 = vadd.f32 %v2366_v31, %v2342_v40  ;;  %v2337_v9 = vadd.f32 %v2336_v21, %v2225_v11 }
 0x7c8   :  { %4184 = vpow2.f32 %v3618_v19  ;;  %v3621_v29 = vmul.f32 -1.442695, %v5489_v36  ;;  %v2383_v12 = vadd.f32 %v2364_v62, %v2337_v9  ;;  %v3974_v24 = vpop.f32.mrf.mxu0 }
 0x7c9   :  { %v2352_v32 = vadd.f32 %v3974_v24, %v2225_v11 }
 0x7ca   :  { %4186 = vpow2.f32 %v3621_v29  ;;  %v3620_v3 = vmul.f32 -1.442695, %v2383_v12  ;;  %v2346_v53 = vpop.f32.mrf.mxu0 }
 0x7cb   :  { %v2386_v51 = vadd.f32 %v2370_v25, %v2352_v32  ;;  %v2347_v61 = vadd.f32 %v2346_v53, %v2225_v11 }
 0x7cc   :  { %4188 = vpow2.f32 %v3620_v3 }
 0x7cd   :  { %v3623_v5 = vmul.f32 -1.442695, %v2386_v51  ;;  %v2385_v43 = vadd.f32 %v2368_v8, %v2347_v61 }
 0x7cf   :  { %v4179_v44 = vpop.eup %4178  ;;  %4190 = vpow2.f32 %v3623_v5  ;;  %v3622_v2 = vmul.f32 -1.442695, %v2385_v43 }
 0x7d0   :  { %v2420_v16 = vadd.f32 1.0, %v4179_v44 }
 0x7d1   :  { %v4181_v60 = vpop.eup %4180  ;;  %4192 = vpow2.f32 %v3622_v2 }
 0x7d2   :  { %4194 = vrcp.f32 %v2420_v16  ;;  %v2419_v39 = vadd.f32 1.0, %v4181_v60 }
 0x7d3   :  { %v4183_v55 = vpop.eup %4182 }
 0x7d4   :  { %4196 = vrcp.f32 %v2419_v39  ;;  %v2422_v56 = vadd.f32 1.0, %v4183_v55 }
 0x7d5   :  { %v4185_v18 = vpop.eup %4184 }
 0x7d6   :  { %4198 = vrcp.f32 %v2422_v56  ;;  %v2421_v63 = vadd.f32 1.0, %v4185_v18 }
 0x7d7   :  { %v4187_v52 = vpop.eup %4186 }
 0x7d8   :  { %4200 = vrcp.f32 %v2421_v63  ;;  %v2424_v11 = vadd.f32 1.0, %v4187_v52  ;;  %v2485_v52 = vsub.s32 7, %v4378_v20 }
 0x7d9   :  { %v4189_v41 = vpop.eup %4188 }
 0x7da   :  { %4202 = vrcp.f32 %v2424_v11  ;;  %v2423_v27 = vadd.f32 1.0, %v4189_v41  ;;  %v2486_v11 = vrot.slane %v5117_v14, %v2485_v52 }
 0x7dc   :  { %v4191_v26 = vpop.eup %4190  ;;  %4204 = vrcp.f32 %v2423_v27  ;;  %v6088_v27 = vld [vmem:[#allocation12_spill] sm:$0xff] }
 0x7dd   :  { %v2426_v4 = vadd.f32 1.0, %v4191_v26  ;;  %v1946_v26 = vadd.f32 %v5161_v48, %v6088_v27 }
 0x7de   :  { %v4193_v54 = vpop.eup %4192 }
 0x7df   :  { %v4195_v31 = vpop.eup %4194  ;;  %4206 = vrcp.f32 %v2426_v4  ;;  %v2425_v0 = vadd.f32 1.0, %v4193_v54 }
 0x7e0   :  { %2453 = vrot.lane.b32.xlu1 %v4195_v31, %s4284_s26  ;;  %v6089_v31 = vld [vmem:[#allocation13_spill] sm:$0xff] }
 0x7e1   :  { %v4197_v40 = vpop.eup %4196  ;;  %4208 = vrcp.f32 %v2425_v0  ;;  %v1945_v0 = vadd.f32 %v5168_v42, %v6089_v31  ;;  %v6091_v42 = vld [vmem:[#allocation15_spill] sm:$0xff] }
 0x7e2   :  { %2451 = vrot.lane.b32.xlu0 %v4197_v40, %s4284_s26  ;;  %4210 = vtanh.f32 %v5480_v35 }
 0x7e3   :  { %v4199_v21 = vpop.eup %4198  ;;  %4212 = vtanh.f32 %v5477_v57 }
 0x7e4   :  { %2457 = vrot.lane.b32.xlu1 %v4199_v21, %s4284_s26  ;;  %4214 = vtanh.f32 %v5486_v1 }
 0x7e5   :  { %v4201_v62 = vpop.eup %4200  ;;  %4216 = vtanh.f32 %v5483_v17 }
 0x7e6   :  { %2455 = vrot.lane.b32.xlu0 %v4201_v62, %s4284_s26  ;;  %4218 = vtanh.f32 %v2383_v12 }
 0x7e7   :  { %v4203_v19 = vpop.eup %4202  ;;  %4220 = vtanh.f32 %v5489_v36 }
 0x7e8   :  { %2461 = vrot.lane.b32.xlu1 %v4203_v19, %s4284_s26  ;;  %4222 = vtanh.f32 %v2385_v43 }
 0x7e9   :  { %v4205_v9 = vpop.eup %4204  ;;  %4224 = vtanh.f32 %v2386_v51 }
 0x7ea   :  { %2459 = vrot.lane.b32.xlu0 %v4205_v9, %s4284_s26  ;;  %v6090_v9 = vld [vmem:[#allocation14_spill] sm:$0xff] }
 0x7ec   :  { %v4207_v29 = vpop.eup %4206 }
 0x7ed   :  { %2465 = vrot.lane.b32.xlu1 %v4207_v29, %s4284_s26  ;;  %v1948_v29 = vadd.f32 %v5175_v23, %v6090_v9 }
 0x7ee   :  { %v4209_v24 = vpop.eup %4208 }
 0x7ef   :  { %2463 = vrot.lane.b32.xlu0 %v4209_v24, %s4284_s26  ;;  %v4211_v25 = vpop.eup %4210 }
 0x7f0   :  { %v4213_v53 = vpop.eup %4212 }
 0x7f1   :  { %v4215_v35 = vpop.eup %4214 }
 0x7f2   :  { %v4217_v1 = vpop.eup %4216 }
 0x7f3   :  { %v4219_v36 = vpop.eup %4218 }
 0x7f4   :  { %v4221_v51 = vpop.eup %4220 }
 0x7f5   :  { %v4223_v39 = vpop.eup %4222 }
 0x7f6   :  { %v4225_v56 = vpop.eup %4224 }
 0x852   :  { %v2454_v32 = vpop.permute.xlu1 %2453 }
 0x853   :  { %v2476_v8 = vmul.f32 %v4213_v53, %v2454_v32 }
 0x854   :  { %v2452_v3 = vpop.permute.xlu0 %2451 }
 0x855   :  { %v2475_v61 = vmul.f32 %v4211_v25, %v2452_v3 }
 0x856   :  { %v2458_v5 = vpop.permute.xlu1 %2457 }
 0x857   :  { %3979 = vmatprep.mubr.msk.f32.mxu1 %vm185_vm1, %v2475_v61  ;;  %v2478_v12 = vmul.f32 %v4217_v1, %v2458_v5 }
 0x858   :  { %v2456_v57 = vpop.permute.xlu0 %2455  ;;  %3980 = vmatmul.mubr.msk.f32.vlgmr.msra.gmra.mxu1 %vm185_vm1, %v2476_v8 }
 0x859   :  { %v2477_v17 = vmul.f32 %v4215_v35, %v2456_v57 }
 0x85a   :  { %v2462_v44 = vpop.permute.xlu1 %2461 }
 0x85b   :  { %3982 = vmatprep.mubr.msk.f32.mxu1 %vm185_vm1, %v2477_v17  ;;  %v2480_v16 = vmul.f32 %v4221_v51, %v2462_v44 }
 0x85c   :  { %v2460_v43 = vpop.permute.xlu0 %2459  ;;  %3983 = vmatmul.mubr.msk.f32.gmra.mxu1 %vm185_vm1, %v2478_v12 }
 0x85d   :  { %v2479_v2 = vmul.f32 %v4219_v36, %v2460_v43  ;;  %v6093_v43 = vld [vmem:[#allocation17_spill] sm:$0xff] }
 0x85f   :  { %3985 = vmatprep.mubr.msk.f32.mxu1 %vm185_vm1, %v2479_v2  ;;  %v2466_v60 = vpop.permute.xlu1 %2465 }
 0x860   :  { %3986 = vmatmul.mubr.msk.f32.gmra.mxu1 %vm185_vm1, %v2480_v16  ;;  %v2482_v63 = vmul.f32 %v4225_v56, %v2466_v60 }
 0x861   :  { %v2464_v55 = vpop.permute.xlu0 %2463 }
 0x862   :  { %v2481_v18 = vmul.f32 %v4223_v39, %v2464_v55 }
 0x864   :  { %3988 = vmatprep.mubr.msk.f32.mxu1 %vm185_vm1, %v2481_v18 }
 0x865   :  { %3989 = vmatmul.mubr.msk.f32.gmra.mxu1 %vm185_vm1, %v2482_v63 }
 0x918   :  { %v3981_v41 = vpop.f32.mrf.mxu1 }
 0x919   :  { %v2583_v4 = vadd.f32 %v3981_v41, %v2486_v11 }
 0x91a   :  { %v2577_v54 = vpop.f32.mrf.mxu1 }
 0x91b   :  { %v5520_v40 = vadd.f32 %v2583_v4, %v5165_v47  ;;  %v5522_v21 = vadd.f32 %v2583_v4, %v1946_v26  ;;  %v2578_v62 = vadd.f32 %v2577_v54, %v2486_v11  ;;  %v1947_v47 = vadd.f32 %v5188_v49, %v6091_v42  ;;  %v6092_v49 = vld [vmem:[#allocation16_spill] sm:$0xff]  ;;  %v6095_v26 = vld [vmem:[#allocation19_spill] sm:$0xff] }
 0x91c   :  { %v3984_v19 = vpop.f32.mrf.mxu1  ;;  %v1950_v35 = vadd.f32 %v5200_v15, %v6092_v49  ;;  %v1949_v15 = vadd.f32 %v5229_v6, %v6093_v43  ;;  %v1951_v4 = vadd.f32 %v5312_v30, %v6095_v26  ;;  %v3634_v26 = vld [vmem:[%s6040_s3 + $0x130] sm:$0xff] }
 0x91d   :  { %v5527_v14 = vadd.f32 %v2578_v62, %v5172_v50  ;;  %v5529_v24 = vadd.f32 %v2578_v62, %v1945_v0  ;;  %v2593_v48 = vadd.f32 %v3984_v19, %v2486_v11  ;;  %2783 = vrot.lane.b32.xlu1 %v5520_v40, %s4285_s17  ;;  %v2694_v25 = vrot.slane %v5520_v40, 1  ;;  %v3641_v19 = vld [vmem:[%s6040_s3 + $0x168] sm:$0xff] }
 0x91e   :  { %v2587_v32 = vpop.f32.mrf.mxu1  ;;  %v2670_v12 = vrot.slane %v5520_v40, 7  ;;  %v2646_v36 = vrot.slane %v5520_v40, 6  ;;  %v2718_v39 = vrot.slane %v5520_v40, 2  ;;  %3991 = vmatprep.subr.mxu1 %v3641_v19 }
 0x91f   :  { %v5537_v3 = vadd.f32 %v2593_v48, %v5181_v10  ;;  %v5539_v53 = vadd.f32 %v2593_v48, %v1948_v29  ;;  %v2588_v23 = vadd.f32 %v2587_v32, %v2486_v11  ;;  %2781 = vrot.lane.b32.xlu0 %v5527_v14, %s4285_s17  ;;  %v2693_v50 = vrot.slane %v5527_v14, 1  ;;  %3992 = vmatpush3.msra.mxu1 %v3641_v19 }
 0x920   :  { %v3987_v61 = vpop.f32.mrf.mxu1  ;;  %v2669_v8 = vrot.slane %v5527_v14, 7  ;;  %v2645_v5 = vrot.slane %v5527_v14, 6  ;;  %v2717_v44 = vrot.slane %v5527_v14, 2  ;;  %v6100_v14 = vld [vmem:[#allocation4_spill] sm:$0xff] }
 0x921   :  { %v5548_v57 = vadd.f32 %v2588_v23, %v1947_v47  ;;  %v2603_v10 = vadd.f32 %v3987_v61, %v2486_v11  ;;  %2787 = vrot.lane.b32.xlu1 %v5537_v3, %s4285_s17  ;;  %v2707_v1 = vsel %vm642_vm2, %v2693_v50, %v2694_v25  ;;  %v5565_v16 = vadd.f32 %v2588_v23, %v5205_v37  ;;  %v6094_v37 = vld [vmem:[#allocation18_spill] sm:$0xff]  ;;  %v3639_v23 = vld [vmem:[%s6040_s3 + $0x158] sm:$0xff] }
 0x922   :  { %v2597_v17 = vpop.f32.mrf.mxu1  ;;  %v2683_v60 = vsel %vm601_vm3, %v2669_v8, %v2670_v12  ;;  %v5576_v6 = vsel %vm560_vm11, %v2645_v5, %v2646_v36  ;;  %v1952_v18 = vadd.f32 %v5281_v33, %v6094_v37  ;;  %v2731_v52 = vsel %vm683_vm4, %v2717_v44, %v2718_v39  ;;  %v3637_v37 = vld [vmem:[%s6040_s3 + $0x148] sm:$0xff] }
 0x923   :  { %v5561_v51 = vadd.f32 %v2603_v10, %v1950_v35  ;;  %v2598_v2 = vadd.f32 %v2597_v17, %v2486_v11  ;;  %2813 = vrot.lane.b32.xlu0 %v2707_v1, %s4286_s18  ;;  %v5588_v41 = vadd.f32 %v2603_v10, %v5219_v46  ;;  %v2695_v33 = vrot.slane %v5565_v16, 1 }
 0x924   :  { %v2719_v40 = vrot.slane %v5565_v16, 2  ;;  %v2671_v30 = vrot.slane %v5565_v16, 7  ;;  %v2647_v48 = vrot.slane %v5565_v16, 6  ;;  %v2648_v42 = vrot.slane %v5537_v3, 6 }
 0x925   :  { %v5578_v55 = vadd.f32 %v2598_v2, %v1949_v15  ;;  %v3990_v56 = vpop.f32.mrf.mxu1  ;;  %2751 = vrot.lane.b32.xlu1 %v2683_v60, %s4287_s19  ;;  %v2706_v46 = vsel %vm642_vm2, %v2694_v25, %v2695_v33  ;;  %v5607_v62 = vadd.f32 %v2598_v2, %v5243_v58  ;;  %v2672_v47 = vrot.slane %v5537_v3, 7 }
 0x926   :  { %v2613_v63 = vadd.f32 %v3990_v56, %v2486_v11  ;;  %v2730_v29 = vsel %vm683_vm4, %v2718_v39, %v2719_v40  ;;  %v2682_v58 = vsel %vm601_vm3, %v2670_v12, %v2671_v30  ;;  %v2650_v25 = vrot.slane %v5588_v41, 6 }
 0x927   :  { %v2607_v27 = vpop.f32.mrf.mxu1  ;;  %2845 = vrot.lane.b32.xlu0 %v2731_v52, %s4288_s20  ;;  %v2649_v32 = vrot.slane %v5607_v62, 6  ;;  %v5642_v35 = vsel %vm560_vm11, %v2646_v36, %v2647_v48  ;;  %v5646_v10 = vsel %vm560_vm11, %v2647_v48, %v2648_v42  ;;  %v2720_v17 = vrot.slane %v5537_v3, 2 }
 0x928   :  { %v5593_v54 = vadd.f32 %v2613_v63, %v1952_v18  ;;  %v2608_v31 = vadd.f32 %v2607_v27, %v2486_v11  ;;  %v5610_v11 = vadd.f32 %v2613_v63, %v5299_v22  ;;  %v2696_v22 = vrot.slane %v5537_v3, 1  ;;  %v3636_v18 = vld [vmem:[%s6040_s3 + $0x140] sm:$0xff]  ;;  %v3635_v27 = vld [vmem:[%s6040_s3 + $0x138] sm:$0xff] }
 0x929   :  { %2791 = vrot.lane.b32.xlu1 %v5588_v41, %s4285_s17  ;;  %v5653_v12 = vsel %vm560_vm11, %v2649_v32, %v2650_v25  ;;  %v5657_v36 = vsel %vm560_vm11, %v2648_v42, %v2649_v32  ;;  %v2681_v15 = vsel %vm601_vm3, %v2671_v30, %v2672_v47  ;;  %v2673_v3 = vrot.slane %v5607_v62, 7  ;;  %v6096_v32 = vld [vmem:[#allocation2_spill] sm:$0xff] }
 0x92a   :  { %v5598_v0 = vadd.f32 %v2608_v31, %v1951_v4  ;;  %v5617_v9 = vadd.f32 %v2608_v31, %v5330_v59  ;;  %v3640_v59 = vld [vmem:[%s6040_s3 + $0x160] sm:$0xff]  ;;  %v2652_v61 = vrot.slane %v5610_v11, 6  ;;  %v2705_v49 = vsel %vm642_vm2, %v2695_v33, %v2696_v22 }
 0x92b   :  { %2785 = vrot.lane.b32.xlu0 %v5565_v16, %s4285_s17  ;;  %3993 = vmatprep.subr.mxu1 %v3640_v59  ;;  %v2697_v60 = vrot.slane %v5607_v62, 1  ;;  %v2729_v39 = vsel %vm683_vm4, %v2719_v40, %v2720_v17  ;;  %v2674_v56 = vrot.slane %v5588_v41, 7  ;;  %v2698_v31 = vrot.slane %v5588_v41, 1 }
 0x92c   :  { %3994 = vmatpush3.msra.mxu1 %v3640_v59  ;;  %v2651_v1 = vrot.slane %v5617_v9, 6  ;;  %v5663_v43 = vsel %vm560_vm11, %v2652_v61, %v2645_v5  ;;  %v3638_v5 = vld [vmem:[%s6040_s3 + $0x150] sm:$0xff]  ;;  %v2680_v33 = vsel %vm601_vm3, %v2672_v47, %v2673_v3  ;;  %v2722_v19 = vrot.slane %v5588_v41, 2 }
 0x92d   :  { %2815 = vrot.lane.b32.xlu1 %v2706_v46, %s4286_s18  ;;  %3995 = vmatprep.subr.mxu1 %v3639_v23  ;;  %v2679_v63 = vsel %vm601_vm3, %v2673_v3, %v2674_v56  ;;  %v2704_v52 = vsel %vm642_vm2, %v2696_v22, %v2697_v60  ;;  %v2703_v40 = vsel %vm642_vm2, %v2697_v60, %v2698_v31  ;;  %v2721_v46 = vrot.slane %v5607_v62, 2  ;;  %v6102_v3 = vld [vmem:[#allocation6_spill] sm:$0xff]  ;;  %v6103_v60 = vld [vmem:[#allocation7_spill] sm:$0xff] }
 0x92e   :  { %3996 = vmatpush3.msra.mxu1 %v3639_v23  ;;  %v5670_v2 = vsel %vm560_vm11, %v2650_v25, %v2651_v1  ;;  %v5674_v16 = vsel %vm560_vm11, %v2651_v1, %v2652_v61  ;;  %v2712_v4 = vsel %vm431_vm5, %v2704_v52, 0.0  ;;  %v2689_v30 = vsel %vm488_vm7, %v2680_v33, 0.0 }
 0x92f   :  { %2847 = vrot.lane.b32.xlu0 %v2730_v29, %s4288_s20  ;;  %3997 = vmatprep.subr.mxu1 %v3638_v5  ;;  %v3632_v29 = vld [vmem:[%s6040_s3 + $0x120] sm:$0xff]  ;;  %v2728_v28 = vsel %vm683_vm4, %v2720_v17, %v2721_v46  ;;  %v2676_v41 = vrot.slane %v5610_v11, 7  ;;  %v2699_v47 = vrot.slane %v5617_v9, 1  ;;  %vm6097_vm5 = vcmp.ge.s32.totalorder %v6096_v32, 0 }
 0x930   :  { %3998 = vmatpush3.msra.mxu1 %v3638_v5  ;;  %v2736_v48 = vsel %vm463_vm6, %v2728_v28, 0.0  ;;  %v2675_v25 = vrot.slane %v5617_v9, 7  ;;  %v2724_v23 = vrot.slane %v5610_v11, 2  ;;  %vm6099_vm6 = vmmov %vm6086_vm8  ;;  %v6104_v5 = vld [vmem:[#allocation8_spill] sm:$0xff] }
 0x931   :  { %2753 = vrot.lane.b32.xlu1 %v2682_v58, %s4287_s19  ;;  %3999 = vmatprep.subr.mxu1 %v3637_v37  ;;  %v2727_v58 = vsel %vm683_vm4, %v2721_v46, %v2722_v19  ;;  %v2684_v42 = vsel %vm601_vm3, %v2676_v41, %v2669_v8  ;;  %v2702_v13 = vsel %vm642_vm2, %v2698_v31, %v2699_v47  ;;  %v2723_v8 = vrot.slane %v5617_v9, 2 }
 0x932   :  { %4000 = vmatpush3.msra.mxu1 %v3637_v37  ;;  %v2678_v45 = vsel %vm601_vm3, %v2674_v56, %v2675_v25  ;;  %v6106_v56 = vld [vmem:[#allocation10_spill] sm:$0xff]  ;;  %v6107_v37 = vld [vmem:[#allocation11_spill] sm:$0xff] }
 0x933   :  { %2817 = vrot.lane.b32.xlu0 %v2705_v49, %s4286_s18  ;;  %4001 = vmatprep.subr.mxu1 %v3636_v18  ;;  %v2726_v61 = vsel %vm683_vm4, %v2722_v19, %v2723_v8  ;;  %v2677_v49 = vsel %vm601_vm3, %v2675_v25, %v2676_v41 }
 0x934   :  { %4002 = vmatpush3.msra.mxu1 %v3636_v18 }
 0x935   :  { %2755 = vrot.lane.b32.xlu1 %v2681_v15, %s4287_s19  ;;  %4003 = vmatprep.subr.mxu1 %v3635_v27  ;;  %v2725_v15 = vsel %vm683_vm4, %v2723_v8, %v2724_v23  ;;  %v2661_v8 = vsel %vm516_vm13, %v5663_v43, 0.0 }
 0x936   :  { %4004 = vmatpush3.msra.mxu1 %v3635_v27 }
 0x937   :  { %2849 = vrot.lane.b32.xlu0 %v2729_v39, %s4288_s20  ;;  %4005 = vmatprep.subr.mxu1 %v3634_v26  ;;  %v6105_v39 = vld [vmem:[#allocation9_spill] sm:$0xff] }
 0x938   :  { %4006 = vmatpush3.msra.mxu1 %v3634_v26 }
 0x939   :  { %2759 = vrot.lane.b32.xlu1 %v2679_v63, %s4287_s19  ;;  %4007 = vmatprep.subr.mxu1 %v3633_v7 }
 0x93a   :  { %4008 = vmatpush3.msra.mxu1 %v3633_v7 }
 0x93b   :  { %2789 = vrot.lane.b32.xlu0 %v5607_v62, %s4285_s17  ;;  %v2700_v62 = vrot.slane %v5610_v11, 1  ;;  %4009 = vmatprep.subr.mxu1 %v3632_v29 }
 0x93c   :  { %4010 = vmatpush3.msra.mxu1 %v3632_v29 }
 0x93d   :  { %2819 = vrot.lane.b32.xlu1 %v2712_v4, %s4286_s18  ;;  %v2708_v22 = vsel %vm642_vm2, %v2700_v62, %v2693_v50  ;;  %v2685_v50 = vsel %vm6097_vm5, %v2684_v42, 0.0  ;;  %v2701_v1 = vsel %vm642_vm2, %v2699_v47, %v2700_v62 }
 0x93e   :  { %v2716_v59 = vsel %vm435_vm9, %v2708_v22, 0.0 }
 0x93f   :  { %2821 = vrot.lane.b32.xlu0 %v2703_v40, %s4286_s18 }
 0x941   :  { %2757 = vrot.lane.b32.xlu1 %v2689_v30, %s4287_s19 }
 0x943   :  { %2853 = vrot.lane.b32.xlu0 %v2727_v58, %s4288_s20 }
 0x945   :  { %2795 = vrot.lane.b32.xlu1 %v5610_v11, %s4285_s17 }
 0x947   :  { %2851 = vrot.lane.b32.xlu0 %v2736_v48, %s4288_s20 }
 0x949   :  { %2827 = vrot.lane.b32.xlu1 %v2716_v59, %s4286_s18 }
 0x94b   :  { %2749 = vrot.lane.b32.xlu0 %v2685_v50, %s4287_s19 }
 0x94d   :  { %2823 = vrot.lane.b32.xlu1 %v2702_v13, %s4286_s18  ;;  %v2665_v13 = vsel %vm520_vm12, %v5657_v36, 0.0 }
 0x94f   :  { %2793 = vrot.lane.b32.xlu0 %v5617_v9, %s4285_s17  ;;  %v2732_v9 = vsel %vm683_vm4, %v2724_v23, %v2717_v44  ;;  %v6101_v44 = vld [vmem:[#allocation5_spill] sm:$0xff] }
 0x950   :  { %v2740_v17 = vsel %vm6099_vm6, %v2732_v9, 0.0 }
 0x951   :  { %2761 = vrot.lane.b32.xlu1 %v2678_v45, %s4287_s19 }
 0x953   :  { %2855 = vrot.lane.b32.xlu0 %v2726_v61, %s4288_s20 }
 0x955   :  { %2763 = vrot.lane.b32.xlu1 %v2677_v49, %s4287_s19 }
 0x957   :  { %2825 = vrot.lane.b32.xlu0 %v2701_v1, %s4286_s18 }
 0x959   :  { %2859 = vrot.lane.b32.xlu1 %v2740_v17, %s4288_s20 }
 0x95b   :  { %2857 = vrot.lane.b32.xlu0 %v2725_v15, %s4288_s20 }
 0x95d   :  { %3036 = vrot.lane.b32.xlu1 %v6100_v14, %s4285_s17 }
 0x95f   :  { %3034 = vrot.lane.b32.xlu0 %v6101_v44, %s4285_s17 }
 0x961   :  { %3040 = vrot.lane.b32.xlu1 %v6102_v3, %s4285_s17 }
 0x963   :  { %3038 = vrot.lane.b32.xlu0 %v6103_v60, %s4285_s17 }
 0x965   :  { %3044 = vrot.lane.b32.xlu1 %v6104_v5, %s4285_s17 }
 0x967   :  { %3042 = vrot.lane.b32.xlu0 %v6105_v39, %s4285_s17 }
 0x969   :  { %3048 = vrot.lane.b32.xlu1 %v6106_v56, %s4285_s17 }
 0x96b   :  { %3046 = vrot.lane.b32.xlu0 %v6107_v37, %s4285_s17 }
 0x98f   :  { %v2784_v18 = vpop.permute.xlu1 %2783 }
 0x991   :  { %v2782_v63 = vpop.permute.xlu0 %2781 }
 0x993   :  { %v2788_v52 = vpop.permute.xlu1 %2787 }
 0x995   :  { %v2814_v27 = vpop.permute.xlu0 %2813 }
 0x997   :  { %v2752_v26 = vpop.permute.xlu1 %2751 }
 0x998   :  { %v2870_v47 = vsel %vm185_vm1, %v5576_v6, %v2752_v26 }
 0x999   :  { %v2846_v4 = vpop.permute.xlu0 %2845  ;;  %v2878_v45 = vsel %vm852_vm14, %v2870_v47, %v2784_v18 }
 0x99b   :  { %v2792_v31 = vpop.permute.xlu1 %2791 }
 0x99d   :  { %v2786_v33 = vpop.permute.xlu0 %2785 }
 0x99f   :  { %v2816_v40 = vpop.permute.xlu1 %2815 }
 0x9a0   :  { %v2886_v6 = vsel %vm861_vm15, %v2878_v45, %v2816_v40 }
 0x9a1   :  { %v2848_v46 = vpop.permute.xlu0 %2847 }
 0x9a2   :  { %v2894_v11 = vsel %vm870_vm0, %v2886_v6, %v2848_v46 }
 0x9a3   :  { %v2754_v7 = vpop.permute.xlu1 %2753 }
 0x9a4   :  { %v2871_v50 = vsel %vm185_vm1, %v5642_v35, %v2754_v7 }
 0x9a5   :  { %v2818_v30 = vpop.permute.xlu0 %2817  ;;  %v2879_v49 = vsel %vm852_vm14, %v2871_v50, %v2786_v33 }
 0x9a6   :  { %v2887_v17 = vsel %vm861_vm15, %v2879_v49, %v2818_v30 }
 0x9a7   :  { %v2756_v19 = vpop.permute.xlu1 %2755 }
 0x9a8   :  { %v2872_v36 = vsel %vm185_vm1, %v5646_v10, %v2756_v19  ;;  %v3642_v19 = vld [vmem:[%s6040_s3 + $0x170] sm:$0xff] }
 0x9a9   :  { %v2850_v29 = vpop.permute.xlu0 %2849  ;;  %v2880_v44 = vsel %vm852_vm14, %v2872_v36, %v2788_v52 }
 0x9aa   :  { %v2895_v15 = vsel %vm870_vm0, %v2887_v17, %v2850_v29  ;;  %v2903_v29 = vsub.s32 4, %v4378_v20 }
 0x9ab   :  { %v2760_v62 = vpop.permute.xlu1 %2759 }
 0x9ac   :  { %v2874_v3 = vsel %vm185_vm1, %v5653_v12, %v2760_v62 }
 0x9ad   :  { %v2790_v58 = vpop.permute.xlu0 %2789  ;;  %v2882_v18 = vsel %vm852_vm14, %v2874_v3, %v2792_v31 }
 0x9af   :  { %v2820_v28 = vpop.permute.xlu1 %2819 }
 0x9b0   :  { %v2888_v60 = vsel %vm861_vm15, %v2880_v44, %v2820_v28 }
 0x9b1   :  { %v2822_v41 = vpop.permute.xlu0 %2821 }
 0x9b3   :  { %v2758_v22 = vpop.permute.xlu1 %2757 }
 0x9b4   :  { %v2873_v23 = vsel %vm185_vm1, %v2665_v13, %v2758_v22 }
 0x9b5   :  { %v2854_v48 = vpop.permute.xlu0 %2853  ;;  %v2881_v38 = vsel %vm852_vm14, %v2873_v23, %v2790_v58  ;;  %v4275_v58 = vld [vmem:[%s6039_s4] sm:$0xff] }
 0x9b6   :  { %v2889_v10 = vsel %vm861_vm15, %v2881_v38, %v2822_v41  ;;  %v2904_v28 = vrot.slane %v4275_v58, %v2903_v29 }
 0x9b7   :  { %v2796_v42 = vpop.permute.xlu1 %2795  ;;  %v2897_v56 = vsel %vm870_vm0, %v2889_v10, %v2854_v48 }
 0x9b9   :  { %v2852_v59 = vpop.permute.xlu0 %2851 }
 0x9ba   :  { %v2896_v39 = vsel %vm870_vm0, %v2888_v60, %v2852_v59 }
 0x9bb   :  { %v2828_v32 = vpop.permute.xlu1 %2827 }
 0x9bd   :  { %v2750_v25 = vpop.permute.xlu0 %2749 }
 0x9be   :  { %v2869_v61 = vsel %vm185_vm1, %v2661_v8, %v2750_v25 }
 0x9bf   :  { %v2877_v35 = vsel %vm852_vm14, %v2869_v61, %v2782_v63  ;;  %v2824_v9 = vpop.permute.xlu1 %2823 }
 0x9c0   :  { %v2885_v34 = vsel %vm861_vm15, %v2877_v35, %v2814_v27  ;;  %v2890_v52 = vsel %vm861_vm15, %v2882_v18, %v2824_v9 }
 0x9c1   :  { %v2794_v43 = vpop.permute.xlu0 %2793  ;;  %v2893_v1 = vsel %vm870_vm0, %v2885_v34, %v2846_v4 }
 0x9c2   :  { %4011 = vmatprep.mubr.msk.f32.mxu1 %vm883_vm10, %v2893_v1 }
 0x9c3   :  { %v2762_v14 = vpop.permute.xlu1 %2761  ;;  %4012 = vmatmul.mubr.msk.f32.vlgmr.msra.gmra.mxu1 %vm883_vm10, %v2894_v11 }
 0x9c4   :  { %4014 = vmatprep.mubr.msk.f32.mxu1 %vm883_vm10, %v2895_v15  ;;  %v2875_v12 = vsel %vm185_vm1, %v5670_v2, %v2762_v14  ;;  %v3643_v2 = vld [vmem:[%s6040_s3 + $0x178] sm:$0xff] }
 0x9c5   :  { %v2856_v5 = vpop.permute.xlu0 %2855  ;;  %v2883_v33 = vsel %vm852_vm14, %v2875_v12, %v2794_v43  ;;  %4023 = vmatprep.subr.mxu0 %v3643_v2 }
 0x9c6   :  { %v2898_v4 = vsel %vm870_vm0, %v2890_v52, %v2856_v5  ;;  %4024 = vmatpush3.msra.mxu0 %v3643_v2 }
 0x9c7   :  { %v2764_v37 = vpop.permute.xlu1 %2763  ;;  %4015 = vmatmul.mubr.msk.f32.gmra.mxu1 %vm883_vm10, %v2896_v39  ;;  %4025 = vmatprep.subr.mxu0 %v3642_v19 }
 0x9c8   :  { %v2876_v63 = vsel %vm185_vm1, %v5674_v16, %v2764_v37  ;;  %4017 = vmatprep.mubr.msk.f32.mxu1 %vm883_vm10, %v2897_v56  ;;  %4026 = vmatpush3.msra.mxu0 %v3642_v19 }
 0x9c9   :  { %v2884_v27 = vsel %vm852_vm14, %v2876_v63, %v2796_v42  ;;  %v2826_v26 = vpop.permute.xlu0 %2825 }
 0x9ca   :  { %v2892_v31 = vsel %vm861_vm15, %v2884_v27, %v2828_v32  ;;  %v2891_v16 = vsel %vm861_vm15, %v2883_v33, %v2826_v26 }
 0x9cb   :  { %4018 = vmatmul.mubr.msk.f32.gmra.mxu1 %vm883_vm10, %v2898_v4  ;;  %v2860_v40 = vpop.permute.xlu1 %2859 }
 0x9cc   :  { %v2900_v30 = vsel %vm870_vm0, %v2892_v31, %v2860_v40 }
 0x9cd   :  { %v2858_v46 = vpop.permute.xlu0 %2857 }
 0x9ce   :  { %v2899_v7 = vsel %vm870_vm0, %v2891_v16, %v2858_v46  ;;  %vm6110_vm0 = vcmask 64512  }
 0x9cf   :  { %4020 = vmatprep.mubr.msk.f32.mxu1 %vm883_vm10, %v2899_v7  ;;  %v3037_v62 = vpop.permute.xlu1 %3036  ;;  %vm6111_vm2 = vmmov %vm6110_vm0 }
 0x9d0   :  { %4021 = vmatmul.mubr.msk.f32.gmra.mxu1 %vm883_vm10, %v2900_v30  ;;  %vm6112_vm3 = vmmov %vm6110_vm0 }
 0x9d1   :  { %v3035_v41 = vpop.permute.xlu0 %3034  ;;  %vm6113_vm4 = vmmov %vm6110_vm0 }
 0x9d2   :  { %vm6114_vm7 = vmmov %vm6110_vm0 }
 0x9d3   :  { %v3041_v59 = vpop.permute.xlu1 %3040  ;;  %vm6115_vm9 = vmmov %vm6110_vm0 }
 0x9d4   :  { %vm6116_vm10 = vmmov %vm6110_vm0 }
 0x9d5   :  { %v3039_v13 = vpop.permute.xlu0 %3038  ;;  %vm6117_vm11 = vmmov %vm6110_vm0 }
 0x9d7   :  { %v3045_v9 = vpop.permute.xlu1 %3044 }
 0x9d9   :  { %v3043_v1 = vpop.permute.xlu0 %3042 }
 0x9db   :  { %v3049_v60 = vpop.permute.xlu1 %3048 }
 0x9dd   :  { %v3047_v18 = vpop.permute.xlu0 %3046 }
 0xa83   :  { %v4013_v22 = vpop.f32.mrf.mxu1 }
 0xa84   :  { %v3001_v48 = vadd.f32 %v4013_v22, %v2904_v28 }
 0xa85   :  { %v2995_v42 = vpop.f32.mrf.mxu1 }
 0xa86   :  { %v5859_v47 = vadd.f32 %v3037_v62, %v3001_v48  ;;  %v2996_v32 = vadd.f32 %v2995_v42, %v2904_v28 }
 0xa87   :  { %v4016_v50 = vpop.f32.mrf.mxu1 }
 0xa88   :  { %v3653_v25 = vmul.f32 -1.442695, %v5859_v47  ;;  %v5862_v8 = vadd.f32 %v3035_v41, %v2996_v32  ;;  %v3011_v45 = vadd.f32 %v4016_v50, %v2904_v28 }
 0xa89   :  { %v3005_v23 = vpop.f32.mrf.mxu1 }
 0xa8a   :  { %4226 = vpow2.f32 %v3653_v25  ;;  %v3652_v61 = vmul.f32 -1.442695, %v5862_v8  ;;  %v5865_v6 = vadd.f32 %v3041_v59, %v3011_v45  ;;  %v3006_v49 = vadd.f32 %v3005_v23, %v2904_v28 }
 0xa8b   :  { %v4019_v35 = vpop.f32.mrf.mxu1 }
 0xa8c   :  { %4228 = vpow2.f32 %v3652_v61  ;;  %v3655_v34 = vmul.f32 -1.442695, %v5865_v6  ;;  %v5868_v36 = vadd.f32 %v3039_v13, %v3006_v49  ;;  %v3021_v38 = vadd.f32 %v4019_v35, %v2904_v28 }
 0xa8d   :  { %v3015_v43 = vpop.f32.mrf.mxu1 }
 0xa8e   :  { %4230 = vpow2.f32 %v3655_v34  ;;  %v3654_v11 = vmul.f32 -1.442695, %v5868_v36  ;;  %v5871_v17 = vadd.f32 %v3045_v9, %v3021_v38  ;;  %v3016_v15 = vadd.f32 %v3015_v43, %v2904_v28 }
 0xa90   :  { %4232 = vpow2.f32 %v3654_v11  ;;  %v3657_v14 = vmul.f32 -1.442695, %v5871_v17  ;;  %v3062_v44 = vadd.f32 %v3043_v1, %v3016_v15  ;;  %v4022_v10 = vpop.f32.mrf.mxu1 }
 0xa91   :  { %v3031_v3 = vadd.f32 %v4022_v10, %v2904_v28 }
 0xa92   :  { %4234 = vpow2.f32 %v3657_v14  ;;  %v3656_v5 = vmul.f32 -1.442695, %v3062_v44  ;;  %v3025_v39 = vpop.f32.mrf.mxu1 }
 0xa93   :  { %v3065_v56 = vadd.f32 %v3049_v60, %v3031_v3  ;;  %v3026_v37 = vadd.f32 %v3025_v39, %v2904_v28  ;;  %v32_v39 = vld [vmem:[%s6036_s1 + $0x10] sm:$0xff] }
 0xa94   :  { %4236 = vpow2.f32 %v3656_v5  ;;  %4039 = vmatprep.subr.mxu0 %v32_v39 }
 0xa95   :  { %v3659_v63 = vmul.f32 -1.442695, %v3065_v56  ;;  %v3064_v52 = vadd.f32 %v3047_v18, %v3026_v37  ;;  %v29_v37 = vld [vmem:[%s6039_s4 + $0x8] sm:$0x3]  ;;  %v6108_v18 = vsub.s32 0, %v4378_v20 }
 0xa97   :  { %v4227_v12 = vpop.eup %4226  ;;  %4238 = vpow2.f32 %v3659_v63  ;;  %v3658_v27 = vmul.f32 -1.442695, %v3064_v52  ;;  %v3165_v63 = vrot.slane %v29_v37, %v6108_v18 }
 0xa98   :  { %v3099_v26 = vadd.f32 1.0, %v4227_v12 }
 0xa99   :  { %v4229_v4 = vpop.eup %4228  ;;  %4240 = vpow2.f32 %v3658_v27 }
 0xa9a   :  { %4242 = vrcp.f32 %v3099_v26  ;;  %v3098_v33 = vadd.f32 1.0, %v4229_v4 }
 0xa9b   :  { %v4231_v31 = vpop.eup %4230 }
 0xa9c   :  { %4244 = vrcp.f32 %v3098_v33  ;;  %v3101_v40 = vadd.f32 1.0, %v4231_v31 }
 0xa9d   :  { %v4233_v16 = vpop.eup %4232 }
 0xa9e   :  { %4246 = vrcp.f32 %v3101_v40  ;;  %v3100_v46 = vadd.f32 1.0, %v4233_v16 }
 0xa9f   :  { %v4235_v7 = vpop.eup %4234 }
 0xaa0   :  { %4248 = vrcp.f32 %v3100_v46  ;;  %v3103_v30 = vadd.f32 1.0, %v4235_v7 }
 0xaa1   :  { %v4237_v2 = vpop.eup %4236 }
 0xaa2   :  { %4250 = vrcp.f32 %v3103_v30  ;;  %v3102_v19 = vadd.f32 1.0, %v4237_v2 }
 0xaa4   :  { %v4239_v29 = vpop.eup %4238  ;;  %4252 = vrcp.f32 %v3102_v19 }
 0xaa5   :  { %v3105_v62 = vadd.f32 1.0, %v4239_v29 }
 0xaa6   :  { %v4241_v58 = vpop.eup %4240 }
 0xaa7   :  { %v4243_v28 = vpop.eup %4242  ;;  %4254 = vrcp.f32 %v3105_v62  ;;  %v3104_v41 = vadd.f32 1.0, %v4241_v58 }
 0xaa8   :  { %3132 = vrot.lane.b32.xlu1 %v4243_v28, %s4284_s26 }
 0xaa9   :  { %v4245_v22 = vpop.eup %4244  ;;  %4256 = vrcp.f32 %v3104_v41 }
 0xaaa   :  { %3130 = vrot.lane.b32.xlu0 %v4245_v22, %s4284_s26  ;;  %4258 = vtanh.f32 %v5862_v8 }
 0xaab   :  { %v4247_v48 = vpop.eup %4246  ;;  %4260 = vtanh.f32 %v5859_v47 }
 0xaac   :  { %3136 = vrot.lane.b32.xlu1 %v4247_v48, %s4284_s26  ;;  %4262 = vtanh.f32 %v5868_v36 }
 0xaad   :  { %v4249_v42 = vpop.eup %4248  ;;  %4264 = vtanh.f32 %v5865_v6 }
 0xaae   :  { %3134 = vrot.lane.b32.xlu0 %v4249_v42, %s4284_s26  ;;  %4266 = vtanh.f32 %v3062_v44 }
 0xaaf   :  { %v4251_v59 = vpop.eup %4250  ;;  %4268 = vtanh.f32 %v5871_v17 }
 0xab0   :  { %3140 = vrot.lane.b32.xlu1 %v4251_v59, %s4284_s26  ;;  %4270 = vtanh.f32 %v3064_v52 }
 0xab1   :  { %v4253_v32 = vpop.eup %4252  ;;  %4272 = vtanh.f32 %v3065_v56  ;;  %v31_v56 = vld [vmem:[%s6036_s1 + $0x8] sm:$0xff]  ;;  %s4290_s1 = smov 8  }
 0xab2   :  { %3138 = vrot.lane.b32.xlu0 %v4253_v32, %s4284_s26 }
 0xab4   :  { %v4255_v50 = vpop.eup %4254 }
 0xab5   :  { %3144 = vrot.lane.b32.xlu1 %v4255_v50, %s4284_s26  ;;  %v6109_v50 = vsub.s32 1, %v4378_v20 }
 0xab6   :  { %v4257_v13 = vpop.eup %4256 }
 0xab7   :  { %3142 = vrot.lane.b32.xlu0 %v4257_v13, %s4284_s26  ;;  %v4259_v45 = vpop.eup %4258  ;;  %v3306_v13 = vrot.slane %v29_v37, %v6109_v50 }
 0xab8   :  { %v4261_v61 = vpop.eup %4260 }
 0xab9   :  { %v4263_v8 = vpop.eup %4262 }
 0xaba   :  { %v4265_v34 = vpop.eup %4264 }
 0xabb   :  { %v4267_v43 = vpop.eup %4266 }
 0xabc   :  { %v4269_v11 = vpop.eup %4268 }
 0xabd   :  { %v4271_v44 = vpop.eup %4270 }
 0xabe   :  { %v4273_v3 = vpop.eup %4272 }
 0xb1a   :  { %v3133_v25 = vpop.permute.xlu1 %3132 }
 0xb1b   :  { %v3155_v35 = vmul.f32 %v4261_v61, %v3133_v25 }
 0xb1c   :  { %v3131_v23 = vpop.permute.xlu0 %3130 }
 0xb1d   :  { %v3154_v49 = vmul.f32 %v4259_v45, %v3131_v23 }
 0xb1e   :  { %v3137_v9 = vpop.permute.xlu1 %3136 }
 0xb1f   :  { %4027 = vmatprep.mubr.msk.f32.mxu0 %vm185_vm1, %v3154_v49  ;;  %v3157_v36 = vmul.f32 %v4265_v34, %v3137_v9 }
 0xb20   :  { %v3135_v47 = vpop.permute.xlu0 %3134  ;;  %4028 = vmatmul.mubr.msk.f32.vlgmr.msra.gmra.mxu0 %vm185_vm1, %v3155_v35 }
 0xb21   :  { %v3156_v6 = vmul.f32 %v4263_v8, %v3135_v47  ;;  %4040 = vmatpush3.msra.mxu0 %v32_v39 }
 0xb22   :  { %v3141_v38 = vpop.permute.xlu1 %3140  ;;  %4041 = vmatprep.subr.mxu0 %v31_v56 }
 0xb23   :  { %4030 = vmatprep.mubr.msk.f32.mxu0 %vm185_vm1, %v3156_v6  ;;  %v3159_v15 = vmul.f32 %v4269_v11, %v3141_v38  ;;  %4042 = vmatpush3.msra.mxu0 %v31_v56  ;;  %v4278_v56 = vld [vmem:[%s6037_s0 + $0x18] sm:$0xff] }
 0xb24   :  { %v3139_v1 = vpop.permute.xlu0 %3138  ;;  %4031 = vmatmul.mubr.msk.f32.gmra.mxu0 %vm185_vm1, %v3157_v36 }
 0xb25   :  { %v3158_v17 = vmul.f32 %v4267_v43, %v3139_v1 }
 0xb27   :  { %4033 = vmatprep.mubr.msk.f32.mxu0 %vm185_vm1, %v3158_v17  ;;  %v3145_v14 = vpop.permute.xlu1 %3144  ;;  %v4276_v17 = vld [vmem:[%s6037_s0 + $0x8] sm:$0xff] }
 0xb28   :  { %4034 = vmatmul.mubr.msk.f32.gmra.mxu0 %vm185_vm1, %v3159_v15  ;;  %v3161_v5 = vmul.f32 %v4273_v3, %v3145_v14 }
 0xb29   :  { %v3143_v10 = vpop.permute.xlu0 %3142 }
 0xb2a   :  { %v3160_v60 = vmul.f32 %v4271_v44, %v3143_v10  ;;  %v4277_v10 = vld [vmem:[%s6037_s0] sm:$0xff] }
 0xb2c   :  { %4036 = vmatprep.mubr.msk.f32.mxu0 %vm185_vm1, %v3160_v60 }
 0xb2d   :  { %4037 = vmatmul.mubr.msk.f32.gmra.mxu0 %vm185_vm1, %v3161_v5 }
 0xbe0   :  { %v4029_v52 = vpop.f32.mrf.mxu0 }
 0xbe1   :  { %v3262_v12 = vadd.f32 %v4029_v52, %v3165_v63 }
 0xbe2   :  { %v3256_v27 = vpop.f32.mrf.mxu0 }
 0xbe3   :  { %v5907_v26 = vadd.f32 %v3262_v12, %v5522_v21  ;;  %v3257_v4 = vadd.f32 %v3256_v27, %v3165_v63  ;;  %v4279_v12 = vld [vmem:[%s6037_s0 + $0x10] sm:$0xff] }
 0xbe4   :  { %v4032_v33 = vpop.f32.mrf.mxu0 }
 0xbe5   :  { %v5910_v31 = vadd.f32 %v3257_v4, %v5529_v24  ;;  %v3272_v40 = vadd.f32 %v4032_v33, %v3165_v63  ;;  %3317 = vrot.lane.b32.xlu1 %v5907_v26, %s4284_s26 }
 0xbe6   :  { %v3266_v16 = vpop.f32.mrf.mxu0 }
 0xbe7   :  { %v5915_v46 = vadd.f32 %v3272_v40, %v5539_v53  ;;  %v3267_v7 = vadd.f32 %v3266_v16, %v3165_v63  ;;  %3315 = vrot.lane.b32.xlu0 %v5910_v31, %s4284_s26 }
 0xbe8   :  { %v4035_v30 = vpop.f32.mrf.mxu0 }
 0xbe9   :  { %v5920_v21 = vadd.f32 %v3267_v7, %v5548_v57  ;;  %v3282_v2 = vadd.f32 %v4035_v30, %v3165_v63  ;;  %3321 = vrot.lane.b32.xlu1 %v5915_v46, %s4284_s26  ;;  %v4281_v30 = vld [vmem:[%s6037_s0 + $0x20] sm:$0xff] }
 0xbea   :  { %v3276_v24 = vpop.f32.mrf.mxu0 }
 0xbeb   :  { %v5925_v19 = vadd.f32 %v3282_v2, %v5561_v51  ;;  %v3277_v29 = vadd.f32 %v3276_v24, %v3165_v63  ;;  %3319 = vrot.lane.b32.xlu0 %v5920_v21, %s4284_s26 }
 0xbed   :  { %v5930_v53 = vadd.f32 %v3277_v29, %v5578_v55  ;;  %3325 = vrot.lane.b32.xlu1 %v5925_v19, %s4284_s26  ;;  %v4038_v57 = vpop.f32.mrf.mxu0 }
 0xbee   :  { %v3292_v62 = vadd.f32 %v4038_v57, %v3165_v63 }
 0xbef   :  { %v3286_v58 = vpop.f32.mrf.mxu0  ;;  %3323 = vrot.lane.b32.xlu0 %v5930_v53, %s4284_s26 }
 0xbf0   :  { %v5937_v28 = vadd.f32 %v3292_v62, %v5593_v54  ;;  %v3287_v51 = vadd.f32 %v3286_v58, %v3165_v63  ;;  %v4282_v62 = vld [vmem:[%s6037_s0 + $0x38] sm:$0xff] }
 0xbf2   :  { %v5940_v41 = vadd.f32 %v3287_v51, %v5598_v0  ;;  %3329 = vrot.lane.b32.xlu1 %v5937_v28, %s4284_s26 }
 0xbf4   :  { %3327 = vrot.lane.b32.xlu0 %v5940_v41, %s4284_s26 }
 0xc57   :  { %v3318_v55 = vpop.permute.xlu1 %3317 }
 0xc59   :  { %v3316_v22 = vpop.permute.xlu0 %3315 }
 0xc5a   :  { %4043 = vmatprep.mubr.msk.f32.mxu0 %vm185_vm1, %v3316_v22 }
 0xc5b   :  { %v3322_v48 = vpop.permute.xlu1 %3321  ;;  %4044 = vmatmul.mubr.msk.f32.vlgmr.msra.gmra.mxu0 %vm185_vm1, %v3318_v55  ;;  %v4283_v55 = vld [vmem:[%s6037_s0 + $0x30] sm:$0xff] }
 0xc5d   :  { %v3320_v42 = vpop.permute.xlu0 %3319 }
 0xc5e   :  { %4046 = vmatprep.mubr.msk.f32.mxu0 %vm185_vm1, %v3320_v42 }
 0xc5f   :  { %4047 = vmatmul.mubr.msk.f32.gmra.mxu0 %vm185_vm1, %v3322_v48  ;;  %v3326_v54 = vpop.permute.xlu1 %3325 }
 0xc61   :  { %v3324_v0 = vpop.permute.xlu0 %3323 }
 0xc62   :  { %4049 = vmatprep.mubr.msk.f32.mxu0 %vm185_vm1, %v3324_v0 }
 0xc63   :  { %4050 = vmatmul.mubr.msk.f32.gmra.mxu0 %vm185_vm1, %v3326_v54 }
 0xc64   :  { %v3330_v32 = vpop.permute.xlu1 %3329 }
 0xc66   :  { %v3328_v59 = vpop.permute.xlu0 %3327 }
 0xc67   :  { %4052 = vmatprep.mubr.msk.f32.mxu0 %vm185_vm1, %v3328_v59 }
 0xc68   :  { %4053 = vmatmul.mubr.msk.f32.gmra.mxu0 %vm185_vm1, %v3330_v32 }
 0xd1b   :  { %v4045_v25 = vpop.f32.mrf.mxu0 }
 0xd1c   :  { %v3419_v45 = vadd.f32 %v4045_v25, %v3306_v13 }
 0xd1d   :  { %v3413_v23 = vpop.f32.mrf.mxu0 }
 0xd1e   :  { %v3414_v61 = vadd.f32 %v3413_v23, %v3306_v13  ;;  %3462 = vrot.lane.b32.xlu1 %v3419_v45, %s4290_s1 }
 0xd1f   :  { %v4048_v49 = vpop.f32.mrf.mxu0 }
 0xd20   :  { %v3429_v35 = vadd.f32 %v4048_v49, %v3306_v13  ;;  %3460 = vrot.lane.b32.xlu0 %v3414_v61, %s4290_s1 }
 0xd21   :  { %v3423_v9 = vpop.f32.mrf.mxu0 }
 0xd22   :  { %v3424_v8 = vadd.f32 %v3423_v9, %v3306_v13  ;;  %3466 = vrot.lane.b32.xlu1 %v3429_v35, %s4290_s1 }
 0xd23   :  { %v4051_v47 = vpop.f32.mrf.mxu0 }
 0xd24   :  { %v3439_v34 = vadd.f32 %v4051_v47, %v3306_v13  ;;  %3464 = vrot.lane.b32.xlu0 %v3424_v8, %s4290_s1 }
 0xd25   :  { %v3433_v6 = vpop.f32.mrf.mxu0 }
 0xd26   :  { %v3434_v36 = vadd.f32 %v3433_v6, %v3306_v13  ;;  %3470 = vrot.lane.b32.xlu1 %v3439_v34, %s4290_s1 }
 0xd28   :  { %3468 = vrot.lane.b32.xlu0 %v3434_v36, %s4290_s1  ;;  %v4054_v20 = vpop.f32.mrf.mxu0 }
 0xd29   :  { %v3449_v38 = vadd.f32 %v4054_v20, %v3306_v13 }
 0xd2a   :  { %v3443_v43 = vpop.f32.mrf.mxu0 }
 0xd2b   :  { %v3444_v1 = vadd.f32 %v3443_v43, %v3306_v13  ;;  %3474 = vrot.lane.b32.xlu1 %v3449_v38, %s4290_s1 }
 0xd2d   :  { %3472 = vrot.lane.b32.xlu0 %v3444_v1, %s4290_s1 }
 0xd90   :  { %v3463_v11 = vpop.permute.xlu1 %3462 }
 0xd91   :  { %v3485_v15 = vadd.f32 %v4276_v17, %v3463_v11 }
 0xd92   :  { %v3461_v14 = vpop.permute.xlu0 %3460 }
 0xd93   :  { %v3493_v44 = vsel %vm6110_vm0, %v4276_v17, %v3485_v15  ;;  %v3484_v3 = vadd.f32 %v4277_v10, %v3461_v14 }
 0xd94   :  { %v3501_v60 = vsel %vm185_vm1, %v3493_v44, %v5907_v26  ;;  %v3467_v5 = vpop.permute.xlu1 %3466 }
 0xd95   :  { %3509 = vst.msk [vmem:[%s6041_s5 + $0x8] sm:$0xff] %vm852_vm14, %v3501_v60  ;;  %v3492_v39 = vsel %vm6111_vm2, %v4277_v10, %v3484_v3  ;;  %v3487_v37 = vadd.f32 %v4278_v56, %v3467_v5 }
 0xd96   :  { %v3500_v18 = vsel %vm185_vm1, %v3492_v39, %v5910_v31  ;;  %v3465_v63 = vpop.permute.xlu0 %3464  ;;  %v4280_v31 = vld [vmem:[%s6037_s0 + $0x28] sm:$0xff] }
 0xd97   :  { %3508 = vst.msk [vmem:[%s6041_s5] sm:$0xff] %vm852_vm14, %v3500_v18  ;;  %v3495_v52 = vsel %vm6112_vm3, %v4278_v56, %v3487_v37  ;;  %v3486_v27 = vadd.f32 %v4279_v12, %v3465_v63 }
 0xd98   :  { %v3503_v26 = vsel %vm185_vm1, %v3495_v52, %v5915_v46  ;;  %v3471_v4 = vpop.permute.xlu1 %3470 }
 0xd99   :  { %3511 = vst.msk [vmem:[%s6041_s5 + $0x18] sm:$0xff] %vm852_vm14, %v3503_v26  ;;  %v3494_v33 = vsel %vm6113_vm4, %v4279_v12, %v3486_v27  ;;  %v3489_v40 = vadd.f32 %v4280_v31, %v3471_v4 }
 0xd9a   :  { %v3502_v16 = vsel %vm185_vm1, %v3494_v33, %v5920_v21  ;;  %v3469_v7 = vpop.permute.xlu0 %3468 }
 0xd9b   :  { %3510 = vst.msk [vmem:[%s6041_s5 + $0x10] sm:$0xff] %vm852_vm14, %v3502_v16  ;;  %v3497_v46 = vsel %vm6114_vm7, %v4280_v31, %v3489_v40  ;;  %v3488_v2 = vadd.f32 %v4281_v30, %v3469_v7 }
 0xd9c   :  { %v3505_v24 = vsel %vm185_vm1, %v3497_v46, %v5925_v19 }
 0xd9d   :  { %3513 = vst.msk [vmem:[%s6041_s5 + $0x28] sm:$0xff] %vm852_vm14, %v3505_v24  ;;  %v3496_v21 = vsel %vm6115_vm9, %v4281_v30, %v3488_v2  ;;  %v3475_v29 = vpop.permute.xlu1 %3474 }
 0xd9e   :  { %v3504_v57 = vsel %vm185_vm1, %v3496_v21, %v5930_v53  ;;  %v3491_v58 = vadd.f32 %v4282_v62, %v3475_v29 }
 0xd9f   :  { %3512 = vst.msk [vmem:[%s6041_s5 + $0x20] sm:$0xff] %vm852_vm14, %v3504_v57  ;;  %v3473_v19 = vpop.permute.xlu0 %3472 }
 0xda0   :  { %v3499_v51 = vsel %vm6116_vm10, %v4282_v62, %v3491_v58  ;;  %v3490_v22 = vadd.f32 %v4283_v55, %v3473_v19 }
 0xda1   :  { %v3507_v53 = vsel %vm185_vm1, %v3499_v51, %v5937_v28 }
 0xda2   :  { %3515 = vst.msk [vmem:[%s6041_s5 + $0x38] sm:$0xff] %vm852_vm14, %v3507_v53  ;;  %v3498_v48 = vsel %vm6117_vm11, %v4283_v55, %v3490_v22 }
 0xda3   :  { %v3506_v42 = vsel %vm185_vm1, %v3498_v48, %v5940_v41 }
 0xda4   :  { %3514 = vst.msk [vmem:[%s6041_s5 + $0x30] sm:$0xff] %vm852_vm14, %v3506_v42 }

</bundles_post_ra>
